<compile_context>
chip_gen: v5e
topology: v5e:2x2
jax: 0.10.0
libtpu: 0.0.40
codegen_flags: <defaults>
</compile_context>

<pallas_src>
import numpy as np
import jax
import jax.numpy as jnp
from jax.experimental import pallas as pl
from jax.experimental.pallas import tpu as pltpu

# ------------------------- model dimensions -------------------------
B = 2            # batch
C_IN = 3         # input channels
HW = 16          # input spatial size
C1, C2 = 8, 16   # conv widths
C_LAST = 8       # channels of last conv (512 in real VGG19)
H2 = HW // 2     # spatial size after the first maxpool (= 8)
P = 2            # adaptive-avg-pool target (7 in real VGG19)
PP = P * P
H1 = 64          # classifier hidden width (4096 in real VGG19)
NC = 10          # number of classes (1000 in real VGG19)
NC_PAD = 128     # lane-dense padded logits width


# ------------------------- in-kernel helpers -------------------------
def _conv3x3_relu(pad_ref, w_ref, b_ref, h, w, cin, cout):
    """3x3 conv (stride 1) reading a zero-padded (h+2, w+2, cin) VMEM ref.

    In-kernel im2col: 9 shifted patch loads, each a bf16 MXU dot accumulated
    in f32.  Returns (h*w, cout) f32 rows in (row, col) order, bias+ReLU done.
    """
    acc = jnp.zeros((h * w, cout), jnp.float32)
    t = 0
    for kh in range(3):
        for kw in range(3):
            patch = pad_ref[kh:kh + h, kw:kw + w, :].reshape(h * w, cin)
            acc = acc + jnp.dot(patch.astype(jnp.bfloat16), w_ref[t],
                                preferred_element_type=jnp.float32)
            t += 1
    return jnp.maximum(acc + b_ref[...], 0.0)


def _maxpool2x2(y2d, h, w, c, row_ref):
    """2x2 stride-2 max pool of y2d = (h*w, c) rows in (row, col) order.

    Row (H) pooling uses a tile-aligned leading-dim split; column (W) pooling
    stores the half-pooled rows to VMEM and uses stride-2 sublane reads.
    Returns (h//2 * w//2, c).
    """
    h2, w2 = h // 2, w // 2
    y4 = y2d.reshape(h2, 2, w, c)
    row_ref[0:h2 * w, :] = jnp.maximum(y4[:, 0], y4[:, 1]).reshape(h2 * w, c)
    even = row_ref[pl.ds(0, h2 * w2, stride=2), :]
    odd = row_ref[pl.ds(1, h2 * w2, stride=2), :]
    return jnp.maximum(even, odd)


# ------------------------- kernel 1: fused conv trunk -------------------------
def _trunk_kernel(x_ref, w1_ref, b1_ref, w2_ref, b2_ref, w3_ref, b3_ref,
                  out_ref, pad2_ref, pad3_ref, row1_ref, row2_ref):
    # features_0 analogue: conv1 + ReLU  (input arrives pre zero-padded)
    y1 = _conv3x3_relu(x_ref, w1_ref, b1_ref, HW, HW, C_IN, C1)      # (256, 8)
    # MaxPool2d(2,2): 16x16 -> 8x8
    p1 = _maxpool2x2(y1, HW, HW, C1, row1_ref)                       # (64, 8)

    # conv2 + ReLU (zero-pad the pooled map inside VMEM)
    pad2_ref[...] = jnp.zeros(pad2_ref.shape, pad2_ref.dtype)
    pad2_ref[1:H2 + 1, 1:H2 + 1, :] = p1.reshape(H2, H2, C1)
    y2 = _conv3x3_relu(pad2_ref, w2_ref, b2_ref, H2, H2, C1, C2)     # (64, 16)

    # conv3 + ReLU  (= last_conv)
    pad3_ref[...] = jnp.zeros(pad3_ref.shape, pad3_ref.dtype)
    pad3_ref[1:H2 + 1, 1:H2 + 1, :] = y2.reshape(H2, H2, C2)
    y3 = _conv3x3_relu(pad3_ref, w3_ref, b3_ref, H2, H2, C2, C_LAST)  # (64, 8)

    # features_1: final MaxPool2d(2,2): 8x8 -> 4x4
    mp = _maxpool2x2(y3, H2, H2, C_LAST, row2_ref)                   # (16, 8)

    # AdaptiveAvgPool2d -> (2,2): exact 2x2 mean of the 4x4 map, rows emitted
    # in channel-major flatten order p = i*P + j (matches torch.flatten on
    # NCHW).  Same leading-split + stride-2 trick as the max pools (reusing
    # row2_ref, whose contents are already consumed), single block store.
    h4 = mp.reshape(P, 2, 2 * P, C_LAST)                             # (2,2,4,C)
    row2_ref[0:P * 2 * P, :] = (h4[:, 0] + h4[:, 1]).reshape(P * 2 * P, C_LAST)
    even = row2_ref[pl.ds(0, PP, stride=2), :]
    odd = row2_ref[pl.ds(1, PP, stride=2), :]
    out_ref[...] = (even + odd) * 0.25                               # (PP, C)


def trunk_forward(x_pad_nhwc, w1, b1, w2, b2, w3, b3):
    hp = HW + 2
    return pl.pallas_call(
        _trunk_kernel,
        out_shape=jax.ShapeDtypeStruct((B, PP, C_LAST), jnp.float32),
        grid=(B,),
        in_specs=[
            pl.BlockSpec((None, hp, hp, C_IN), lambda b: (b, 0, 0, 0)),
            pl.BlockSpec((9, C_IN, C1), lambda b: (0, 0, 0)),
            pl.BlockSpec((1, C1), lambda b: (0, 0)),
            pl.BlockSpec((9, C1, C2), lambda b: (0, 0, 0)),
            pl.BlockSpec((1, C2), lambda b: (0, 0)),
            pl.BlockSpec((9, C2, C_LAST), lambda b: (0, 0, 0)),
            pl.BlockSpec((1, C_LAST), lambda b: (0, 0)),
        ],
        out_specs=pl.BlockSpec((None, PP, C_LAST), lambda b: (b, 0, 0)),
        scratch_shapes=[
            pltpu.VMEM((H2 + 2, H2 + 2, C1), jnp.float32),   # conv2 padded in
            pltpu.VMEM((H2 + 2, H2 + 2, C2), jnp.float32),   # conv3 padded in
            pltpu.VMEM((H2 * HW, C1), jnp.float32),          # pool1 row buffer
            pltpu.VMEM(((H2 // 2) * H2, C_LAST), jnp.float32),  # pool2/avg buf
        ],
        compiler_params=pltpu.CompilerParams(
            dimension_semantics=("parallel",)),              # v7x: 2 TCs
    )(x_pad_nhwc, w1, b1, w2, b2, w3, b3)


# ------------------------- kernel 2: channel-batched classifier ----------------
def _classifier_kernel(p0_ref, w1_ref, b1_ref, w2_ref, b2_ref, w3_ref, b3_ref,
                       pen_ref, fc_ref):
    # p0: (C_LAST, PP) avg-pooled features of batch row 0.
    # The per-channel zeroing loop of the module reduces to using, for each
    # channel row c, only fc1 weight rows [c*PP : (c+1)*PP] -> per-channel
    # weight slices, no masking, no grid loop.  At real scale (PP=49) this
    # would be a batched MXU contraction; at PP=4 a 4-term broadcast-mul-add.
    p0 = p0_ref[...]
    h1 = jnp.zeros((C_LAST, H1), jnp.float32)
    for p in range(PP):
        h1 = h1 + p0[:, p:p + 1] * w1_ref[p].astype(jnp.float32)
    h1 = jnp.maximum(h1 + b1_ref[...], 0.0)
    # TODO(synk): nn.Dropout treated as identity (eval-mode semantics).
    h2 = jnp.dot(h1.astype(jnp.bfloat16), w2_ref[...],
                 preferred_element_type=jnp.float32) + b2_ref[...]
    h2 = jnp.maximum(h2, 0.0)                      # classifier_0 output
    fc = jnp.dot(h2.astype(jnp.bfloat16), w3_ref[...],
                 preferred_element_type=jnp.float32) + b3_ref[...]
    pen_ref[...] = h2                              # (C_LAST, H1)
    fc_ref[...] = fc                               # (C_LAST, NC_PAD) lane-dense


def classifier_forward(pooled0, w1p, b1, w2, b2, w3p, b3p):
    return pl.pallas_call(
        _classifier_kernel,
        out_shape=(jax.ShapeDtypeStruct((C_LAST, H1), jnp.float32),
                   jax.ShapeDtypeStruct((C_LAST, NC_PAD), jnp.float32)),
        grid=(1,),
        in_specs=[
            pl.BlockSpec((C_LAST, PP), lambda i: (0, 0)),
            pl.BlockSpec((PP, C_LAST, H1), lambda i: (0, 0, 0)),
            pl.BlockSpec((1, H1), lambda i: (0, 0)),
            pl.BlockSpec((H1, H1), lambda i: (0, 0)),
            pl.BlockSpec((1, H1), lambda i: (0, 0)),
            pl.BlockSpec((H1, NC_PAD), lambda i: (0, 0)),
            pl.BlockSpec((1, NC_PAD), lambda i: (0, 0)),
        ],
        out_specs=(pl.BlockSpec((C_LAST, H1), lambda i: (0, 0)),
                   pl.BlockSpec((C_LAST, NC_PAD), lambda i: (0, 0))),
    )(pooled0, w1p, b1, w2, b2, w3p, b3p)


# ------------------------- parameters -------------------------
def init_params(key):
    ks = jax.random.split(key, 12)

    def w(k, shape, scale=0.1):
        return jax.random.normal(k, shape, jnp.float32) * scale

    return {
        "conv1_w": w(ks[0], (3, 3, C_IN, C1)),
        "conv1_b": w(ks[1], (C1,), 0.01),
        "conv2_w": w(ks[2], (3, 3, C1, C2)),
        "conv2_b": w(ks[3], (C2,), 0.01),
        "conv3_w": w(ks[4], (3, 3, C2, C_LAST)),
        "conv3_b": w(ks[5], (C_LAST,), 0.01),
        "fc1_w": w(ks[6], (C_LAST * PP, H1)),   # (in, out), in = channel-major
        "fc1_b": w(ks[7], (H1,), 0.01),
        "fc2_w": w(ks[8], (H1, H1)),
        "fc2_b": w(ks[9], (H1,), 0.01),
        "fc3_w": w(ks[10], (H1, NC)),
        "fc3_b": w(ks[11], (NC,), 0.01),
    }


# ------------------------- forward (VGG19Keep1) -------------------------
def vgg19keep1_forward(x_nchw, params):
    # Weight layout prep (tiny, done once under jit): bf16 MXU operands.
    cw1 = params["conv1_w"].reshape(9, C_IN, C1).astype(jnp.bfloat16)
    cw2 = params["conv2_w"].reshape(9, C1, C2).astype(jnp.bfloat16)
    cw3 = params["conv3_w"].reshape(9, C2, C_LAST).astype(jnp.bfloat16)
    cb1 = params["conv1_b"].reshape(1, C1)
    cb2 = params["conv2_b"].reshape(1, C2)
    cb3 = params["conv3_b"].reshape(1, C_LAST)
    # fc1 rearranged to (PP, C_LAST, H1): w1p[p, c, :] = fc1_w[c*PP + p, :]
    w1p = (params["fc1_w"].reshape(C_LAST, PP, H1)
           .transpose(1, 0, 2).astype(jnp.bfloat16))
    b1 = params["fc1_b"].reshape(1, H1)
    w2 = params["fc2_w"].astype(jnp.bfloat16)
    b2 = params["fc2_b"].reshape(1, H1)
    # lane-dense padded logits weight/bias (slice back to NC in the wrapper)
    w3p = jnp.zeros((H1, NC_PAD), jnp.bfloat16).at[:, :NC].set(
        params["fc3_w"].astype(jnp.bfloat16))
    b3p = jnp.zeros((1, NC_PAD), jnp.float32).at[0, :NC].set(params["fc3_b"])

    # NCHW -> NHWC and zero-pad for conv1 (input prep glue only).
    x = jnp.transpose(x_nchw, (0, 2, 3, 1)).astype(jnp.float32)
    x = jnp.pad(x, ((0, 0), (1, 1), (1, 1), (0, 0)))

    # Kernel 1: whole conv trunk + pools, output (B, PP, C_LAST).
    pooled = trunk_forward(x, cw1, cb1, cw2, cb2, cw3, cb3)
    # Module keeps batch element 0 only; arrange channels onto the M axis.
    pooled0 = jnp.transpose(pooled[0], (1, 0))          # (C_LAST, PP)

    # Kernel 2: channel-batched classifier (per-channel loop == M rows).
    pen, fc_pad = classifier_forward(pooled0, w1p, b1, w2, b2, w3p, b3p)
    return pen, fc_pad[:, :NC]


if __name__ == "__main__":
    key = jax.random.PRNGKey(0)
    kx, kp = jax.random.split(key)
    x = jax.random.normal(kx, (B, C_IN, HW, HW), jnp.float32)
    params = init_params(kp)

    pen, fc = jax.jit(vgg19keep1_forward)(x, params)
    jax.block_until_ready((pen, fc))

    penultimate_list = np.asarray(pen)   # (C_LAST, H1)  ~ (512, 4096) real VGG19
    last_fc_list = np.asarray(fc)        # (C_LAST, NC)  ~ (512, 1000) real VGG19
    assert penultimate_list.shape == (C_LAST, H1)
    assert last_fc_list.shape == (C_LAST, NC)
    assert np.all(np.isfinite(penultimate_list)) and np.all(np.isfinite(last_fc_list))
    print("KERNEL_OK")
</pallas_src>

<mosaic_0001>
module attributes {stable_mosaic.version = 11 : i64} {
  func.func @_trunk_kernel(%arg0: i32, %arg1: memref<1x18x18x3xf32, #tpu.memory_space<vmem>>, %arg2: memref<9x3x8xbf16, #tpu.memory_space<vmem>>, %arg3: memref<1x8xf32, #tpu.memory_space<vmem>>, %arg4: memref<9x8x16xbf16, #tpu.memory_space<vmem>>, %arg5: memref<1x16xf32, #tpu.memory_space<vmem>>, %arg6: memref<9x16x8xbf16, #tpu.memory_space<vmem>>, %arg7: memref<1x8xf32, #tpu.memory_space<vmem>>, %arg8: memref<1x4x8xf32, #tpu.memory_space<vmem>>, %arg9: memref<10x10x8xf32, #tpu.memory_space<vmem>>, %arg10: memref<10x10x16xf32, #tpu.memory_space<vmem>>, %arg11: memref<128x8xf32, #tpu.memory_space<vmem>>, %arg12: memref<32x8xf32, #tpu.memory_space<vmem>>) attributes {dimension_semantics = [#tpu.dimension_semantics<parallel>], iteration_bounds = array<i64: 2>, scalar_prefetch = 0 : i64, scratch_operands = 4 : i64, tpu.core_type = #tpu.core_type<tc>, window_params = [{transform_indices = @transform_0, window_bounds = array<i64: 1, 18, 18, 3>}, {pipeline_mode = #tpu.pipeline_mode<synchronous>, transform_indices = @transform_1, window_bounds = array<i64: 9, 3, 8>}, {pipeline_mode = #tpu.pipeline_mode<synchronous>, transform_indices = @transform_2, window_bounds = array<i64: 1, 8>}, {pipeline_mode = #tpu.pipeline_mode<synchronous>, transform_indices = @transform_3, window_bounds = array<i64: 9, 8, 16>}, {pipeline_mode = #tpu.pipeline_mode<synchronous>, transform_indices = @transform_4, window_bounds = array<i64: 1, 16>}, {pipeline_mode = #tpu.pipeline_mode<synchronous>, transform_indices = @transform_5, window_bounds = array<i64: 9, 16, 8>}, {pipeline_mode = #tpu.pipeline_mode<synchronous>, transform_indices = @transform_6, window_bounds = array<i64: 1, 8>}, {transform_indices = @transform_7, window_bounds = array<i64: 1, 4, 8>}]} {
    %cst = arith.constant 0.000000e+00 : f32
    %0 = vector.broadcast %cst : f32 to vector<256x8xf32>
    %c0 = arith.constant 0 : index
    %c0_0 = arith.constant 0 : index
    %c0_1 = arith.constant 0 : index
    %c0_2 = arith.constant 0 : index
    %1 = vector.load %arg1[%c0, %c0_0, %c0_1, %c0_2] : memref<1x18x18x3xf32, #tpu.memory_space<vmem>>, vector<1x16x16x3xf32>
    %2 = vector.shape_cast %1 : vector<1x16x16x3xf32> to vector<16x16x3xf32>
    %3 = vector.shape_cast %2 : vector<16x16x3xf32> to vector<256x3xf32>
    %4 = arith.truncf %3 : vector<256x3xf32> to vector<256x3xbf16>
    %c0_3 = arith.constant 0 : index
    %c0_4 = arith.constant 0 : index
    %c0_5 = arith.constant 0 : index
    %5 = vector.load %arg2[%c0_3, %c0_4, %c0_5] : memref<9x3x8xbf16, #tpu.memory_space<vmem>>, vector<1x3x8xbf16>
    %6 = vector.shape_cast %5 : vector<1x3x8xbf16> to vector<3x8xbf16>
    %cst_6 = arith.constant dense<0.000000e+00> : vector<256x8xf32>
    %7 = tpu.matmul %4, %6, %cst_6 {dimension_numbers = #tpu.dot_dimension_numbers<[1], [0], [0], [1], [0, 0, 1, 1], [], []>} : vector<256x3xbf16>, vector<3x8xbf16>, vector<256x8xf32> -> vector<256x8xf32>
    %8 = arith.addf %0, %7 : vector<256x8xf32>
    %c0_7 = arith.constant 0 : index
    %c0_8 = arith.constant 0 : index
    %c1 = arith.constant 1 : index
    %c0_9 = arith.constant 0 : index
    %9 = vector.load %arg1[%c0_7, %c0_8, %c1, %c0_9] : memref<1x18x18x3xf32, #tpu.memory_space<vmem>>, vector<1x16x16x3xf32>
    %10 = vector.shape_cast %9 : vector<1x16x16x3xf32> to vector<16x16x3xf32>
    %11 = vector.shape_cast %10 : vector<16x16x3xf32> to vector<256x3xf32>
    %12 = arith.truncf %11 : vector<256x3xf32> to vector<256x3xbf16>
    %c1_10 = arith.constant 1 : index
    %c0_11 = arith.constant 0 : index
    %c0_12 = arith.constant 0 : index
    %13 = vector.load %arg2[%c1_10, %c0_11, %c0_12] : memref<9x3x8xbf16, #tpu.memory_space<vmem>>, vector<1x3x8xbf16>
    %14 = vector.shape_cast %13 : vector<1x3x8xbf16> to vector<3x8xbf16>
    %cst_13 = arith.constant dense<0.000000e+00> : vector<256x8xf32>
    %15 = tpu.matmul %12, %14, %cst_13 {dimension_numbers = #tpu.dot_dimension_numbers<[1], [0], [0], [1], [0, 0, 1, 1], [], []>} : vector<256x3xbf16>, vector<3x8xbf16>, vector<256x8xf32> -> vector<256x8xf32>
    %16 = arith.addf %8, %15 : vector<256x8xf32>
    %c0_14 = arith.constant 0 : index
    %c0_15 = arith.constant 0 : index
    %c2 = arith.constant 2 : index
    %c0_16 = arith.constant 0 : index
    %17 = vector.load %arg1[%c0_14, %c0_15, %c2, %c0_16] : memref<1x18x18x3xf32, #tpu.memory_space<vmem>>, vector<1x16x16x3xf32>
    %18 = vector.shape_cast %17 : vector<1x16x16x3xf32> to vector<16x16x3xf32>
    %19 = vector.shape_cast %18 : vector<16x16x3xf32> to vector<256x3xf32>
    %20 = arith.truncf %19 : vector<256x3xf32> to vector<256x3xbf16>
    %c2_17 = arith.constant 2 : index
    %c0_18 = arith.constant 0 : index
    %c0_19 = arith.constant 0 : index
    %21 = vector.load %arg2[%c2_17, %c0_18, %c0_19] : memref<9x3x8xbf16, #tpu.memory_space<vmem>>, vector<1x3x8xbf16>
    %22 = vector.shape_cast %21 : vector<1x3x8xbf16> to vector<3x8xbf16>
    %cst_20 = arith.constant dense<0.000000e+00> : vector<256x8xf32>
    %23 = tpu.matmul %20, %22, %cst_20 {dimension_numbers = #tpu.dot_dimension_numbers<[1], [0], [0], [1], [0, 0, 1, 1], [], []>} : vector<256x3xbf16>, vector<3x8xbf16>, vector<256x8xf32> -> vector<256x8xf32>
    %24 = arith.addf %16, %23 : vector<256x8xf32>
    %c0_21 = arith.constant 0 : index
    %c1_22 = arith.constant 1 : index
    %c0_23 = arith.constant 0 : index
    %c0_24 = arith.constant 0 : index
    %25 = vector.load %arg1[%c0_21, %c1_22, %c0_23, %c0_24] : memref<1x18x18x3xf32, #tpu.memory_space<vmem>>, vector<1x16x16x3xf32>
    %26 = vector.shape_cast %25 : vector<1x16x16x3xf32> to vector<16x16x3xf32>
    %27 = vector.shape_cast %26 : vector<16x16x3xf32> to vector<256x3xf32>
    %28 = arith.truncf %27 : vector<256x3xf32> to vector<256x3xbf16>
    %c3 = arith.constant 3 : index
    %c0_25 = arith.constant 0 : index
    %c0_26 = arith.constant 0 : index
    %29 = vector.load %arg2[%c3, %c0_25, %c0_26] : memref<9x3x8xbf16, #tpu.memory_space<vmem>>, vector<1x3x8xbf16>
    %30 = vector.shape_cast %29 : vector<1x3x8xbf16> to vector<3x8xbf16>
    %cst_27 = arith.constant dense<0.000000e+00> : vector<256x8xf32>
    %31 = tpu.matmul %28, %30, %cst_27 {dimension_numbers = #tpu.dot_dimension_numbers<[1], [0], [0], [1], [0, 0, 1, 1], [], []>} : vector<256x3xbf16>, vector<3x8xbf16>, vector<256x8xf32> -> vector<256x8xf32>
    %32 = arith.addf %24, %31 : vector<256x8xf32>
    %c0_28 = arith.constant 0 : index
    %c1_29 = arith.constant 1 : index
    %c1_30 = arith.constant 1 : index
    %c0_31 = arith.constant 0 : index
    %33 = vector.load %arg1[%c0_28, %c1_29, %c1_30, %c0_31] : memref<1x18x18x3xf32, #tpu.memory_space<vmem>>, vector<1x16x16x3xf32>
    %34 = vector.shape_cast %33 : vector<1x16x16x3xf32> to vector<16x16x3xf32>
    %35 = vector.shape_cast %34 : vector<16x16x3xf32> to vector<256x3xf32>
    %36 = arith.truncf %35 : vector<256x3xf32> to vector<256x3xbf16>
    %c4 = arith.constant 4 : index
    %c0_32 = arith.constant 0 : index
    %c0_33 = arith.constant 0 : index
    %37 = vector.load %arg2[%c4, %c0_32, %c0_33] : memref<9x3x8xbf16, #tpu.memory_space<vmem>>, vector<1x3x8xbf16>
    %38 = vector.shape_cast %37 : vector<1x3x8xbf16> to vector<3x8xbf16>
    %cst_34 = arith.constant dense<0.000000e+00> : vector<256x8xf32>
    %39 = tpu.matmul %36, %38, %cst_34 {dimension_numbers = #tpu.dot_dimension_numbers<[1], [0], [0], [1], [0, 0, 1, 1], [], []>} : vector<256x3xbf16>, vector<3x8xbf16>, vector<256x8xf32> -> vector<256x8xf32>
    %40 = arith.addf %32, %39 : vector<256x8xf32>
    %c0_35 = arith.constant 0 : index
    %c1_36 = arith.constant 1 : index
    %c2_37 = arith.constant 2 : index
    %c0_38 = arith.constant 0 : index
    %41 = vector.load %arg1[%c0_35, %c1_36, %c2_37, %c0_38] : memref<1x18x18x3xf32, #tpu.memory_space<vmem>>, vector<1x16x16x3xf32>
    %42 = vector.shape_cast %41 : vector<1x16x16x3xf32> to vector<16x16x3xf32>
    %43 = vector.shape_cast %42 : vector<16x16x3xf32> to vector<256x3xf32>
    %44 = arith.truncf %43 : vector<256x3xf32> to vector<256x3xbf16>
    %c5 = arith.constant 5 : index
    %c0_39 = arith.constant 0 : index
    %c0_40 = arith.constant 0 : index
    %45 = vector.load %arg2[%c5, %c0_39, %c0_40] : memref<9x3x8xbf16, #tpu.memory_space<vmem>>, vector<1x3x8xbf16>
    %46 = vector.shape_cast %45 : vector<1x3x8xbf16> to vector<3x8xbf16>
    %cst_41 = arith.constant dense<0.000000e+00> : vector<256x8xf32>
    %47 = tpu.matmul %44, %46, %cst_41 {dimension_numbers = #tpu.dot_dimension_numbers<[1], [0], [0], [1], [0, 0, 1, 1], [], []>} : vector<256x3xbf16>, vector<3x8xbf16>, vector<256x8xf32> -> vector<256x8xf32>
    %48 = arith.addf %40, %47 : vector<256x8xf32>
    %c0_42 = arith.constant 0 : index
    %c2_43 = arith.constant 2 : index
    %c0_44 = arith.constant 0 : index
    %c0_45 = arith.constant 0 : index
    %49 = vector.load %arg1[%c0_42, %c2_43, %c0_44, %c0_45] : memref<1x18x18x3xf32, #tpu.memory_space<vmem>>, vector<1x16x16x3xf32>
    %50 = vector.shape_cast %49 : vector<1x16x16x3xf32> to vector<16x16x3xf32>
    %51 = vector.shape_cast %50 : vector<16x16x3xf32> to vector<256x3xf32>
    %52 = arith.truncf %51 : vector<256x3xf32> to vector<256x3xbf16>
    %c6 = arith.constant 6 : index
    %c0_46 = arith.constant 0 : index
    %c0_47 = arith.constant 0 : index
    %53 = vector.load %arg2[%c6, %c0_46, %c0_47] : memref<9x3x8xbf16, #tpu.memory_space<vmem>>, vector<1x3x8xbf16>
    %54 = vector.shape_cast %53 : vector<1x3x8xbf16> to vector<3x8xbf16>
    %cst_48 = arith.constant dense<0.000000e+00> : vector<256x8xf32>
    %55 = tpu.matmul %52, %54, %cst_48 {dimension_numbers = #tpu.dot_dimension_numbers<[1], [0], [0], [1], [0, 0, 1, 1], [], []>} : vector<256x3xbf16>, vector<3x8xbf16>, vector<256x8xf32> -> vector<256x8xf32>
    %56 = arith.addf %48, %55 : vector<256x8xf32>
    %c0_49 = arith.constant 0 : index
    %c2_50 = arith.constant 2 : index
    %c1_51 = arith.constant 1 : index
    %c0_52 = arith.constant 0 : index
    %57 = vector.load %arg1[%c0_49, %c2_50, %c1_51, %c0_52] : memref<1x18x18x3xf32, #tpu.memory_space<vmem>>, vector<1x16x16x3xf32>
    %58 = vector.shape_cast %57 : vector<1x16x16x3xf32> to vector<16x16x3xf32>
    %59 = vector.shape_cast %58 : vector<16x16x3xf32> to vector<256x3xf32>
    %60 = arith.truncf %59 : vector<256x3xf32> to vector<256x3xbf16>
    %c7 = arith.constant 7 : index
    %c0_53 = arith.constant 0 : index
    %c0_54 = arith.constant 0 : index
    %61 = vector.load %arg2[%c7, %c0_53, %c0_54] : memref<9x3x8xbf16, #tpu.memory_space<vmem>>, vector<1x3x8xbf16>
    %62 = vector.shape_cast %61 : vector<1x3x8xbf16> to vector<3x8xbf16>
    %cst_55 = arith.constant dense<0.000000e+00> : vector<256x8xf32>
    %63 = tpu.matmul %60, %62, %cst_55 {dimension_numbers = #tpu.dot_dimension_numbers<[1], [0], [0], [1], [0, 0, 1, 1], [], []>} : vector<256x3xbf16>, vector<3x8xbf16>, vector<256x8xf32> -> vector<256x8xf32>
    %64 = arith.addf %56, %63 : vector<256x8xf32>
    %c0_56 = arith.constant 0 : index
    %c2_57 = arith.constant 2 : index
    %c2_58 = arith.constant 2 : index
    %c0_59 = arith.constant 0 : index
    %65 = vector.load %arg1[%c0_56, %c2_57, %c2_58, %c0_59] : memref<1x18x18x3xf32, #tpu.memory_space<vmem>>, vector<1x16x16x3xf32>
    %66 = vector.shape_cast %65 : vector<1x16x16x3xf32> to vector<16x16x3xf32>
    %67 = vector.shape_cast %66 : vector<16x16x3xf32> to vector<256x3xf32>
    %68 = arith.truncf %67 : vector<256x3xf32> to vector<256x3xbf16>
    %c8 = arith.constant 8 : index
    %c0_60 = arith.constant 0 : index
    %c0_61 = arith.constant 0 : index
    %69 = vector.load %arg2[%c8, %c0_60, %c0_61] : memref<9x3x8xbf16, #tpu.memory_space<vmem>>, vector<1x3x8xbf16>
    %70 = vector.shape_cast %69 : vector<1x3x8xbf16> to vector<3x8xbf16>
    %cst_62 = arith.constant dense<0.000000e+00> : vector<256x8xf32>
    %71 = tpu.matmul %68, %70, %cst_62 {dimension_numbers = #tpu.dot_dimension_numbers<[1], [0], [0], [1], [0, 0, 1, 1], [], []>} : vector<256x3xbf16>, vector<3x8xbf16>, vector<256x8xf32> -> vector<256x8xf32>
    %72 = arith.addf %64, %71 : vector<256x8xf32>
    %c0_63 = arith.constant 0 : index
    %c0_64 = arith.constant 0 : index
    %73 = vector.load %arg3[%c0_63, %c0_64] : memref<1x8xf32, #tpu.memory_space<vmem>>, vector<1x8xf32>
    %74 = vector.broadcast %73 : vector<1x8xf32> to vector<256x8xf32>
    %75 = arith.addf %72, %74 : vector<256x8xf32>
    %cst_65 = arith.constant 0.000000e+00 : f32
    %76 = vector.broadcast %cst_65 : f32 to vector<256x8xf32>
    %77 = arith.maximumf %75, %76 : vector<256x8xf32>
    %78 = vector.shape_cast %77 : vector<256x8xf32> to vector<8x2x16x8xf32>
    %79 = vector.extract_strided_slice %78 {offsets = [0, 0, 0, 0], sizes = [8, 1, 16, 8], strides = [1, 1, 1, 1]} : vector<8x2x16x8xf32> to vector<8x1x16x8xf32>
    %80 = vector.shape_cast %79 : vector<8x1x16x8xf32> to vector<8x16x8xf32>
    %81 = vector.extract_strided_slice %78 {offsets = [0, 1, 0, 0], sizes = [8, 1, 16, 8], strides = [1, 1, 1, 1]} : vector<8x2x16x8xf32> to vector<8x1x16x8xf32>
    %82 = vector.shape_cast %81 : vector<8x1x16x8xf32> to vector<8x16x8xf32>
    %83 = arith.maximumf %80, %82 : vector<8x16x8xf32>
    %84 = vector.shape_cast %83 : vector<8x16x8xf32> to vector<128x8xf32>
    %c0_66 = arith.constant 0 : index
    %c0_67 = arith.constant 0 : index
    %85 = vector.load %arg11[%c0_66, %c0_67] : memref<128x8xf32, #tpu.memory_space<vmem>>, vector<128x8xf32>
    tpu.vector_store %arg11[%c0_66, %c0_67], %84 {strides = array<i32>} : memref<128x8xf32, #tpu.memory_space<vmem>>, vector<128x8xf32>,
    %c0_68 = arith.constant 0 : index
    %c0_69 = arith.constant 0 : index
    %86 = tpu.strided_load %arg11[%c0_68, %c0_69] {strides = array<i32: 2, 1>} : memref<128x8xf32, #tpu.memory_space<vmem>>, vector<64x8xf32>
    %c1_70 = arith.constant 1 : index
    %c0_71 = arith.constant 0 : index
    %87 = tpu.strided_load %arg11[%c1_70, %c0_71] {strides = array<i32: 2, 1>} : memref<128x8xf32, #tpu.memory_space<vmem>>, vector<64x8xf32>
    %88 = arith.maximumf %86, %87 : vector<64x8xf32>
    %cst_72 = arith.constant 0.000000e+00 : f32
    %89 = vector.broadcast %cst_72 : f32 to vector<10x10x8xf32>
    %c0_73 = arith.constant 0 : index
    %c0_74 = arith.constant 0 : index
    %c0_75 = arith.constant 0 : index
    %90 = vector.load %arg9[%c0_73, %c0_74, %c0_75] : memref<10x10x8xf32, #tpu.memory_space<vmem>>, vector<10x10x8xf32>
    tpu.vector_store %arg9[%c0_73, %c0_74, %c0_75], %89 {strides = array<i32>} : memref<10x10x8xf32, #tpu.memory_space<vmem>>, vector<10x10x8xf32>,
    %91 = vector.shape_cast %88 : vector<64x8xf32> to vector<8x8x8xf32>
    %c1_76 = arith.constant 1 : index
    %c1_77 = arith.constant 1 : index
    %c0_78 = arith.constant 0 : index
    %92 = vector.load %arg9[%c1_76, %c1_77, %c0_78] : memref<10x10x8xf32, #tpu.memory_space<vmem>>, vector<8x8x8xf32>
    tpu.vector_store %arg9[%c1_76, %c1_77, %c0_78], %91 {strides = array<i32>} : memref<10x10x8xf32, #tpu.memory_space<vmem>>, vector<8x8x8xf32>,
    %cst_79 = arith.constant 0.000000e+00 : f32
    %93 = vector.broadcast %cst_79 : f32 to vector<64x16xf32>
    %c0_80 = arith.constant 0 : index
    %c0_81 = arith.constant 0 : index
    %c0_82 = arith.constant 0 : index
    %94 = vector.load %arg9[%c0_80, %c0_81, %c0_82] : memref<10x10x8xf32, #tpu.memory_space<vmem>>, vector<8x8x8xf32>
    %95 = vector.shape_cast %94 : vector<8x8x8xf32> to vector<64x8xf32>
    %96 = arith.truncf %95 : vector<64x8xf32> to vector<64x8xbf16>
    %c0_83 = arith.constant 0 : index
    %c0_84 = arith.constant 0 : index
    %c0_85 = arith.constant 0 : index
    %97 = vector.load %arg4[%c0_83, %c0_84, %c0_85] : memref<9x8x16xbf16, #tpu.memory_space<vmem>>, vector<1x8x16xbf16>
    %98 = vector.shape_cast %97 : vector<1x8x16xbf16> to vector<8x16xbf16>
    %cst_86 = arith.constant dense<0.000000e+00> : vector<64x16xf32>
    %99 = tpu.matmul %96, %98, %cst_86 {dimension_numbers = #tpu.dot_dimension_numbers<[1], [0], [0], [1], [0, 0, 1, 1], [], []>} : vector<64x8xbf16>, vector<8x16xbf16>, vector<64x16xf32> -> vector<64x16xf32>
    %100 = arith.addf %93, %99 : vector<64x16xf32>
    %c0_87 = arith.constant 0 : index
    %c1_88 = arith.constant 1 : index
    %c0_89 = arith.constant 0 : index
    %101 = vector.load %arg9[%c0_87, %c1_88, %c0_89] : memref<10x10x8xf32, #tpu.memory_space<vmem>>, vector<8x8x8xf32>
    %102 = vector.shape_cast %101 : vector<8x8x8xf32> to vector<64x8xf32>
    %103 = arith.truncf %102 : vector<64x8xf32> to vector<64x8xbf16>
    %c1_90 = arith.constant 1 : index
    %c0_91 = arith.constant 0 : index
    %c0_92 = arith.constant 0 : index
    %104 = vector.load %arg4[%c1_90, %c0_91, %c0_92] : memref<9x8x16xbf16, #tpu.memory_space<vmem>>, vector<1x8x16xbf16>
    %105 = vector.shape_cast %104 : vector<1x8x16xbf16> to vector<8x16xbf16>
    %cst_93 = arith.constant dense<0.000000e+00> : vector<64x16xf32>
    %106 = tpu.matmul %103, %105, %cst_93 {dimension_numbers = #tpu.dot_dimension_numbers<[1], [0], [0], [1], [0, 0, 1, 1], [], []>} : vector<64x8xbf16>, vector<8x16xbf16>, vector<64x16xf32> -> vector<64x16xf32>
    %107 = arith.addf %100, %106 : vector<64x16xf32>
    %c0_94 = arith.constant 0 : index
    %c2_95 = arith.constant 2 : index
    %c0_96 = arith.constant 0 : index
    %108 = vector.load %arg9[%c0_94, %c2_95, %c0_96] : memref<10x10x8xf32, #tpu.memory_space<vmem>>, vector<8x8x8xf32>
    %109 = vector.shape_cast %108 : vector<8x8x8xf32> to vector<64x8xf32>
    %110 = arith.truncf %109 : vector<64x8xf32> to vector<64x8xbf16>
    %c2_97 = arith.constant 2 : index
    %c0_98 = arith.constant 0 : index
    %c0_99 = arith.constant 0 : index
    %111 = vector.load %arg4[%c2_97, %c0_98, %c0_99] : memref<9x8x16xbf16, #tpu.memory_space<vmem>>, vector<1x8x16xbf16>
    %112 = vector.shape_cast %111 : vector<1x8x16xbf16> to vector<8x16xbf16>
    %cst_100 = arith.constant dense<0.000000e+00> : vector<64x16xf32>
    %113 = tpu.matmul %110, %112, %cst_100 {dimension_numbers = #tpu.dot_dimension_numbers<[1], [0], [0], [1], [0, 0, 1, 1], [], []>} : vector<64x8xbf16>, vector<8x16xbf16>, vector<64x16xf32> -> vector<64x16xf32>
    %114 = arith.addf %107, %113 : vector<64x16xf32>
    %c1_101 = arith.constant 1 : index
    %c0_102 = arith.constant 0 : index
    %c0_103 = arith.constant 0 : index
    %115 = vector.load %arg9[%c1_101, %c0_102, %c0_103] : memref<10x10x8xf32, #tpu.memory_space<vmem>>, vector<8x8x8xf32>
    %116 = vector.shape_cast %115 : vector<8x8x8xf32> to vector<64x8xf32>
    %117 = arith.truncf %116 : vector<64x8xf32> to vector<64x8xbf16>
    %c3_104 = arith.constant 3 : index
    %c0_105 = arith.constant 0 : index
    %c0_106 = arith.constant 0 : index
    %118 = vector.load %arg4[%c3_104, %c0_105, %c0_106] : memref<9x8x16xbf16, #tpu.memory_space<vmem>>, vector<1x8x16xbf16>
    %119 = vector.shape_cast %118 : vector<1x8x16xbf16> to vector<8x16xbf16>
    %cst_107 = arith.constant dense<0.000000e+00> : vector<64x16xf32>
    %120 = tpu.matmul %117, %119, %cst_107 {dimension_numbers = #tpu.dot_dimension_numbers<[1], [0], [0], [1], [0, 0, 1, 1], [], []>} : vector<64x8xbf16>, vector<8x16xbf16>, vector<64x16xf32> -> vector<64x16xf32>
    %121 = arith.addf %114, %120 : vector<64x16xf32>
    %c1_108 = arith.constant 1 : index
    %c1_109 = arith.constant 1 : index
    %c0_110 = arith.constant 0 : index
    %122 = vector.load %arg9[%c1_108, %c1_109, %c0_110] : memref<10x10x8xf32, #tpu.memory_space<vmem>>, vector<8x8x8xf32>
    %123 = vector.shape_cast %122 : vector<8x8x8xf32> to vector<64x8xf32>
    %124 = arith.truncf %123 : vector<64x8xf32> to vector<64x8xbf16>
    %c4_111 = arith.constant 4 : index
    %c0_112 = arith.constant 0 : index
    %c0_113 = arith.constant 0 : index
    %125 = vector.load %arg4[%c4_111, %c0_112, %c0_113] : memref<9x8x16xbf16, #tpu.memory_space<vmem>>, vector<1x8x16xbf16>
    %126 = vector.shape_cast %125 : vector<1x8x16xbf16> to vector<8x16xbf16>
    %cst_114 = arith.constant dense<0.000000e+00> : vector<64x16xf32>
    %127 = tpu.matmul %124, %126, %cst_114 {dimension_numbers = #tpu.dot_dimension_numbers<[1], [0], [0], [1], [0, 0, 1, 1], [], []>} : vector<64x8xbf16>, vector<8x16xbf16>, vector<64x16xf32> -> vector<64x16xf32>
    %128 = arith.addf %121, %127 : vector<64x16xf32>
    %c1_115 = arith.constant 1 : index
    %c2_116 = arith.constant 2 : index
    %c0_117 = arith.constant 0 : index
    %129 = vector.load %arg9[%c1_115, %c2_116, %c0_117] : memref<10x10x8xf32, #tpu.memory_space<vmem>>, vector<8x8x8xf32>
    %130 = vector.shape_cast %129 : vector<8x8x8xf32> to vector<64x8xf32>
    %131 = arith.truncf %130 : vector<64x8xf32> to vector<64x8xbf16>
    %c5_118 = arith.constant 5 : index
    %c0_119 = arith.constant 0 : index
    %c0_120 = arith.constant 0 : index
    %132 = vector.load %arg4[%c5_118, %c0_119, %c0_120] : memref<9x8x16xbf16, #tpu.memory_space<vmem>>, vector<1x8x16xbf16>
    %133 = vector.shape_cast %132 : vector<1x8x16xbf16> to vector<8x16xbf16>
    %cst_121 = arith.constant dense<0.000000e+00> : vector<64x16xf32>
    %134 = tpu.matmul %131, %133, %cst_121 {dimension_numbers = #tpu.dot_dimension_numbers<[1], [0], [0], [1], [0, 0, 1, 1], [], []>} : vector<64x8xbf16>, vector<8x16xbf16>, vector<64x16xf32> -> vector<64x16xf32>
    %135 = arith.addf %128, %134 : vector<64x16xf32>
    %c2_122 = arith.constant 2 : index
    %c0_123 = arith.constant 0 : index
    %c0_124 = arith.constant 0 : index
    %136 = vector.load %arg9[%c2_122, %c0_123, %c0_124] : memref<10x10x8xf32, #tpu.memory_space<vmem>>, vector<8x8x8xf32>
    %137 = vector.shape_cast %136 : vector<8x8x8xf32> to vector<64x8xf32>
    %138 = arith.truncf %137 : vector<64x8xf32> to vector<64x8xbf16>
    %c6_125 = arith.constant 6 : index
    %c0_126 = arith.constant 0 : index
    %c0_127 = arith.constant 0 : index
    %139 = vector.load %arg4[%c6_125, %c0_126, %c0_127] : memref<9x8x16xbf16, #tpu.memory_space<vmem>>, vector<1x8x16xbf16>
    %140 = vector.shape_cast %139 : vector<1x8x16xbf16> to vector<8x16xbf16>
    %cst_128 = arith.constant dense<0.000000e+00> : vector<64x16xf32>
    %141 = tpu.matmul %138, %140, %cst_128 {dimension_numbers = #tpu.dot_dimension_numbers<[1], [0], [0], [1], [0, 0, 1, 1], [], []>} : vector<64x8xbf16>, vector<8x16xbf16>, vector<64x16xf32> -> vector<64x16xf32>
    %142 = arith.addf %135, %141 : vector<64x16xf32>
    %c2_129 = arith.constant 2 : index
    %c1_130 = arith.constant 1 : index
    %c0_131 = arith.constant 0 : index
    %143 = vector.load %arg9[%c2_129, %c1_130, %c0_131] : memref<10x10x8xf32, #tpu.memory_space<vmem>>, vector<8x8x8xf32>
    %144 = vector.shape_cast %143 : vector<8x8x8xf32> to vector<64x8xf32>
    %145 = arith.truncf %144 : vector<64x8xf32> to vector<64x8xbf16>
    %c7_132 = arith.constant 7 : index
    %c0_133 = arith.constant 0 : index
    %c0_134 = arith.constant 0 : index
    %146 = vector.load %arg4[%c7_132, %c0_133, %c0_134] : memref<9x8x16xbf16, #tpu.memory_space<vmem>>, vector<1x8x16xbf16>
    %147 = vector.shape_cast %146 : vector<1x8x16xbf16> to vector<8x16xbf16>
    %cst_135 = arith.constant dense<0.000000e+00> : vector<64x16xf32>
    %148 = tpu.matmul %145, %147, %cst_135 {dimension_numbers = #tpu.dot_dimension_numbers<[1], [0], [0], [1], [0, 0, 1, 1], [], []>} : vector<64x8xbf16>, vector<8x16xbf16>, vector<64x16xf32> -> vector<64x16xf32>
    %149 = arith.addf %142, %148 : vector<64x16xf32>
    %c2_136 = arith.constant 2 : index
    %c2_137 = arith.constant 2 : index
    %c0_138 = arith.constant 0 : index
    %150 = vector.load %arg9[%c2_136, %c2_137, %c0_138] : memref<10x10x8xf32, #tpu.memory_space<vmem>>, vector<8x8x8xf32>
    %151 = vector.shape_cast %150 : vector<8x8x8xf32> to vector<64x8xf32>
    %152 = arith.truncf %151 : vector<64x8xf32> to vector<64x8xbf16>
    %c8_139 = arith.constant 8 : index
    %c0_140 = arith.constant 0 : index
    %c0_141 = arith.constant 0 : index
    %153 = vector.load %arg4[%c8_139, %c0_140, %c0_141] : memref<9x8x16xbf16, #tpu.memory_space<vmem>>, vector<1x8x16xbf16>
    %154 = vector.shape_cast %153 : vector<1x8x16xbf16> to vector<8x16xbf16>
    %cst_142 = arith.constant dense<0.000000e+00> : vector<64x16xf32>
    %155 = tpu.matmul %152, %154, %cst_142 {dimension_numbers = #tpu.dot_dimension_numbers<[1], [0], [0], [1], [0, 0, 1, 1], [], []>} : vector<64x8xbf16>, vector<8x16xbf16>, vector<64x16xf32> -> vector<64x16xf32>
    %156 = arith.addf %149, %155 : vector<64x16xf32>
    %c0_143 = arith.constant 0 : index
    %c0_144 = arith.constant 0 : index
    %157 = vector.load %arg5[%c0_143, %c0_144] : memref<1x16xf32, #tpu.memory_space<vmem>>, vector<1x16xf32>
    %158 = vector.broadcast %157 : vector<1x16xf32> to vector<64x16xf32>
    %159 = arith.addf %156, %158 : vector<64x16xf32>
    %cst_145 = arith.constant 0.000000e+00 : f32
    %160 = vector.broadcast %cst_145 : f32 to vector<64x16xf32>
    %161 = arith.maximumf %159, %160 : vector<64x16xf32>
    %cst_146 = arith.constant 0.000000e+00 : f32
    %162 = vector.broadcast %cst_146 : f32 to vector<10x10x16xf32>
    %c0_147 = arith.constant 0 : index
    %c0_148 = arith.constant 0 : index
    %c0_149 = arith.constant 0 : index
    %163 = vector.load %arg10[%c0_147, %c0_148, %c0_149] : memref<10x10x16xf32, #tpu.memory_space<vmem>>, vector<10x10x16xf32>
    tpu.vector_store %arg10[%c0_147, %c0_148, %c0_149], %162 {strides = array<i32>} : memref<10x10x16xf32, #tpu.memory_space<vmem>>, vector<10x10x16xf32>,
    %164 = vector.shape_cast %161 : vector<64x16xf32> to vector<8x8x16xf32>
    %c1_150 = arith.constant 1 : index
    %c1_151 = arith.constant 1 : index
    %c0_152 = arith.constant 0 : index
    %165 = vector.load %arg10[%c1_150, %c1_151, %c0_152] : memref<10x10x16xf32, #tpu.memory_space<vmem>>, vector<8x8x16xf32>
    tpu.vector_store %arg10[%c1_150, %c1_151, %c0_152], %164 {strides = array<i32>} : memref<10x10x16xf32, #tpu.memory_space<vmem>>, vector<8x8x16xf32>,
    %cst_153 = arith.constant 0.000000e+00 : f32
    %166 = vector.broadcast %cst_153 : f32 to vector<64x8xf32>
    %c0_154 = arith.constant 0 : index
    %c0_155 = arith.constant 0 : index
    %c0_156 = arith.constant 0 : index
    %167 = vector.load %arg10[%c0_154, %c0_155, %c0_156] : memref<10x10x16xf32, #tpu.memory_space<vmem>>, vector<8x8x16xf32>
    %168 = vector.shape_cast %167 : vector<8x8x16xf32> to vector<64x16xf32>
    %169 = arith.truncf %168 : vector<64x16xf32> to vector<64x16xbf16>
    %c0_157 = arith.constant 0 : index
    %c0_158 = arith.constant 0 : index
    %c0_159 = arith.constant 0 : index
    %170 = vector.load %arg6[%c0_157, %c0_158, %c0_159] : memref<9x16x8xbf16, #tpu.memory_space<vmem>>, vector<1x16x8xbf16>
    %171 = vector.shape_cast %170 : vector<1x16x8xbf16> to vector<16x8xbf16>
    %cst_160 = arith.constant dense<0.000000e+00> : vector<64x8xf32>
    %172 = tpu.matmul %169, %171, %cst_160 {dimension_numbers = #tpu.dot_dimension_numbers<[1], [0], [0], [1], [0, 0, 1, 1], [], []>} : vector<64x16xbf16>, vector<16x8xbf16>, vector<64x8xf32> -> vector<64x8xf32>
    %173 = arith.addf %166, %172 : vector<64x8xf32>
    %c0_161 = arith.constant 0 : index
    %c1_162 = arith.constant 1 : index
    %c0_163 = arith.constant 0 : index
    %174 = vector.load %arg10[%c0_161, %c1_162, %c0_163] : memref<10x10x16xf32, #tpu.memory_space<vmem>>, vector<8x8x16xf32>
    %175 = vector.shape_cast %174 : vector<8x8x16xf32> to vector<64x16xf32>
    %176 = arith.truncf %175 : vector<64x16xf32> to vector<64x16xbf16>
    %c1_164 = arith.constant 1 : index
    %c0_165 = arith.constant 0 : index
    %c0_166 = arith.constant 0 : index
    %177 = vector.load %arg6[%c1_164, %c0_165, %c0_166] : memref<9x16x8xbf16, #tpu.memory_space<vmem>>, vector<1x16x8xbf16>
    %178 = vector.shape_cast %177 : vector<1x16x8xbf16> to vector<16x8xbf16>
    %cst_167 = arith.constant dense<0.000000e+00> : vector<64x8xf32>
    %179 = tpu.matmul %176, %178, %cst_167 {dimension_numbers = #tpu.dot_dimension_numbers<[1], [0], [0], [1], [0, 0, 1, 1], [], []>} : vector<64x16xbf16>, vector<16x8xbf16>, vector<64x8xf32> -> vector<64x8xf32>
    %180 = arith.addf %173, %179 : vector<64x8xf32>
    %c0_168 = arith.constant 0 : index
    %c2_169 = arith.constant 2 : index
    %c0_170 = arith.constant 0 : index
    %181 = vector.load %arg10[%c0_168, %c2_169, %c0_170] : memref<10x10x16xf32, #tpu.memory_space<vmem>>, vector<8x8x16xf32>
    %182 = vector.shape_cast %181 : vector<8x8x16xf32> to vector<64x16xf32>
    %183 = arith.truncf %182 : vector<64x16xf32> to vector<64x16xbf16>
    %c2_171 = arith.constant 2 : index
    %c0_172 = arith.constant 0 : index
    %c0_173 = arith.constant 0 : index
    %184 = vector.load %arg6[%c2_171, %c0_172, %c0_173] : memref<9x16x8xbf16, #tpu.memory_space<vmem>>, vector<1x16x8xbf16>
    %185 = vector.shape_cast %184 : vector<1x16x8xbf16> to vector<16x8xbf16>
    %cst_174 = arith.constant dense<0.000000e+00> : vector<64x8xf32>
    %186 = tpu.matmul %183, %185, %cst_174 {dimension_numbers = #tpu.dot_dimension_numbers<[1], [0], [0], [1], [0, 0, 1, 1], [], []>} : vector<64x16xbf16>, vector<16x8xbf16>, vector<64x8xf32> -> vector<64x8xf32>
    %187 = arith.addf %180, %186 : vector<64x8xf32>
    %c1_175 = arith.constant 1 : index
    %c0_176 = arith.constant 0 : index
    %c0_177 = arith.constant 0 : index
    %188 = vector.load %arg10[%c1_175, %c0_176, %c0_177] : memref<10x10x16xf32, #tpu.memory_space<vmem>>, vector<8x8x16xf32>
    %189 = vector.shape_cast %188 : vector<8x8x16xf32> to vector<64x16xf32>
    %190 = arith.truncf %189 : vector<64x16xf32> to vector<64x16xbf16>
    %c3_178 = arith.constant 3 : index
    %c0_179 = arith.constant 0 : index
    %c0_180 = arith.constant 0 : index
    %191 = vector.load %arg6[%c3_178, %c0_179, %c0_180] : memref<9x16x8xbf16, #tpu.memory_space<vmem>>, vector<1x16x8xbf16>
    %192 = vector.shape_cast %191 : vector<1x16x8xbf16> to vector<16x8xbf16>
    %cst_181 = arith.constant dense<0.000000e+00> : vector<64x8xf32>
    %193 = tpu.matmul %190, %192, %cst_181 {dimension_numbers = #tpu.dot_dimension_numbers<[1], [0], [0], [1], [0, 0, 1, 1], [], []>} : vector<64x16xbf16>, vector<16x8xbf16>, vector<64x8xf32> -> vector<64x8xf32>
    %194 = arith.addf %187, %193 : vector<64x8xf32>
    %c1_182 = arith.constant 1 : index
    %c1_183 = arith.constant 1 : index
    %c0_184 = arith.constant 0 : index
    %195 = vector.load %arg10[%c1_182, %c1_183, %c0_184] : memref<10x10x16xf32, #tpu.memory_space<vmem>>, vector<8x8x16xf32>
    %196 = vector.shape_cast %195 : vector<8x8x16xf32> to vector<64x16xf32>
    %197 = arith.truncf %196 : vector<64x16xf32> to vector<64x16xbf16>
    %c4_185 = arith.constant 4 : index
    %c0_186 = arith.constant 0 : index
    %c0_187 = arith.constant 0 : index
    %198 = vector.load %arg6[%c4_185, %c0_186, %c0_187] : memref<9x16x8xbf16, #tpu.memory_space<vmem>>, vector<1x16x8xbf16>
    %199 = vector.shape_cast %198 : vector<1x16x8xbf16> to vector<16x8xbf16>
    %cst_188 = arith.constant dense<0.000000e+00> : vector<64x8xf32>
    %200 = tpu.matmul %197, %199, %cst_188 {dimension_numbers = #tpu.dot_dimension_numbers<[1], [0], [0], [1], [0, 0, 1, 1], [], []>} : vector<64x16xbf16>, vector<16x8xbf16>, vector<64x8xf32> -> vector<64x8xf32>
    %201 = arith.addf %194, %200 : vector<64x8xf32>
    %c1_189 = arith.constant 1 : index
    %c2_190 = arith.constant 2 : index
    %c0_191 = arith.constant 0 : index
    %202 = vector.load %arg10[%c1_189, %c2_190, %c0_191] : memref<10x10x16xf32, #tpu.memory_space<vmem>>, vector<8x8x16xf32>
    %203 = vector.shape_cast %202 : vector<8x8x16xf32> to vector<64x16xf32>
    %204 = arith.truncf %203 : vector<64x16xf32> to vector<64x16xbf16>
    %c5_192 = arith.constant 5 : index
    %c0_193 = arith.constant 0 : index
    %c0_194 = arith.constant 0 : index
    %205 = vector.load %arg6[%c5_192, %c0_193, %c0_194] : memref<9x16x8xbf16, #tpu.memory_space<vmem>>, vector<1x16x8xbf16>
    %206 = vector.shape_cast %205 : vector<1x16x8xbf16> to vector<16x8xbf16>
    %cst_195 = arith.constant dense<0.000000e+00> : vector<64x8xf32>
    %207 = tpu.matmul %204, %206, %cst_195 {dimension_numbers = #tpu.dot_dimension_numbers<[1], [0], [0], [1], [0, 0, 1, 1], [], []>} : vector<64x16xbf16>, vector<16x8xbf16>, vector<64x8xf32> -> vector<64x8xf32>
    %208 = arith.addf %201, %207 : vector<64x8xf32>
    %c2_196 = arith.constant 2 : index
    %c0_197 = arith.constant 0 : index
    %c0_198 = arith.constant 0 : index
    %209 = vector.load %arg10[%c2_196, %c0_197, %c0_198] : memref<10x10x16xf32, #tpu.memory_space<vmem>>, vector<8x8x16xf32>
    %210 = vector.shape_cast %209 : vector<8x8x16xf32> to vector<64x16xf32>
    %211 = arith.truncf %210 : vector<64x16xf32> to vector<64x16xbf16>
    %c6_199 = arith.constant 6 : index
    %c0_200 = arith.constant 0 : index
    %c0_201 = arith.constant 0 : index
    %212 = vector.load %arg6[%c6_199, %c0_200, %c0_201] : memref<9x16x8xbf16, #tpu.memory_space<vmem>>, vector<1x16x8xbf16>
    %213 = vector.shape_cast %212 : vector<1x16x8xbf16> to vector<16x8xbf16>
    %cst_202 = arith.constant dense<0.000000e+00> : vector<64x8xf32>
    %214 = tpu.matmul %211, %213, %cst_202 {dimension_numbers = #tpu.dot_dimension_numbers<[1], [0], [0], [1], [0, 0, 1, 1], [], []>} : vector<64x16xbf16>, vector<16x8xbf16>, vector<64x8xf32> -> vector<64x8xf32>
    %215 = arith.addf %208, %214 : vector<64x8xf32>
    %c2_203 = arith.constant 2 : index
    %c1_204 = arith.constant 1 : index
    %c0_205 = arith.constant 0 : index
    %216 = vector.load %arg10[%c2_203, %c1_204, %c0_205] : memref<10x10x16xf32, #tpu.memory_space<vmem>>, vector<8x8x16xf32>
    %217 = vector.shape_cast %216 : vector<8x8x16xf32> to vector<64x16xf32>
    %218 = arith.truncf %217 : vector<64x16xf32> to vector<64x16xbf16>
    %c7_206 = arith.constant 7 : index
    %c0_207 = arith.constant 0 : index
    %c0_208 = arith.constant 0 : index
    %219 = vector.load %arg6[%c7_206, %c0_207, %c0_208] : memref<9x16x8xbf16, #tpu.memory_space<vmem>>, vector<1x16x8xbf16>
    %220 = vector.shape_cast %219 : vector<1x16x8xbf16> to vector<16x8xbf16>
    %cst_209 = arith.constant dense<0.000000e+00> : vector<64x8xf32>
    %221 = tpu.matmul %218, %220, %cst_209 {dimension_numbers = #tpu.dot_dimension_numbers<[1], [0], [0], [1], [0, 0, 1, 1], [], []>} : vector<64x16xbf16>, vector<16x8xbf16>, vector<64x8xf32> -> vector<64x8xf32>
    %222 = arith.addf %215, %221 : vector<64x8xf32>
    %c2_210 = arith.constant 2 : index
    %c2_211 = arith.constant 2 : index
    %c0_212 = arith.constant 0 : index
    %223 = vector.load %arg10[%c2_210, %c2_211, %c0_212] : memref<10x10x16xf32, #tpu.memory_space<vmem>>, vector<8x8x16xf32>
    %224 = vector.shape_cast %223 : vector<8x8x16xf32> to vector<64x16xf32>
    %225 = arith.truncf %224 : vector<64x16xf32> to vector<64x16xbf16>
    %c8_213 = arith.constant 8 : index
    %c0_214 = arith.constant 0 : index
    %c0_215 = arith.constant 0 : index
    %226 = vector.load %arg6[%c8_213, %c0_214, %c0_215] : memref<9x16x8xbf16, #tpu.memory_space<vmem>>, vector<1x16x8xbf16>
    %227 = vector.shape_cast %226 : vector<1x16x8xbf16> to vector<16x8xbf16>
    %cst_216 = arith.constant dense<0.000000e+00> : vector<64x8xf32>
    %228 = tpu.matmul %225, %227, %cst_216 {dimension_numbers = #tpu.dot_dimension_numbers<[1], [0], [0], [1], [0, 0, 1, 1], [], []>} : vector<64x16xbf16>, vector<16x8xbf16>, vector<64x8xf32> -> vector<64x8xf32>
    %229 = arith.addf %222, %228 : vector<64x8xf32>
    %c0_217 = arith.constant 0 : index
    %c0_218 = arith.constant 0 : index
    %230 = vector.load %arg7[%c0_217, %c0_218] : memref<1x8xf32, #tpu.memory_space<vmem>>, vector<1x8xf32>
    %231 = vector.broadcast %230 : vector<1x8xf32> to vector<64x8xf32>
    %232 = arith.addf %229, %231 : vector<64x8xf32>
    %cst_219 = arith.constant 0.000000e+00 : f32
    %233 = vector.broadcast %cst_219 : f32 to vector<64x8xf32>
    %234 = arith.maximumf %232, %233 : vector<64x8xf32>
    %235 = vector.shape_cast %234 : vector<64x8xf32> to vector<4x2x8x8xf32>
    %236 = vector.extract_strided_slice %235 {offsets = [0, 0, 0, 0], sizes = [4, 1, 8, 8], strides = [1, 1, 1, 1]} : vector<4x2x8x8xf32> to vector<4x1x8x8xf32>
    %237 = vector.shape_cast %236 : vector<4x1x8x8xf32> to vector<4x8x8xf32>
    %238 = vector.extract_strided_slice %235 {offsets = [0, 1, 0, 0], sizes = [4, 1, 8, 8], strides = [1, 1, 1, 1]} : vector<4x2x8x8xf32> to vector<4x1x8x8xf32>
    %239 = vector.shape_cast %238 : vector<4x1x8x8xf32> to vector<4x8x8xf32>
    %240 = arith.maximumf %237, %239 : vector<4x8x8xf32>
    %241 = vector.shape_cast %240 : vector<4x8x8xf32> to vector<32x8xf32>
    %c0_220 = arith.constant 0 : index
    %c0_221 = arith.constant 0 : index
    %242 = vector.load %arg12[%c0_220, %c0_221] : memref<32x8xf32, #tpu.memory_space<vmem>>, vector<32x8xf32>
    tpu.vector_store %arg12[%c0_220, %c0_221], %241 {strides = array<i32>} : memref<32x8xf32, #tpu.memory_space<vmem>>, vector<32x8xf32>,
    %c0_222 = arith.constant 0 : index
    %c0_223 = arith.constant 0 : index
    %243 = tpu.strided_load %arg12[%c0_222, %c0_223] {strides = array<i32: 2, 1>} : memref<32x8xf32, #tpu.memory_space<vmem>>, vector<16x8xf32>
    %c1_224 = arith.constant 1 : index
    %c0_225 = arith.constant 0 : index
    %244 = tpu.strided_load %arg12[%c1_224, %c0_225] {strides = array<i32: 2, 1>} : memref<32x8xf32, #tpu.memory_space<vmem>>, vector<16x8xf32>
    %245 = arith.maximumf %243, %244 : vector<16x8xf32>
    %246 = vector.shape_cast %245 : vector<16x8xf32> to vector<2x2x4x8xf32>
    %247 = vector.extract_strided_slice %246 {offsets = [0, 0, 0, 0], sizes = [2, 1, 4, 8], strides = [1, 1, 1, 1]} : vector<2x2x4x8xf32> to vector<2x1x4x8xf32>
    %248 = vector.shape_cast %247 : vector<2x1x4x8xf32> to vector<2x4x8xf32>
    %249 = vector.extract_strided_slice %246 {offsets = [0, 1, 0, 0], sizes = [2, 1, 4, 8], strides = [1, 1, 1, 1]} : vector<2x2x4x8xf32> to vector<2x1x4x8xf32>
    %250 = vector.shape_cast %249 : vector<2x1x4x8xf32> to vector<2x4x8xf32>
    %251 = arith.addf %248, %250 : vector<2x4x8xf32>
    %252 = vector.shape_cast %251 : vector<2x4x8xf32> to vector<8x8xf32>
    %c0_226 = arith.constant 0 : index
    %c0_227 = arith.constant 0 : index
    %253 = vector.load %arg12[%c0_226, %c0_227] : memref<32x8xf32, #tpu.memory_space<vmem>>, vector<8x8xf32>
    tpu.vector_store %arg12[%c0_226, %c0_227], %252 {strides = array<i32>} : memref<32x8xf32, #tpu.memory_space<vmem>>, vector<8x8xf32>,
    %c0_228 = arith.constant 0 : index
    %c0_229 = arith.constant 0 : index
    %254 = tpu.strided_load %arg12[%c0_228, %c0_229] {strides = array<i32: 2, 1>} : memref<32x8xf32, #tpu.memory_space<vmem>>, vector<4x8xf32>
    %c1_230 = arith.constant 1 : index
    %c0_231 = arith.constant 0 : index
    %255 = tpu.strided_load %arg12[%c1_230, %c0_231] {strides = array<i32: 2, 1>} : memref<32x8xf32, #tpu.memory_space<vmem>>, vector<4x8xf32>
    %256 = arith.addf %254, %255 : vector<4x8xf32>
    %cst_232 = arith.constant 2.500000e-01 : f32
    %257 = vector.broadcast %cst_232 : f32 to vector<4x8xf32>
    %258 = arith.mulf %256, %257 : vector<4x8xf32>
    %c0_233 = arith.constant 0 : index
    %c0_234 = arith.constant 0 : index
    %c0_235 = arith.constant 0 : index
    %259 = vector.load %arg8[%c0_233, %c0_234, %c0_235] : memref<1x4x8xf32, #tpu.memory_space<vmem>>, vector<1x4x8xf32>
    %260 = vector.shape_cast %259 : vector<1x4x8xf32> to vector<4x8xf32>
    %261 = vector.shape_cast %258 : vector<4x8xf32> to vector<1x4x8xf32>
    tpu.vector_store %arg8[%c0_233, %c0_234, %c0_235], %261 {strides = array<i32>} : memref<1x4x8xf32, #tpu.memory_space<vmem>>, vector<1x4x8xf32>,
    return
  }
  func.func @transform_0(%arg0: i32) -> (i32, i32, i32, i32) {
    %c0_i32 = arith.constant 0 : i32
    %c0_i32_0 = arith.constant 0 : i32
    %c0_i32_1 = arith.constant 0 : i32
    %c0_i32_2 = arith.constant 0 : i32
    return %arg0, %c0_i32, %c0_i32_0, %c0_i32_1 : i32, i32, i32, i32
  }
  func.func @transform_1(%arg0: i32) -> (i32, i32, i32) {
    %c0_i32 = arith.constant 0 : i32
    %c0_i32_0 = arith.constant 0 : i32
    %c0_i32_1 = arith.constant 0 : i32
    %c0_i32_2 = arith.constant 0 : i32
    return %c0_i32, %c0_i32_0, %c0_i32_1 : i32, i32, i32
  }
  func.func @transform_2(%arg0: i32) -> (i32, i32) {
    %c0_i32 = arith.constant 0 : i32
    %c0_i32_0 = arith.constant 0 : i32
    %c0_i32_1 = arith.constant 0 : i32
    return %c0_i32, %c0_i32_0 : i32, i32
  }
  func.func @transform_3(%arg0: i32) -> (i32, i32, i32) {
    %c0_i32 = arith.constant 0 : i32
    %c0_i32_0 = arith.constant 0 : i32
    %c0_i32_1 = arith.constant 0 : i32
    %c0_i32_2 = arith.constant 0 : i32
    return %c0_i32, %c0_i32_0, %c0_i32_1 : i32, i32, i32
  }
  func.func @transform_4(%arg0: i32) -> (i32, i32) {
    %c0_i32 = arith.constant 0 : i32
    %c0_i32_0 = arith.constant 0 : i32
    %c0_i32_1 = arith.constant 0 : i32
    return %c0_i32, %c0_i32_0 : i32, i32
  }
  func.func @transform_5(%arg0: i32) -> (i32, i32, i32) {
    %c0_i32 = arith.constant 0 : i32
    %c0_i32_0 = arith.constant 0 : i32
    %c0_i32_1 = arith.constant 0 : i32
    %c0_i32_2 = arith.constant 0 : i32
    return %c0_i32, %c0_i32_0, %c0_i32_1 : i32, i32, i32
  }
  func.func @transform_6(%arg0: i32) -> (i32, i32) {
    %c0_i32 = arith.constant 0 : i32
    %c0_i32_0 = arith.constant 0 : i32
    %c0_i32_1 = arith.constant 0 : i32
    return %c0_i32, %c0_i32_0 : i32, i32
  }
  func.func @transform_7(%arg0: i32) -> (i32, i32, i32) {
    %c0_i32 = arith.constant 0 : i32
    %c0_i32_0 = arith.constant 0 : i32
    %c0_i32_1 = arith.constant 0 : i32
    return %arg0, %c0_i32, %c0_i32_0 : i32, i32, i32
  }
}

module attributes {stable_mosaic.version = 11 : i64} {
  func.func @_classifier_kernel(%arg0: i32, %arg1: memref<8x4xf32, #tpu.memory_space<vmem>>, %arg2: memref<4x8x64xbf16, #tpu.memory_space<vmem>>, %arg3: memref<1x64xf32, #tpu.memory_space<vmem>>, %arg4: memref<64x64xbf16, #tpu.memory_space<vmem>>, %arg5: memref<1x64xf32, #tpu.memory_space<vmem>>, %arg6: memref<64x128xbf16, #tpu.memory_space<vmem>>, %arg7: memref<1x128xf32, #tpu.memory_space<vmem>>, %arg8: memref<8x64xf32, #tpu.memory_space<vmem>>, %arg9: memref<8x128xf32, #tpu.memory_space<vmem>>) attributes {dimension_semantics = [#tpu.dimension_semantics<arbitrary>], iteration_bounds = array<i64: 1>, scalar_prefetch = 0 : i64, scratch_operands = 0 : i64, tpu.core_type = #tpu.core_type<tc>, window_params = [{pipeline_mode = #tpu.pipeline_mode<synchronous>, transform_indices = @transform_0, window_bounds = array<i64: 8, 4>}, {pipeline_mode = #tpu.pipeline_mode<synchronous>, transform_indices = @transform_1, window_bounds = array<i64: 4, 8, 64>}, {pipeline_mode = #tpu.pipeline_mode<synchronous>, transform_indices = @transform_2, window_bounds = array<i64: 1, 64>}, {pipeline_mode = #tpu.pipeline_mode<synchronous>, transform_indices = @transform_3, window_bounds = array<i64: 64, 64>}, {pipeline_mode = #tpu.pipeline_mode<synchronous>, transform_indices = @transform_4, window_bounds = array<i64: 1, 64>}, {pipeline_mode = #tpu.pipeline_mode<synchronous>, transform_indices = @transform_5, window_bounds = array<i64: 64, 128>}, {pipeline_mode = #tpu.pipeline_mode<synchronous>, transform_indices = @transform_6, window_bounds = array<i64: 1, 128>}, {pipeline_mode = #tpu.pipeline_mode<synchronous>, transform_indices = @transform_7, window_bounds = array<i64: 8, 64>}, {pipeline_mode = #tpu.pipeline_mode<synchronous>, transform_indices = @transform_8, window_bounds = array<i64: 8, 128>}]} {
    %c0 = arith.constant 0 : index
    %c0_0 = arith.constant 0 : index
    %0 = vector.load %arg1[%c0, %c0_0] : memref<8x4xf32, #tpu.memory_space<vmem>>, vector<8x4xf32>
    %cst = arith.constant 0.000000e+00 : f32
    %1 = vector.broadcast %cst : f32 to vector<8x64xf32>
    %2 = vector.extract_strided_slice %0 {offsets = [0, 0], sizes = [8, 1], strides = [1, 1]} : vector<8x4xf32> to vector<8x1xf32>
    %c0_1 = arith.constant 0 : index
    %c0_2 = arith.constant 0 : index
    %c0_3 = arith.constant 0 : index
    %3 = vector.load %arg2[%c0_1, %c0_2, %c0_3] : memref<4x8x64xbf16, #tpu.memory_space<vmem>>, vector<1x8x64xbf16>
    %4 = vector.shape_cast %3 : vector<1x8x64xbf16> to vector<8x64xbf16>
    %5 = arith.extf %4 : vector<8x64xbf16> to vector<8x64xf32>
    %6 = vector.broadcast %2 : vector<8x1xf32> to vector<8x64xf32>
    %7 = arith.mulf %6, %5 : vector<8x64xf32>
    %8 = arith.addf %1, %7 : vector<8x64xf32>
    %9 = vector.extract_strided_slice %0 {offsets = [0, 1], sizes = [8, 1], strides = [1, 1]} : vector<8x4xf32> to vector<8x1xf32>
    %c1 = arith.constant 1 : index
    %c0_4 = arith.constant 0 : index
    %c0_5 = arith.constant 0 : index
    %10 = vector.load %arg2[%c1, %c0_4, %c0_5] : memref<4x8x64xbf16, #tpu.memory_space<vmem>>, vector<1x8x64xbf16>
    %11 = vector.shape_cast %10 : vector<1x8x64xbf16> to vector<8x64xbf16>
    %12 = arith.extf %11 : vector<8x64xbf16> to vector<8x64xf32>
    %13 = vector.broadcast %9 : vector<8x1xf32> to vector<8x64xf32>
    %14 = arith.mulf %13, %12 : vector<8x64xf32>
    %15 = arith.addf %8, %14 : vector<8x64xf32>
    %16 = vector.extract_strided_slice %0 {offsets = [0, 2], sizes = [8, 1], strides = [1, 1]} : vector<8x4xf32> to vector<8x1xf32>
    %c2 = arith.constant 2 : index
    %c0_6 = arith.constant 0 : index
    %c0_7 = arith.constant 0 : index
    %17 = vector.load %arg2[%c2, %c0_6, %c0_7] : memref<4x8x64xbf16, #tpu.memory_space<vmem>>, vector<1x8x64xbf16>
    %18 = vector.shape_cast %17 : vector<1x8x64xbf16> to vector<8x64xbf16>
    %19 = arith.extf %18 : vector<8x64xbf16> to vector<8x64xf32>
    %20 = vector.broadcast %16 : vector<8x1xf32> to vector<8x64xf32>
    %21 = arith.mulf %20, %19 : vector<8x64xf32>
    %22 = arith.addf %15, %21 : vector<8x64xf32>
    %23 = vector.extract_strided_slice %0 {offsets = [0, 3], sizes = [8, 1], strides = [1, 1]} : vector<8x4xf32> to vector<8x1xf32>
    %c3 = arith.constant 3 : index
    %c0_8 = arith.constant 0 : index
    %c0_9 = arith.constant 0 : index
    %24 = vector.load %arg2[%c3, %c0_8, %c0_9] : memref<4x8x64xbf16, #tpu.memory_space<vmem>>, vector<1x8x64xbf16>
    %25 = vector.shape_cast %24 : vector<1x8x64xbf16> to vector<8x64xbf16>
    %26 = arith.extf %25 : vector<8x64xbf16> to vector<8x64xf32>
    %27 = vector.broadcast %23 : vector<8x1xf32> to vector<8x64xf32>
    %28 = arith.mulf %27, %26 : vector<8x64xf32>
    %29 = arith.addf %22, %28 : vector<8x64xf32>
    %c0_10 = arith.constant 0 : index
    %c0_11 = arith.constant 0 : index
    %30 = vector.load %arg3[%c0_10, %c0_11] : memref<1x64xf32, #tpu.memory_space<vmem>>, vector<1x64xf32>
    %31 = vector.broadcast %30 : vector<1x64xf32> to vector<8x64xf32>
    %32 = arith.addf %29, %31 : vector<8x64xf32>
    %cst_12 = arith.constant 0.000000e+00 : f32
    %33 = vector.broadcast %cst_12 : f32 to vector<8x64xf32>
    %34 = arith.maximumf %32, %33 : vector<8x64xf32>
    %35 = arith.truncf %34 : vector<8x64xf32> to vector<8x64xbf16>
    %c0_13 = arith.constant 0 : index
    %c0_14 = arith.constant 0 : index
    %36 = vector.load %arg4[%c0_13, %c0_14] : memref<64x64xbf16, #tpu.memory_space<vmem>>, vector<64x64xbf16>
    %cst_15 = arith.constant dense<0.000000e+00> : vector<8x64xf32>
    %37 = tpu.matmul %35, %36, %cst_15 {dimension_numbers = #tpu.dot_dimension_numbers<[1], [0], [0], [1], [0, 0, 1, 1], [], []>} : vector<8x64xbf16>, vector<64x64xbf16>, vector<8x64xf32> -> vector<8x64xf32>
    %c0_16 = arith.constant 0 : index
    %c0_17 = arith.constant 0 : index
    %38 = vector.load %arg5[%c0_16, %c0_17] : memref<1x64xf32, #tpu.memory_space<vmem>>, vector<1x64xf32>
    %39 = vector.broadcast %38 : vector<1x64xf32> to vector<8x64xf32>
    %40 = arith.addf %37, %39 : vector<8x64xf32>
    %cst_18 = arith.constant 0.000000e+00 : f32
    %41 = vector.broadcast %cst_18 : f32 to vector<8x64xf32>
    %42 = arith.maximumf %40, %41 : vector<8x64xf32>
    %43 = arith.truncf %42 : vector<8x64xf32> to vector<8x64xbf16>
    %c0_19 = arith.constant 0 : index
    %c0_20 = arith.constant 0 : index
    %44 = vector.load %arg6[%c0_19, %c0_20] : memref<64x128xbf16, #tpu.memory_space<vmem>>, vector<64x128xbf16>
    %cst_21 = arith.constant dense<0.000000e+00> : vector<8x128xf32>
    %45 = tpu.matmul %43, %44, %cst_21 {dimension_numbers = #tpu.dot_dimension_numbers<[1], [0], [0], [1], [0, 0, 1, 1], [], []>} : vector<8x64xbf16>, vector<64x128xbf16>, vector<8x128xf32> -> vector<8x128xf32>
    %c0_22 = arith.constant 0 : index
    %c0_23 = arith.constant 0 : index
    %46 = vector.load %arg7[%c0_22, %c0_23] : memref<1x128xf32, #tpu.memory_space<vmem>>, vector<1x128xf32>
    %47 = vector.broadcast %46 : vector<1x128xf32> to vector<8x128xf32>
    %48 = arith.addf %45, %47 : vector<8x128xf32>
    %c0_24 = arith.constant 0 : index
    %c0_25 = arith.constant 0 : index
    %49 = vector.load %arg8[%c0_24, %c0_25] : memref<8x64xf32, #tpu.memory_space<vmem>>, vector<8x64xf32>
    tpu.vector_store %arg8[%c0_24, %c0_25], %42 {strides = array<i32>} : memref<8x64xf32, #tpu.memory_space<vmem>>, vector<8x64xf32>,
    %c0_26 = arith.constant 0 : index
    %c0_27 = arith.constant 0 : index
    %50 = vector.load %arg9[%c0_26, %c0_27] : memref<8x128xf32, #tpu.memory_space<vmem>>, vector<8x128xf32>
    tpu.vector_store %arg9[%c0_26, %c0_27], %48 {strides = array<i32>} : memref<8x128xf32, #tpu.memory_space<vmem>>, vector<8x128xf32>,
    return
  }
  func.func @transform_0(%arg0: i32) -> (i32, i32) {
    %c0_i32 = arith.constant 0 : i32
    %c0_i32_0 = arith.constant 0 : i32
    %c0_i32_1 = arith.constant 0 : i32
    return %c0_i32, %c0_i32_0 : i32, i32
  }
  func.func @transform_1(%arg0: i32) -> (i32, i32, i32) {
    %c0_i32 = arith.constant 0 : i32
    %c0_i32_0 = arith.constant 0 : i32
    %c0_i32_1 = arith.constant 0 : i32
    %c0_i32_2 = arith.constant 0 : i32
    return %c0_i32, %c0_i32_0, %c0_i32_1 : i32, i32, i32
  }
  func.func @transform_2(%arg0: i32) -> (i32, i32) {
    %c0_i32 = arith.constant 0 : i32
    %c0_i32_0 = arith.constant 0 : i32
    %c0_i32_1 = arith.constant 0 : i32
    return %c0_i32, %c0_i32_0 : i32, i32
  }
  func.func @transform_3(%arg0: i32) -> (i32, i32) {
    %c0_i32 = arith.constant 0 : i32
    %c0_i32_0 = arith.constant 0 : i32
    %c0_i32_1 = arith.constant 0 : i32
    return %c0_i32, %c0_i32_0 : i32, i32
  }
  func.func @transform_4(%arg0: i32) -> (i32, i32) {
    %c0_i32 = arith.constant 0 : i32
    %c0_i32_0 = arith.constant 0 : i32
    %c0_i32_1 = arith.constant 0 : i32
    return %c0_i32, %c0_i32_0 : i32, i32
  }
  func.func @transform_5(%arg0: i32) -> (i32, i32) {
    %c0_i32 = arith.constant 0 : i32
    %c0_i32_0 = arith.constant 0 : i32
    %c0_i32_1 = arith.constant 0 : i32
    return %c0_i32, %c0_i32_0 : i32, i32
  }
  func.func @transform_6(%arg0: i32) -> (i32, i32) {
    %c0_i32 = arith.constant 0 : i32
    %c0_i32_0 = arith.constant 0 : i32
    %c0_i32_1 = arith.constant 0 : i32
    return %c0_i32, %c0_i32_0 : i32, i32
  }
  func.func @transform_7(%arg0: i32) -> (i32, i32) {
    %c0_i32 = arith.constant 0 : i32
    %c0_i32_0 = arith.constant 0 : i32
    %c0_i32_1 = arith.constant 0 : i32
    return %c0_i32, %c0_i32_0 : i32, i32
  }
  func.func @transform_8(%arg0: i32) -> (i32, i32) {
    %c0_i32 = arith.constant 0 : i32
    %c0_i32_0 = arith.constant 0 : i32
    %c0_i32_1 = arith.constant 0 : i32
    return %c0_i32, %c0_i32_0 : i32, i32
  }
}

</mosaic_0001>

<bundles_post_ra>
// kernel: vgg19keep1_forward.3
= control target key start
LH: loop header
LB: loop body
LE: loop exit
PB: predicated region body
PF: predicated region fallthrough
CT: control target
= control target key end

     0   :  { %14 = vsyncpa [#allocation3], 0  ;;  %v327_v1 = vmov 0   ;;  %v328_v2 = vmov 2   ;;  %s426_s0 = inlined_call_operand.vmem [shape: f32[8,4], index: 0, kind: input, shape index: {}]   ;;  %s427_s1 = inlined_call_operand.vmem [shape: bf16[4,8,64], index: 1, kind: input, shape index: {}]   ;;  %s428_s2 = inlined_call_operand.vmem [shape: f32[1,64], index: 2, kind: input, shape index: {}]   ;;  %s429_s3 = inlined_call_operand.vmem [shape: bf16[64,64], index: 3, kind: input, shape index: {}]   ;;  %s430_s4 = inlined_call_operand.vmem [shape: f32[1,64], index: 4, kind: input, shape index: {}]   ;;  %s431_s5 = inlined_call_operand.vmem [shape: bf16[64,128], index: 5, kind: input, shape index: {}]   ;;  %s432_s6 = inlined_call_operand.vmem [shape: f32[1,128], index: 6, kind: input, shape index: {}]   ;;  %s433_s7 = inlined_call_operand.hbm [shape: f32[8,64], index: 7, kind: output, shape index: {0}]   ;;  %s434_s8 = inlined_call_operand.hbm [shape: f32[8,128], index: 8, kind: output, shape index: {1}]  }
   0x1   :  { %v31_v0 = vld [vmem:[%s426_s0] sm:$0xff]  ;;  %267 = vset.pattern.permute.xlu0 %v327_v1  ;;  %269 = vset.pattern.permute.xlu1 %v328_v2 }
   0x2   :  { %36 = vperm.xlu0 %267, %v31_v0   ;;  %54 = vperm.xlu1 %269, %v31_v0  }
   0x3   :  { %15 = vsyncpa [#allocation5], 0  ;;  %v329_v3 = vmov 1   ;;  %v330_v4 = vmov 3   ;;  %v256_v5 = vld [vmem:[%s429_s3 + $0x18] sm:$0xff]  ;;  %v255_v6 = vld [vmem:[%s429_s3 + $0x10] sm:$0xff] }
   0x4   :  { %119 = vmatpush.bf16.msra.mxu0 %v256_v5  ;;  %v254_v7 = vld [vmem:[%s429_s3 + $0x8] sm:$0xff]  ;;  %v253_v8 = vld [vmem:[%s429_s3] sm:$0xff]  ;;  %v260_v9 = vld [vmem:[%s431_s5 + $0x18] sm:$0xff]  ;;  %vm111_vm0 = vcmask 523264   ;;  %s191_s0 = sshll.u32 %s433_s7, 4  ;;  %s202_s13 = sshll.u32 %s434_s8, 4  ;;  %s192_s0 = int_to_ptr.hbm [resolvable:$true] %s191_s0  ;;  %s203_s13 = int_to_ptr.hbm [resolvable:$true] %s202_s13 }
   0x5   :  { %173 = vmatpush.bf16.msra.mxu1 %v260_v9  ;;  %v259_v10 = vld [vmem:[%s431_s5 + $0x10] sm:$0xff]  ;;  %v32_v13 = vld [vmem:[%s427_s1] sm:$0xff]   ;;  %v217_v14 = vld [vmem:[%s427_s1 + $0x8] sm:$0xff]  }
   0x6   :  { %v33_v15 = vunpack.c.l.bf16 %v32_v13  ;;  %v43_v16 = vunpack.c.h.bf16 %v32_v13  ;;  %v52_v17 = vunpack.c.l.bf16 %v217_v14  ;;  %v61_v18 = vunpack.c.h.bf16 %v217_v14  ;;  %v272_v26 = vld [vmem:[%s428_s2] ss:$0 sm:$0xff]  ;;  %v258_v32 = vld [vmem:[%s431_s5 + $0x8] sm:$0xff]  ;;  %s331_s2 = smov [#allocation2]  }
   0x7   :  { %v257_v33 = vld [vmem:[%s431_s5] sm:$0xff]  ;;  %s189_s28 = sshll.u32 %s331_s2, 4  ;;  %s190_s28 = int_to_ptr.vmem [resolvable:$true] %s189_s28 }
   0x8   :  { %120 = vmatpush.bf16.msra.mxu0 %v255_v6  ;;  %v273_v34 = vld [vmem:[%s430_s4] ss:$0 sm:$0xff]  ;;  %s332_s4 = smov [#allocation4]  }
   0x9   :  { %174 = vmatpush.bf16.msra.mxu1 %v259_v10  ;;  %v274_v40 = vld [vmem:[%s432_s6] ss:$0 sm:$0xff]  ;;  %s200_s10 = sshll.u32 %s332_s4, 4  ;;  %s201_s10 = int_to_ptr.vmem [resolvable:$true] %s200_s10 }
   0xa   :  { %268 = vset.pattern.permute.xlu0 %v329_v3  ;;  %270 = vset.pattern.permute.xlu1 %v330_v4 }
   0xb   :  { %45 = vperm.xlu0 %268, %v31_v0   ;;  %63 = vperm.xlu1 %270, %v31_v0  }
   0xc   :  { %121 = vmatpush.bf16.msra.mxu0 %v254_v7 }
   0xd   :  { %175 = vmatpush.bf16.msra.mxu1 %v258_v32 }
  0x10   :  { %122 = vmatpush.bf16.msra.mxu0 %v253_v8 }
  0x11   :  { %176 = vmatpush.bf16.msra.mxu1 %v257_v33 }
  0x13   :  { %271 = vset.pattern.permute.xlu0 %v330_v4 }
  0x74   :  { %v37_v11 = vpop.permute.xlu0 %36  ;;  %v55_v12 = vpop.permute.xlu1 %54 }
  0x75   :  { %v39_v21 = vmul.f32 %v37_v11, %v33_v15  ;;  %v57_v23 = vmul.f32 %v55_v12, %v52_v17 }
  0x7d   :  { %v46_v19 = vpop.permute.xlu0 %45  ;;  %v64_v20 = vpop.permute.xlu1 %63 }
  0x7e   :  { %v48_v22 = vmul.f32 %v46_v19, %v43_v16  ;;  %v66_v25 = vmul.f32 %v64_v20, %v61_v18 }
  0x80   :  { %v49_v24 = vadd.f32 %v48_v22, %v39_v21 }
  0x82   :  { %v58_v27 = vadd.f32 %v57_v23, %v49_v24 }
  0x84   :  { %v67_v28 = vadd.f32 %v66_v25, %v58_v27 }
  0x86   :  { %v72_v29 = vadd.f32 %v272_v26, %v67_v28 }
  0x88   :  { %v73_v30 = vmax.f32 %v72_v29, 0.0 }
  0x8a   :  { %v74_v31 = vpack.c.bf16 %v73_v30, %v73_v30 }
  0x8c   :  { %235 = vmatmul.msk.bf16.vlgmr.msra.gmra.mxu0 %vm111_vm0, %v74_v31 }
 0x109   :  { %v124_v35 = vpop.f32.mrf.mxu0 }
 0x10a   :  { %v125_v36 = vadd.f32 %v273_v34, %v124_v35 }
 0x10c   :  { %v128_v37 = vmax.f32 %v125_v36, 0.0 }
 0x10e   :  { %v129_v38 = vpack.c.bf16 %v128_v37, %v128_v37  ;;  %182 = vst.msk [vmem:[#allocation2] sm:$0xff] %vm111_vm0, %v128_v37 }
 0x10f   :  { %194 = dma.vmem_to_hbm [thread:$0]  %s190_s28, 128, %s192_s0, [#allocation3]  }
 0x110   :  { %252 = vmatmul.msk.bf16.vlgmr.msra.gmra.mxu1 %vm111_vm0, %v129_v38 }
 0x111   :  { %v126_v39 = vpop.f32.mrf.mxu0 }
 0x18d   :  { %v178_v41 = vpop.f32.mrf.mxu1 }
 0x18e   :  { %v179_v42 = vadd.f32 %v274_v40, %v178_v41 }
 0x190   :  { %183 = vst [vmem:[#allocation4] sm:$0xff] %v179_v42 }
 0x191   :  { %205 = dma.vmem_to_hbm [thread:$0]  %s201_s10, 128, %s203_s13, [#allocation5]  }
 0x195   :  { %v180_v43 = vpop.f32.mrf.mxu1 }
 0x196   :  { %323 = dma.done.wait [#allocation3], 128  }
 0x197   :  { %324 = vsyncadd [#allocation3], 4294967168 }
 0x198   :  { %325 = dma.done.wait [#allocation5], 128  }
 0x199   :  { %326 = vsyncadd [#allocation5], 4294967168 }
 0x19a   :  { %214 = vsyncpa [#allocation3], 1 }
 0x19b   :  { %215 = vsyncpa [#allocation5], 1 }

// kernel: vgg19keep1_forward.2
= control target key start
LH: loop header
LB: loop body
LE: loop exit
PB: predicated region body
PF: predicated region fallthrough
CT: control target
= control target key end

     0   :  { %s4304_s24 = smov 0   ;;  %s5931_s0 = inlined_call_operand.vmem [shape: f32[2,18,18,3], index: 0, kind: input, shape index: {}]   ;;  %s5932_s1 = inlined_call_operand.vmem [shape: bf16[9,3,8], index: 1, kind: input, shape index: {}]   ;;  %s5933_s2 = inlined_call_operand.vmem [shape: f32[1,8], index: 2, kind: input, shape index: {}]   ;;  %s5934_s3 = inlined_call_operand.vmem [shape: bf16[9,8,16], index: 3, kind: input, shape index: {}]   ;;  %s5935_s4 = inlined_call_operand.vmem [shape: f32[1,16], index: 4, kind: input, shape index: {}]   ;;  %s5936_s5 = inlined_call_operand.vmem [shape: bf16[9,16,8], index: 5, kind: input, shape index: {}]   ;;  %s5937_s6 = inlined_call_operand.vmem [shape: f32[1,8], index: 6, kind: input, shape index: {}]   ;;  %s5938_s7 = inlined_call_operand.vmem [shape: f32[2,4,8], index: 7, kind: output, shape index: {}]  }
   0x1 LB: > { %s3744_s25 = sadd.s32 4294967295, %s4260_s24   ;;  %p3748_p0 = scmp.ge.s32.totalorder %s4260_s24, 1  ;;  %s4260_s24 = sphi %s4304_s24, %s17_s24  }
   0x2   : > { %p237_p1 = scmp.lt.s32.totalorder %s4260_s24, 3 }
   0x4   : > { %p238_p2 = pnand %p3748_p0, %p237_p1 }
   0x6   : > { %241 = sbr.rel (%p238_p2) target bundleno = 1455 (0x5af), region = 48 }
   0xb   : > { %v3751_v0 = vld [vmem:[%s5932_s1 + $0x2] sm:$0x3]  ;;  %vm426_vm0 = vcmask 1040384   ;;  %vm427_vm1 = vcmask 1041408   ;;  %p268_p3 = scmp.lt.s32.totalorder %s3744_s25, 1  ;;  %v4262_v1 = vmov 65535  }
   0xc   : > { %v428_v2 = vsel %vm426_vm0, 4294967295, %v4262_v1  ;;  %v326_v3 = vld [vmem:[%s5932_s1] sm:$0x3]  ;;  %v3882_v4 = vld [vmem:[%s5932_s1 + $0x8] sm:$0x3]  ;;  %vm377_vm2 = vcmask 23552  }
   0xd   : > { %v4321_v5 = vsel %vm427_vm1, %v428_v2, 0  ;;  %s6015_s25 = smov (!%p268_p3, %s3744_s25), 1  ;;  %v3784_v6 = vld [vmem:[%s5932_s1 + $0x4] sm:$0x3]  ;;  %v3833_v7 = vld [vmem:[%s5932_s1 + $0x6] sm:$0x3] }
   0xe   : > { %v431_v8 = vand.u32 %v3751_v0, %v4321_v5  ;;  %v571_v9 = vand.u32 %v4321_v5, %v326_v3  ;;  %v1206_v10 = vand.u32 %v3882_v4, %v4321_v5  ;;  %v761_v11 = vand.u32 %v3784_v6, %v4321_v5  ;;  %s4240_s13 = smul.u32 432, %s6015_s25  ;;  %s3750_s27 = sshll.u32 %s6015_s25, 2 }
   0xf   : > { %v984_v12 = vand.u32 %v3833_v7, %v4321_v5  ;;  %vm2427_vm3 = vcmask 1043456   ;;  %vm2302_vm4 = vcmask 64512   ;;  %vm2359_vm5 = vcmask 58368   ;;  %s276_s30 = scalar_lea.vmem %s5938_s7, %s3750_s27 }
  0x10   : > { %440 = vmatpush.bf16.msra.mxu0 %v431_v8  ;;  %4238 = vmatpush.bf16.msra.mxu2 %v431_v8  ;;  %s4340_s16 = scalar_lea.vmem %s5931_s0, %s4240_s13  ;;  %vm2987_vm6 = vcmask 130048   ;;  %vm2989_vm7 = vcmask 123904   ;;  %vm3689_vm8 = vcmask 60416  }
  0x11   : > { %580 = vmatpush.bf16.msra.mxu1 %v571_v9  ;;  %4239 = vmatpush.bf16.msra.mxu3 %v571_v9  ;;  %v327_v13 = vld [vmem:[%s4340_s16 + $0x1] sm:$0xff]  ;;  %v328_v14 = vld [vmem:[%s4340_s16 + $0x9] sm:$0xff]  ;;  %v355_v15 = vld [vmem:[%s4340_s16 + $0x151] sm:$0xff] }
  0x12   : > { %v359_v16 = vpack.c.bf16 %v328_v14, %v327_v13  ;;  %v356_v17 = vld [vmem:[%s4340_s16 + $0x159] sm:$0xff]  ;;  %v279_v19 = vld [vmem:[%s4340_s16 + $0x8] sm:$0xff]  ;;  %v306_v22 = vld [vmem:[%s4340_s16 + $0x150] sm:$0xff] }
  0x13   : > { %v278_v18 = vld [vmem:[%s4340_s16] sm:$0xff]  ;;  %v373_v20 = vpack.c.bf16 %v356_v17, %v355_v15  ;;  %v307_v23 = vld [vmem:[%s4340_s16 + $0x158] sm:$0xff]  ;;  %v357_v27 = vld [vmem:[%s4340_s16 + $0x169] sm:$0xff] }
  0x14   : > { %1215 = vmatpush.bf16.msrb.mxu0 %v1206_v10  ;;  %770 = vmatpush.bf16.msrb.mxu2 %v761_v11  ;;  %v310_v21 = vpack.c.bf16 %v279_v19, %v278_v18  ;;  %v4351_v24 = vpack.c.bf16 %v307_v23, %v306_v22  ;;  %v329_v25 = vld [vmem:[%s4340_s16 + $0x19] sm:$0xff]  ;;  %v330_v26 = vld [vmem:[%s4340_s16 + $0x21] sm:$0xff]  ;;  %v358_v28 = vld [vmem:[%s4340_s16 + $0x171] sm:$0xff] }
  0x15   : > { %993 = vmatpush.bf16.msrb.mxu3 %v984_v12  ;;  %3752 = vmatmul.msk.bf16.vlgmr.msra.gmra.mxu0 %vm377_vm2, %v359_v16  ;;  %v280_v29 = vld [vmem:[%s4340_s16 + $0x18] sm:$0xff]  ;;  %v281_v30 = vld [vmem:[%s4340_s16 + $0x20] sm:$0xff]  ;;  %v308_v31 = vld [vmem:[%s4340_s16 + $0x168] sm:$0xff]  ;;  %v4365_v33 = vpack.c.bf16 %v330_v26, %v329_v25  ;;  %v374_v34 = vpack.c.bf16 %v358_v28, %v357_v27 }
  0x16   : > { %3766 = vmatmul.msk.bf16.vlgmr.msra.gmra.mxu2 %vm377_vm2, %v373_v20  ;;  %3768 = vmatmul.msk.bf16.vlgmr.msra.gmra.mxu1 %vm377_vm2, %v310_v21  ;;  %v309_v32 = vld [vmem:[%s4340_s16 + $0x170] sm:$0xff]  ;;  %v311_v35 = vpack.c.bf16 %v281_v30, %v280_v29  ;;  %v332_v38 = vld [vmem:[%s4340_s16 + $0x39] sm:$0xff]  ;;  %v662_v41 = vld [vmem:[%s4340_s16 + $0x2] sm:$0xff] }
  0x17   : > { %3782 = vmatmul.msk.bf16.vlgmr.msra.gmra.mxu3 %vm377_vm2, %v4351_v24  ;;  %v4367_v36 = vpack.c.bf16 %v309_v32, %v308_v31  ;;  %v331_v37 = vld [vmem:[%s4340_s16 + $0x31] sm:$0xff]  ;;  %v333_v46 = vld [vmem:[%s4340_s16 + $0x49] sm:$0xff]  ;;  %v664_v50 = vld [vmem:[%s4340_s16 + $0x1a] sm:$0xff] }
  0x18   : > { %v282_v39 = vld [vmem:[%s4340_s16 + $0x30] sm:$0xff]  ;;  %v283_v40 = vld [vmem:[%s4340_s16 + $0x38] sm:$0xff]  ;;  %v4381_v43 = vpack.c.bf16 %v332_v38, %v331_v37  ;;  %v284_v48 = vld [vmem:[%s4340_s16 + $0x48] sm:$0xff] }
  0x19   : > { %v663_v42 = vld [vmem:[%s4340_s16 + $0xa] sm:$0xff]  ;;  %v4383_v44 = vpack.c.bf16 %v283_v40, %v282_v39  ;;  %v665_v51 = vld [vmem:[%s4340_s16 + $0x22] sm:$0xff]  ;;  %v666_v59 = vld [vmem:[%s4340_s16 + $0x32] sm:$0xff] }
  0x1a   : > { %v694_v45 = vpack.c.bf16 %v663_v42, %v662_v41  ;;  %v334_v47 = vld [vmem:[%s4340_s16 + $0x51] sm:$0xff]  ;;  %v4401_v54 = vpack.c.bf16 %v665_v51, %v664_v50  ;;  %v335_v55 = vld [vmem:[%s4340_s16 + $0x61] sm:$0xff]  ;;  %v336_v56 = vld [vmem:[%s4340_s16 + $0x69] sm:$0xff] }
  0x1b   : > { %v285_v49 = vld [vmem:[%s4340_s16 + $0x50] sm:$0xff]  ;;  %v4397_v52 = vpack.c.bf16 %v334_v47, %v333_v46  ;;  %v286_v57 = vld [vmem:[%s4340_s16 + $0x60] sm:$0xff]  ;;  %v287_v58 = vld [vmem:[%s4340_s16 + $0x68] sm:$0xff]  ;;  %v4417_v61 = vpack.c.bf16 %v336_v56, %v335_v55 }
  0x1c   : > { %v4399_v53 = vpack.c.bf16 %v285_v49, %v284_v48  ;;  %v667_v60 = vld [vmem:[%s4340_s16 + $0x3a] sm:$0xff]  ;;  %v4419_v62 = vpack.c.bf16 %v287_v58, %v286_v57  ;;  %v668_v4 = vld [vmem:[%s4340_s16 + $0x4a] sm:$0xff]  ;;  %v669_v6 = vld [vmem:[%s4340_s16 + $0x52] sm:$0xff] }
  0x1d   : > { %v4421_v63 = vpack.c.bf16 %v667_v60, %v666_v59  ;;  %v337_v0 = vld [vmem:[%s4340_s16 + $0x79] sm:$0xff]  ;;  %v338_v1 = vld [vmem:[%s4340_s16 + $0x81] sm:$0xff]  ;;  %v4441_v9 = vpack.c.bf16 %v669_v6, %v668_v4  ;;  %v339_v10 = vld [vmem:[%s4340_s16 + $0x91] sm:$0xff] }
  0x1e   : > { %v288_v2 = vld [vmem:[%s4340_s16 + $0x78] sm:$0xff]  ;;  %v289_v3 = vld [vmem:[%s4340_s16 + $0x80] sm:$0xff]  ;;  %v4437_v7 = vpack.c.bf16 %v338_v1, %v337_v0  ;;  %v290_v12 = vld [vmem:[%s4340_s16 + $0x90] sm:$0xff] }
  0x1f   : > { %v4439_v8 = vpack.c.bf16 %v289_v3, %v288_v2  ;;  %v340_v11 = vld [vmem:[%s4340_s16 + $0x99] sm:$0xff]  ;;  %v670_v14 = vld [vmem:[%s4340_s16 + $0x62] sm:$0xff]  ;;  %v671_v15 = vld [vmem:[%s4340_s16 + $0x6a] sm:$0xff] }
  0x20   : > { %v291_v13 = vld [vmem:[%s4340_s16 + $0x98] sm:$0xff]  ;;  %v4457_v16 = vpack.c.bf16 %v340_v11, %v339_v10  ;;  %v4461_v18 = vpack.c.bf16 %v671_v15, %v670_v14  ;;  %v341_v19 = vld [vmem:[%s4340_s16 + $0xa9] sm:$0xff]  ;;  %v343_v29 = vld [vmem:[%s4340_s16 + $0xc1] sm:$0xff] }
  0x21   : > { %v4459_v17 = vpack.c.bf16 %v291_v13, %v290_v12  ;;  %v342_v20 = vld [vmem:[%s4340_s16 + $0xb1] sm:$0xff]  ;;  %v292_v21 = vld [vmem:[%s4340_s16 + $0xa8] sm:$0xff]  ;;  %v672_v23 = vld [vmem:[%s4340_s16 + $0x7a] sm:$0xff] }
  0x22   : > { %v293_v22 = vld [vmem:[%s4340_s16 + $0xb0] sm:$0xff]  ;;  %v673_v25 = vld [vmem:[%s4340_s16 + $0x82] sm:$0xff]  ;;  %v4477_v26 = vpack.c.bf16 %v342_v20, %v341_v19  ;;  %v345_v51 = vld [vmem:[%s4340_s16 + $0xd9] sm:$0xff] }
  0x23   : > { %v4479_v27 = vpack.c.bf16 %v293_v22, %v292_v21  ;;  %v4481_v28 = vpack.c.bf16 %v673_v25, %v672_v23  ;;  %v344_v30 = vld [vmem:[%s4340_s16 + $0xc9] sm:$0xff]  ;;  %v294_v31 = vld [vmem:[%s4340_s16 + $0xc0] sm:$0xff]  ;;  %v296_v56 = vld [vmem:[%s4340_s16 + $0xd8] sm:$0xff] }
  0x24   : > { %v295_v32 = vld [vmem:[%s4340_s16 + $0xc8] sm:$0xff]  ;;  %v4497_v37 = vpack.c.bf16 %v344_v30, %v343_v29  ;;  %v297_v57 = vld [vmem:[%s4340_s16 + $0xe0] sm:$0xff]  ;;  %v677_v59 = vld [vmem:[%s4340_s16 + $0xb2] sm:$0xff] }
  0x25   : > { %3753 = vmatmul.msk.bf16.gmra.mxu0 %vm377_vm2, %v4365_v33  ;;  %v4499_v39 = vpack.c.bf16 %v295_v32, %v294_v31  ;;  %v346_v55 = vld [vmem:[%s4340_s16 + $0xe1] sm:$0xff]  ;;  %v676_v58 = vld [vmem:[%s4340_s16 + $0xaa] sm:$0xff]  ;;  %v4521_v3 = vpack.c.bf16 %v297_v57, %v296_v56  ;;  %v348_v22 = vld [vmem:[%s4340_s16 + $0xf9] sm:$0xff] }
  0x26   : > { %3767 = vmatmul.msk.bf16.gmra.mxu2 %vm377_vm2, %v374_v34  ;;  %3769 = vmatmul.msk.bf16.gmra.mxu1 %vm377_vm2, %v311_v35  ;;  %v674_v34 = vld [vmem:[%s4340_s16 + $0x92] sm:$0xff]  ;;  %v4519_v0 = vpack.c.bf16 %v346_v55, %v345_v51  ;;  %v4523_v4 = vpack.c.bf16 %v677_v59, %v676_v58  ;;  %v678_v29 = vld [vmem:[%s4340_s16 + $0xc2] sm:$0xff]  ;;  %v679_v30 = vld [vmem:[%s4340_s16 + $0xca] sm:$0xff] }
  0x27   : > { %3783 = vmatmul.msk.bf16.gmra.mxu3 %vm377_vm2, %v4367_v36  ;;  %v347_v21 = vld [vmem:[%s4340_s16 + $0xf1] sm:$0xff] }
  0x28   : > { %v298_v23 = vld [vmem:[%s4340_s16 + $0xf0] sm:$0xff]  ;;  %v299_v25 = vld [vmem:[%s4340_s16 + $0xf8] sm:$0xff]  ;;  %v4545_v32 = vpack.c.bf16 %v348_v22, %v347_v21 }
  0x35   : > { %3754 = vmatmul.msk.bf16.gmra.mxu0 %vm377_vm2, %v4381_v43 }
  0x36   : > { %3770 = vmatmul.msk.bf16.gmra.mxu1 %vm377_vm2, %v4383_v44  ;;  %3785 = vmatmul.msk.bf16.vlgmr.msrb.gmra.mxu2 %vm377_vm2, %v694_v45 }
  0x37   : > { %3834 = vmatmul.msk.bf16.vlgmr.msrb.gmra.mxu3 %vm377_vm2, %v311_v35  ;;  %v675_v35 = vld [vmem:[%s4340_s16 + $0x9a] sm:$0xff] }
  0x38   : > { %v4501_v40 = vpack.c.bf16 %v675_v35, %v674_v34 }
  0x45   : > { %3755 = vmatmul.msk.bf16.gmra.mxu0 %vm377_vm2, %v4397_v52 }
  0x46   : > { %3771 = vmatmul.msk.bf16.gmra.mxu1 %vm377_vm2, %v4399_v53  ;;  %3786 = vmatmul.msk.bf16.gmra.mxu2 %vm377_vm2, %v4401_v54 }
  0x47   : > { %3835 = vmatmul.msk.bf16.gmra.mxu3 %vm377_vm2, %v4383_v44 }
  0x55   : > { %3756 = vmatmul.msk.bf16.gmra.mxu0 %vm377_vm2, %v4417_v61 }
  0x56   : > { %3772 = vmatmul.msk.bf16.gmra.mxu1 %vm377_vm2, %v4419_v62  ;;  %3787 = vmatmul.msk.bf16.gmra.mxu2 %vm377_vm2, %v4421_v63 }
  0x57   : > { %3836 = vmatmul.msk.bf16.gmra.mxu3 %vm377_vm2, %v4399_v53 }
  0x65   : > { %3757 = vmatmul.msk.bf16.gmra.mxu0 %vm377_vm2, %v4437_v7 }
  0x66   : > { %3773 = vmatmul.msk.bf16.gmra.mxu1 %vm377_vm2, %v4439_v8  ;;  %3788 = vmatmul.msk.bf16.gmra.mxu2 %vm377_vm2, %v4441_v9 }
  0x67   : > { %3837 = vmatmul.msk.bf16.gmra.mxu3 %vm377_vm2, %v4419_v62 }
  0x75   : > { %3758 = vmatmul.msk.bf16.gmra.mxu0 %vm377_vm2, %v4457_v16 }
  0x76   : > { %3774 = vmatmul.msk.bf16.gmra.mxu1 %vm377_vm2, %v4459_v17  ;;  %3789 = vmatmul.msk.bf16.gmra.mxu2 %vm377_vm2, %v4461_v18 }
  0x77   : > { %3838 = vmatmul.msk.bf16.gmra.mxu3 %vm377_vm2, %v4439_v8 }
  0x85   : > { %3759 = vmatmul.msk.bf16.gmra.mxu0 %vm377_vm2, %v4477_v26 }
  0x86   : > { %3775 = vmatmul.msk.bf16.gmra.mxu1 %vm377_vm2, %v4479_v27  ;;  %3790 = vmatmul.msk.bf16.gmra.mxu2 %vm377_vm2, %v4481_v28 }
  0x87   : > { %3839 = vmatmul.msk.bf16.gmra.mxu3 %vm377_vm2, %v4459_v17 }
  0x92   : > { %v442_v38 = vpop.f32.mrf.mxu0 }
  0x93   : > { %v582_v41 = vpop.f32.mrf.mxu1 }
  0x94   : > { %v583_v42 = vadd.f32 %v582_v41, %v442_v38  ;;  %v4547_v38 = vpack.c.bf16 %v299_v25, %v298_v23  ;;  %v4549_v41 = vpack.c.bf16 %v679_v30, %v678_v29 }
  0x95   : > { %3760 = vmatmul.msk.bf16.gmra.mxu0 %vm377_vm2, %v4497_v37 }
  0x96   : > { %3776 = vmatmul.msk.bf16.gmra.mxu1 %vm377_vm2, %v4499_v39  ;;  %3791 = vmatmul.msk.bf16.gmra.mxu2 %vm377_vm2, %v4501_v40  ;;  %5949 = vst [vmem:[#allocation6_spill] sm:$0xff] %v4547_v38 }
  0x97   : > { %3840 = vmatmul.msk.bf16.gmra.mxu3 %vm377_vm2, %v4479_v27 }
  0x99   : > { %v512_v45 = vpop.f32.mrf.mxu2 }
  0x9a   : > { %v444_v46 = vpop.f32.mrf.mxu0  ;;  %v652_v47 = vpop.f32.mrf.mxu3 }
  0x9b   : > { %v584_v48 = vpop.f32.mrf.mxu1  ;;  %v4511_v49 = vadd.f32 %v652_v47, %v512_v45 }
  0x9c   : > { %v585_v50 = vadd.f32 %v584_v48, %v444_v46 }
  0xa1   : > { %v514_v60 = vpop.f32.mrf.mxu2 }
  0xa2   : > { %v447_v1 = vpop.f32.mrf.mxu0  ;;  %v654_v2 = vpop.f32.mrf.mxu3 }
  0xa3   : > { %v587_v6 = vpop.f32.mrf.mxu1  ;;  %v4525_v10 = vadd.f32 %v654_v2, %v514_v60  ;;  %v349_v60 = vld [vmem:[%s4340_s16 + $0x109] sm:$0xff] }
  0xa4   : > { %v588_v11 = vadd.f32 %v587_v6, %v447_v1  ;;  %v350_v1 = vld [vmem:[%s4340_s16 + $0x111] sm:$0xff]  ;;  %v300_v2 = vld [vmem:[%s4340_s16 + $0x108] sm:$0xff] }
  0xa5   : > { %3761 = vmatmul.msk.bf16.gmra.mxu0 %vm377_vm2, %v4519_v0  ;;  %v301_v6 = vld [vmem:[%s4340_s16 + $0x110] sm:$0xff] }
  0xa6   : > { %3777 = vmatmul.msk.bf16.gmra.mxu1 %vm377_vm2, %v4521_v3  ;;  %3792 = vmatmul.msk.bf16.gmra.mxu2 %vm377_vm2, %v4523_v4 }
  0xa7   : > { %3841 = vmatmul.msk.bf16.gmra.mxu3 %vm377_vm2, %v4499_v39 }
  0xa9   : > { %v517_v12 = vpop.f32.mrf.mxu2 }
  0xaa   : > { %v449_v13 = vpop.f32.mrf.mxu0  ;;  %v657_v14 = vpop.f32.mrf.mxu3 }
  0xab   : > { %v589_v15 = vpop.f32.mrf.mxu1  ;;  %v4535_v19 = vadd.f32 %v657_v14, %v517_v12  ;;  %v680_v12 = vld [vmem:[%s4340_s16 + $0xda] sm:$0xff] }
  0xac   : > { %v4537_v20 = vadd.f32 %v589_v15, %v449_v13  ;;  %v681_v13 = vld [vmem:[%s4340_s16 + $0xe2] sm:$0xff]  ;;  %v4573_v15 = vpack.c.bf16 %v350_v1, %v349_v60 }
  0xad   : > { %v4577_v25 = vpack.c.bf16 %v681_v13, %v680_v12  ;;  %v303_v12 = vld [vmem:[%s4340_s16 + $0x128] sm:$0xff]  ;;  %v682_v13 = vld [vmem:[%s4340_s16 + $0xf2] sm:$0xff] }
  0xb1   : > { %v519_v31 = vpop.f32.mrf.mxu2 }
  0xb2   : > { %v452_v34 = vpop.f32.mrf.mxu0  ;;  %v659_v35 = vpop.f32.mrf.mxu3 }
  0xb3   : > { %v592_v45 = vpop.f32.mrf.mxu1  ;;  %v4551_v46 = vadd.f32 %v659_v35, %v519_v31 }
  0xb4   : > { %v4553_v47 = vadd.f32 %v592_v45, %v452_v34 }
  0xb5   : > { %5950 = vst [vmem:[#allocation7_spill] sm:$0xff] %v4551_v46  ;;  %3762 = vmatmul.msk.bf16.gmra.mxu0 %vm377_vm2, %v4545_v32 }
  0xb6   : > { %3778 = vmatmul.msk.bf16.gmra.mxu1 %vm377_vm2, %v4547_v38  ;;  %3793 = vmatmul.msk.bf16.gmra.mxu2 %vm377_vm2, %v4549_v41 }
  0xb7   : > { %3842 = vmatmul.msk.bf16.gmra.mxu3 %vm377_vm2, %v4521_v3 }
  0xb9   : > { %v772_v48 = vpop.f32.mrf.mxu2 }
  0xba   : > { %v852_v51 = vadd.f32 %v772_v48, %v583_v42  ;;  %v454_v55 = vpop.f32.mrf.mxu0  ;;  %v995_v56 = vpop.f32.mrf.mxu3  ;;  %v4575_v42 = vpack.c.bf16 %v301_v6, %v300_v2  ;;  %v352_v2 = vld [vmem:[%s4340_s16 + $0x129] sm:$0xff]  ;;  %v302_v6 = vld [vmem:[%s4340_s16 + $0x120] sm:$0xff] }
  0xbb   : > { %v594_v57 = vpop.f32.mrf.mxu1 }
  0xbc   : > { %v4563_v58 = vadd.f32 %v594_v57, %v454_v55  ;;  %v4565_v59 = vadd.f32 %v995_v56, %v852_v51  ;;  %5951 = vst [vmem:[#allocation8_spill] sm:$0xff] %v4575_v42  ;;  %v3980_v56 = vld [vmem:[%s5932_s1 + $0xc] sm:$0x3]  ;;  %v4029_v57 = vld [vmem:[%s5932_s1 + $0xe] sm:$0x3] }
  0xbd   : > { %v1651_v60 = vand.u32 %v3980_v56, %v4321_v5  ;;  %v1873_v1 = vand.u32 %v4029_v57, %v4321_v5 }
  0xbf   : > { %1660 = vmatpush.bf16.msra.mxu2 %v1651_v60  ;;  %1882 = vmatpush.bf16.msra.mxu3 %v1873_v1 }
  0xc1   : > { %v774_v14 = vpop.f32.mrf.mxu2 }
  0xc2   : > { %v853_v21 = vadd.f32 %v774_v14, %v585_v50  ;;  %v457_v22 = vpop.f32.mrf.mxu0  ;;  %v997_v23 = vpop.f32.mrf.mxu3  ;;  %v683_v14 = vld [vmem:[%s4340_s16 + $0xfa] sm:$0xff] }
  0xc3   : > { %v597_v29 = vpop.f32.mrf.mxu1 }
  0xc4   : > { %v4579_v30 = vadd.f32 %v597_v29, %v457_v22  ;;  %v4581_v31 = vadd.f32 %v997_v23, %v853_v21 }
  0xc5   : > { %3763 = vmatmul.msk.bf16.gmra.mxu0 %vm377_vm2, %v4573_v15 }
  0xc6   : > { %3779 = vmatmul.msk.bf16.gmra.mxu1 %vm377_vm2, %v4575_v42  ;;  %3794 = vmatmul.msk.bf16.gmra.mxu2 %vm377_vm2, %v4577_v25 }
  0xc7   : > { %3843 = vmatmul.msk.bf16.gmra.mxu3 %vm377_vm2, %v4547_v38 }
  0xc9   : > { %v777_v50 = vpop.f32.mrf.mxu2 }
  0xca   : > { %v854_v34 = vadd.f32 %v777_v50, %v588_v11  ;;  %v459_v35 = vpop.f32.mrf.mxu0  ;;  %v1000_v45 = vpop.f32.mrf.mxu3  ;;  %v351_v11 = vld [vmem:[%s4340_s16 + $0x121] sm:$0xff] }
  0xcb   : > { %v599_v48 = vpop.f32.mrf.mxu1  ;;  %v4609_v22 = vpack.c.bf16 %v352_v2, %v351_v11 }
  0xcc   : > { %v4591_v51 = vadd.f32 %v599_v48, %v459_v35  ;;  %v4593_v55 = vadd.f32 %v1000_v45, %v854_v34  ;;  %v4612_v34 = vpack.c.bf16 %v303_v12, %v302_v6  ;;  %v4614_v35 = vpack.c.bf16 %v683_v14, %v682_v13  ;;  %v3931_v45 = vld [vmem:[%s5932_s1 + $0xa] sm:$0x3] }
  0xcd   : > { %v1428_v56 = vand.u32 %v3931_v45, %v4321_v5  ;;  %v305_v45 = vld [vmem:[%s4340_s16 + $0x140] sm:$0xff] }
  0xce   : > { %5952 = vst [vmem:[#allocation9_spill] sm:$0xff] %v4612_v34 }
  0xcf   : > { %1437 = vmatpush.bf16.msrb.mxu1 %v1428_v56  ;;  %v685_v56 = vld [vmem:[%s4340_s16 + $0x112] sm:$0xff] }
  0xd1   : > { %v779_v21 = vpop.f32.mrf.mxu2 }
  0xd2   : > { %v855_v23 = vadd.f32 %v779_v21, %v4537_v20  ;;  %v462_v29 = vpop.f32.mrf.mxu0  ;;  %v1002_v50 = vpop.f32.mrf.mxu3  ;;  %v4078_v20 = vld [vmem:[%s5932_s1 + $0x10] sm:$0x3] }
  0xd3   : > { %v602_v48 = vpop.f32.mrf.mxu1  ;;  %v2095_v1 = vand.u32 %v4078_v20, %v4321_v5 }
  0xd4   : > { %v603_v57 = vadd.f32 %v602_v48, %v462_v29  ;;  %v4620_v60 = vadd.f32 %v1002_v50, %v855_v23  ;;  %v353_v23 = vld [vmem:[%s4340_s16 + $0x139] sm:$0xff]  ;;  %v354_v29 = vld [vmem:[%s4340_s16 + $0x141] sm:$0xff]  ;;  %v684_v48 = vld [vmem:[%s4340_s16 + $0x10a] sm:$0xff] }
  0xd5   : > { %3764 = vmatmul.msk.bf16.gmra.mxu0 %vm377_vm2, %v4609_v22  ;;  %v304_v50 = vld [vmem:[%s4340_s16 + $0x138] sm:$0xff] }
  0xd6   : > { %3780 = vmatmul.msk.bf16.gmra.mxu1 %vm377_vm2, %v4612_v34  ;;  %3795 = vmatmul.msk.bf16.gmra.mxu2 %vm377_vm2, %v4614_v35 }
  0xd7   : > { %3844 = vmatmul.msk.bf16.gmra.mxu3 %vm377_vm2, %v4575_v42  ;;  %2104 = vmatpush.bf16.msra.mxu0 %v2095_v1  ;;  %v4643_v42 = vpack.c.bf16 %v354_v29, %v353_v23 }
  0xd9   : > { %v782_v11 = vpop.f32.mrf.mxu2  ;;  %5953 = vst [vmem:[#allocation10_spill] sm:$0xff] %v4643_v42 }
  0xda   : > { %v856_v2 = vadd.f32 %v782_v11, %v4553_v47  ;;  %v464_v6 = vpop.f32.mrf.mxu0  ;;  %v1005_v12 = vpop.f32.mrf.mxu3  ;;  %v4646_v47 = vpack.c.bf16 %v305_v45, %v304_v50  ;;  %v4648_v11 = vpack.c.bf16 %v685_v56, %v684_v48  ;;  %v686_v48 = vld [vmem:[%s4340_s16 + $0x122] sm:$0xff]  ;;  %v687_v56 = vld [vmem:[%s4340_s16 + $0x12a] sm:$0xff] }
  0xdb   : > { %v604_v13 = vpop.f32.mrf.mxu1 }
  0xdc   : > { %v605_v14 = vadd.f32 %v604_v13, %v464_v6  ;;  %v4635_v21 = vadd.f32 %v1005_v12, %v856_v2  ;;  %5954 = vst [vmem:[#allocation11_spill] sm:$0xff] %v4646_v47 }
  0xe1   : > { %v784_v38 = vpop.f32.mrf.mxu2 }
  0xe2   : > { %v857_v5 = vadd.f32 %v784_v38, %v4563_v58  ;;  %v467_v20 = vpop.f32.mrf.mxu0  ;;  %v1007_v1 = vpop.f32.mrf.mxu3 }
  0xe3   : > { %v607_v2 = vpop.f32.mrf.mxu1 }
  0xe4   : > { %v608_v6 = vadd.f32 %v607_v2, %v467_v20  ;;  %v4650_v12 = vadd.f32 %v1007_v1, %v857_v5 }
  0xe5   : > { %3765 = vmatmul.msk.bf16.gmra.mxu0 %vm377_vm2, %v4643_v42  ;;  %v4666_v42 = vpack.c.bf16 %v687_v56, %v686_v48  ;;  %v688_v48 = vld [vmem:[%s4340_s16 + $0x13a] sm:$0xff]  ;;  %v689_v56 = vld [vmem:[%s4340_s16 + $0x142] sm:$0xff] }
  0xe6   : > { %3781 = vmatmul.msk.bf16.gmra.mxu1 %vm377_vm2, %v4646_v47  ;;  %3796 = vmatmul.msk.bf16.gmra.mxu2 %vm377_vm2, %v4648_v11 }
  0xe7   : > { %3845 = vmatmul.msk.bf16.gmra.mxu3 %vm377_vm2, %v4612_v34 }
  0xe9   : > { %v787_v38 = vpop.f32.mrf.mxu2 }
  0xea   : > { %v858_v58 = vadd.f32 %v787_v38, %v4579_v30  ;;  %v469_v13 = vpop.f32.mrf.mxu0  ;;  %v1010_v23 = vpop.f32.mrf.mxu3 }
  0xeb   : > { %v609_v29 = vpop.f32.mrf.mxu1 }
  0xec   : > { %v610_v50 = vadd.f32 %v609_v29, %v469_v13  ;;  %v4661_v45 = vadd.f32 %v1010_v23, %v858_v58 }
  0xf1   : > { %v789_v5 = vpop.f32.mrf.mxu2 }
  0xf2   : > { %v859_v20 = vadd.f32 %v789_v5, %v4591_v51  ;;  %v472_v1 = vpop.f32.mrf.mxu0  ;;  %v1012_v2 = vpop.f32.mrf.mxu3 }
  0xf3   : > { %v612_v34 = vpop.f32.mrf.mxu1 }
  0xf4   : > { %v613_v46 = vadd.f32 %v612_v34, %v472_v1  ;;  %v4668_v30 = vadd.f32 %v1012_v2, %v859_v20  ;;  %v4682_v2 = vpack.c.bf16 %v689_v56, %v688_v48  ;;  %v690_v48 = vld [vmem:[%s4340_s16 + $0x152] sm:$0xff]  ;;  %v691_v56 = vld [vmem:[%s4340_s16 + $0x15a] sm:$0xff] }
  0xf5   : > { %3883 = vmatmul.msk.bf16.vlgmr.msrb.gmra.mxu0 %vm377_vm2, %v4365_v33 }
  0xf6   : > { %5955 = vst [vmem:[#allocation12_spill] sm:$0xff] %v4668_v30  ;;  %3797 = vmatmul.msk.bf16.gmra.mxu2 %vm377_vm2, %v4666_v42  ;;  %3932 = vmatmul.msk.bf16.vlgmr.msrb.gmra.mxu1 %vm377_vm2, %v4401_v54 }
  0xf7   : > { %3846 = vmatmul.msk.bf16.gmra.mxu3 %vm377_vm2, %v4646_v47 }
  0xf9   : > { %v792_v51 = vpop.f32.mrf.mxu2 }
  0xfa   : > { %v860_v38 = vadd.f32 %v792_v51, %v603_v57  ;;  %v474_v58 = vpop.f32.mrf.mxu0  ;;  %v1015_v13 = vpop.f32.mrf.mxu3 }
  0xfb   : > { %v614_v23 = vpop.f32.mrf.mxu1 }
  0xfc   : > { %v615_v34 = vadd.f32 %v614_v23, %v474_v58  ;;  %v4678_v29 = vadd.f32 %v1015_v13, %v860_v38 }
 0x101   : > { %v794_v33 = vpop.f32.mrf.mxu2 }
 0x102   : > { %v861_v5 = vadd.f32 %v794_v33, %v605_v14  ;;  %v477_v20 = vpop.f32.mrf.mxu0  ;;  %v1017_v1 = vpop.f32.mrf.mxu3 }
 0x103   : > { %v617_v54 = vpop.f32.mrf.mxu1 }
 0x104   : > { %v618_v47 = vadd.f32 %v617_v54, %v477_v20  ;;  %v4684_v30 = vadd.f32 %v1017_v1, %v861_v5  ;;  %v4698_v54 = vpack.c.bf16 %v691_v56, %v690_v48  ;;  %v692_v56 = vld [vmem:[%s4340_s16 + $0x16a] sm:$0xff] }
 0x105   : > { %3884 = vmatmul.msk.bf16.gmra.mxu0 %vm377_vm2, %v4381_v43 }
 0x106   : > { %3798 = vmatmul.msk.bf16.gmra.mxu2 %vm377_vm2, %v4682_v2  ;;  %3933 = vmatmul.msk.bf16.gmra.mxu1 %vm377_vm2, %v4421_v63  ;;  %5957 = vst [vmem:[#allocation14_spill] sm:$0xff] %v4698_v54 }
 0x107   : > { %3847 = vmatmul.msk.bf16.gmra.mxu3 %vm377_vm2, %v4351_v24 }
 0x109   : > { %v797_v57 = vpop.f32.mrf.mxu2 }
 0x10a   : > { %v862_v14 = vadd.f32 %v797_v57, %v608_v6  ;;  %v479_v51 = vpop.f32.mrf.mxu0  ;;  %v1020_v38 = vpop.f32.mrf.mxu3 }
 0x10b   : > { %v619_v58 = vpop.f32.mrf.mxu1 }
 0x10c   : > { %v620_v13 = vadd.f32 %v619_v58, %v479_v51  ;;  %v4694_v23 = vadd.f32 %v1020_v38, %v862_v14 }
 0x10e   : > { %5956 = vst [vmem:[#allocation13_spill] sm:$0xff] %v4694_v23 }
 0x111   : > { %v799_v33 = vpop.f32.mrf.mxu2 }
 0x112   : > { %v863_v5 = vadd.f32 %v799_v33, %v610_v50  ;;  %v482_v20 = vpop.f32.mrf.mxu0  ;;  %v1022_v1 = vpop.f32.mrf.mxu3  ;;  %v693_v33 = vld [vmem:[%s4340_s16 + $0x172] sm:$0xff] }
 0x113   : > { %v622_v63 = vpop.f32.mrf.mxu1 }
 0x114   : > { %v623_v24 = vadd.f32 %v622_v63, %v482_v20  ;;  %v4700_v6 = vadd.f32 %v1022_v1, %v863_v5  ;;  %v3831_v5 = vld [vmem:[%s4340_s16 + $0x180] sm:$0xff]  ;;  %v3832_v20 = vld [vmem:[%s4340_s16 + $0x188] sm:$0xff] }
 0x115   : > { %3885 = vmatmul.msk.bf16.gmra.mxu0 %vm377_vm2, %v4397_v52 }
 0x116   : > { %5958 = vst [vmem:[#allocation15_spill] sm:$0xff] %v4700_v6  ;;  %3799 = vmatmul.msk.bf16.gmra.mxu2 %vm377_vm2, %v4698_v54  ;;  %3934 = vmatmul.msk.bf16.gmra.mxu1 %vm377_vm2, %v4441_v9  ;;  %v4716_v9 = vpack.c.bf16 %v693_v33, %v692_v56 }
 0x117   : > { %3848 = vmatmul.msk.bf16.gmra.mxu3 %vm377_vm2, %v4367_v36  ;;  %v4718_v36 = vpack.c.bf16 %v3832_v20, %v3831_v5 }
 0x119   : > { %v802_v50 = vpop.f32.mrf.mxu2 }
 0x11a   : > { %v864_v57 = vadd.f32 %v802_v50, %v613_v46  ;;  %v484_v14 = vpop.f32.mrf.mxu0  ;;  %v1025_v51 = vpop.f32.mrf.mxu3 }
 0x11b   : > { %v624_v38 = vpop.f32.mrf.mxu1 }
 0x11c   : > { %v625_v58 = vadd.f32 %v624_v38, %v484_v14  ;;  %v4710_v48 = vadd.f32 %v1025_v51, %v864_v57 }
 0x121   : > { %v804_v1 = vpop.f32.mrf.mxu2 }
 0x122   : > { %v865_v63 = vadd.f32 %v804_v1, %v615_v34  ;;  %v487_v6 = vpop.f32.mrf.mxu0  ;;  %v1027_v54 = vpop.f32.mrf.mxu3 }
 0x123   : > { %v627_v23 = vpop.f32.mrf.mxu1 }
 0x124   : > { %v628_v46 = vadd.f32 %v627_v23, %v487_v6  ;;  %v4720_v50 = vadd.f32 %v1027_v54, %v865_v63 }
 0x125   : > { %3886 = vmatmul.msk.bf16.gmra.mxu0 %vm377_vm2, %v4417_v61 }
 0x126   : > { %3800 = vmatmul.msk.bf16.gmra.mxu2 %vm377_vm2, %v4716_v9  ;;  %3935 = vmatmul.msk.bf16.gmra.mxu1 %vm377_vm2, %v4461_v18 }
 0x127   : > { %3849 = vmatmul.msk.bf16.gmra.mxu3 %vm377_vm2, %v4718_v36 }
 0x129   : > { %v807_v34 = vpop.f32.mrf.mxu2 }
 0x12a   : > { %v866_v57 = vadd.f32 %v807_v34, %v618_v47  ;;  %v489_v14 = vpop.f32.mrf.mxu0  ;;  %v1030_v51 = vpop.f32.mrf.mxu3 }
 0x12b   : > { %v629_v38 = vpop.f32.mrf.mxu1 }
 0x12c   : > { %v630_v23 = vadd.f32 %v629_v38, %v489_v14  ;;  %v4730_v54 = vadd.f32 %v1030_v51, %v866_v57 }
 0x131   : > { %v809_v6 = vpop.f32.mrf.mxu2 }
 0x132   : > { %v867_v56 = vadd.f32 %v809_v6, %v620_v13  ;;  %v492_v33 = vpop.f32.mrf.mxu0  ;;  %v1032_v5 = vpop.f32.mrf.mxu3 }
 0x133   : > { %v632_v20 = vpop.f32.mrf.mxu1 }
 0x134   : > { %v633_v1 = vadd.f32 %v632_v20, %v492_v33  ;;  %v4732_v63 = vadd.f32 %v1032_v5, %v867_v56 }
 0x135   : > { %3887 = vmatmul.msk.bf16.gmra.mxu0 %vm377_vm2, %v4437_v7 }
 0x136   : > { %3981 = vmatmul.msk.bf16.vlgmr.msra.gmra.mxu2 %vm377_vm2, %v4383_v44  ;;  %3936 = vmatmul.msk.bf16.gmra.mxu1 %vm377_vm2, %v4481_v28 }
 0x137   : > { %4030 = vmatmul.msk.bf16.vlgmr.msra.gmra.mxu3 %vm377_vm2, %v4381_v43 }
 0x139   : > { %v812_v18 = vpop.f32.mrf.mxu2 }
 0x13a   : > { %v868_v47 = vadd.f32 %v812_v18, %v623_v24  ;;  %v494_v13 = vpop.f32.mrf.mxu0  ;;  %v1035_v34 = vpop.f32.mrf.mxu3 }
 0x13b   : > { %v634_v57 = vpop.f32.mrf.mxu1 }
 0x13c   : > { %v635_v14 = vadd.f32 %v634_v57, %v494_v13  ;;  %v4742_v51 = vadd.f32 %v1035_v34, %v868_v47 }
 0x141   : > { %v814_v38 = vpop.f32.mrf.mxu2 }
 0x142   : > { %v869_v6 = vadd.f32 %v814_v38, %v625_v58  ;;  %v497_v56 = vpop.f32.mrf.mxu0  ;;  %v1037_v33 = vpop.f32.mrf.mxu3 }
 0x143   : > { %v637_v5 = vpop.f32.mrf.mxu1 }
 0x144   : > { %v638_v44 = vadd.f32 %v637_v5, %v497_v56  ;;  %v4744_v20 = vadd.f32 %v1037_v33, %v869_v6 }
 0x145   : > { %3888 = vmatmul.msk.bf16.gmra.mxu0 %vm377_vm2, %v4457_v16 }
 0x146   : > { %3982 = vmatmul.msk.bf16.gmra.mxu2 %vm377_vm2, %v4399_v53  ;;  %3937 = vmatmul.msk.bf16.gmra.mxu1 %vm377_vm2, %v4501_v40 }
 0x147   : > { %4031 = vmatmul.msk.bf16.gmra.mxu3 %vm377_vm2, %v4397_v52 }
 0x149   : > { %v817_v43 = vpop.f32.mrf.mxu2 }
 0x14a   : > { %v870_v28 = vadd.f32 %v817_v43, %v628_v46  ;;  %v499_v24 = vpop.f32.mrf.mxu0  ;;  %v1040_v58 = vpop.f32.mrf.mxu3 }
 0x14b   : > { %v639_v18 = vpop.f32.mrf.mxu1 }
 0x14c   : > { %v640_v47 = vadd.f32 %v639_v18, %v499_v24  ;;  %v4754_v13 = vadd.f32 %v1040_v58, %v870_v28 }
 0x151   : > { %v819_v34 = vpop.f32.mrf.mxu2 }
 0x152   : > { %v871_v57 = vadd.f32 %v819_v34, %v630_v23  ;;  %v502_v38 = vpop.f32.mrf.mxu0  ;;  %v1042_v6 = vpop.f32.mrf.mxu3 }
 0x153   : > { %v642_v56 = vpop.f32.mrf.mxu1 }
 0x154   : > { %v643_v53 = vadd.f32 %v642_v56, %v502_v38  ;;  %v4756_v33 = vadd.f32 %v1042_v6, %v871_v57 }
 0x155   : > { %3889 = vmatmul.msk.bf16.gmra.mxu0 %vm377_vm2, %v4477_v26 }
 0x156   : > { %3983 = vmatmul.msk.bf16.gmra.mxu2 %vm377_vm2, %v4419_v62  ;;  %3938 = vmatmul.msk.bf16.gmra.mxu1 %vm377_vm2, %v4523_v4 }
 0x157   : > { %4032 = vmatmul.msk.bf16.gmra.mxu3 %vm377_vm2, %v4417_v61 }
 0x159   : > { %v822_v52 = vpop.f32.mrf.mxu2 }
 0x15a   : > { %v872_v40 = vadd.f32 %v822_v52, %v633_v1  ;;  %v504_v46 = vpop.f32.mrf.mxu0  ;;  %v1045_v23 = vpop.f32.mrf.mxu3 }
 0x15b   : > { %v644_v5 = vpop.f32.mrf.mxu1 }
 0x15c   : > { %v645_v43 = vadd.f32 %v644_v5, %v504_v46  ;;  %v4766_v28 = vadd.f32 %v1045_v23, %v872_v40 }
 0x161   : > { %v824_v24 = vpop.f32.mrf.mxu2 }
 0x162   : > { %v873_v58 = vadd.f32 %v824_v24, %v635_v14  ;;  %v507_v18 = vpop.f32.mrf.mxu0  ;;  %v1047_v34 = vpop.f32.mrf.mxu3 }
 0x163   : > { %v647_v57 = vpop.f32.mrf.mxu1 }
 0x164   : > { %v648_v62 = vadd.f32 %v647_v57, %v507_v18  ;;  %v4768_v38 = vadd.f32 %v1047_v34, %v873_v58 }
 0x165   : > { %3890 = vmatmul.msk.bf16.gmra.mxu0 %vm377_vm2, %v4497_v37 }
 0x166   : > { %3984 = vmatmul.msk.bf16.gmra.mxu2 %vm377_vm2, %v4439_v8  ;;  %3939 = vmatmul.msk.bf16.gmra.mxu1 %vm377_vm2, %v4549_v41 }
 0x167   : > { %4033 = vmatmul.msk.bf16.gmra.mxu3 %vm377_vm2, %v4437_v7 }
 0x169   : > { %v827_v61 = vpop.f32.mrf.mxu2 }
 0x16a   : > { %v874_v4 = vadd.f32 %v827_v61, %v638_v44  ;;  %v509_v1 = vpop.f32.mrf.mxu0  ;;  %v1050_v14 = vpop.f32.mrf.mxu3 }
 0x16b   : > { %v649_v6 = vpop.f32.mrf.mxu1 }
 0x16c   : > { %v650_v56 = vadd.f32 %v649_v6, %v509_v1  ;;  %v4778_v52 = vadd.f32 %v1050_v14, %v874_v4 }
 0x171   : > { %v829_v40 = vpop.f32.mrf.mxu2 }
 0x172   : > { %v875_v46 = vadd.f32 %v829_v40, %v640_v47  ;;  %v1052_v23 = vpop.f32.mrf.mxu3  ;;  %v1217_v5 = vpop.f32.mrf.mxu0 }
 0x173   : > { %v1297_v8 = vadd.f32 %v1217_v5, %v4565_v59  ;;  %v1439_v24 = vpop.f32.mrf.mxu1 }
 0x174   : > { %v4781_v58 = vadd.f32 %v1052_v23, %v875_v46 }
 0x175   : > { %v4783_v41 = vadd.f32 %v1439_v24, %v1297_v8  ;;  %3891 = vmatmul.msk.bf16.gmra.mxu0 %vm377_vm2, %v4519_v0 }
 0x176   : > { %3985 = vmatmul.msk.bf16.gmra.mxu2 %vm377_vm2, %v4459_v17  ;;  %3940 = vmatmul.msk.bf16.gmra.mxu1 %vm377_vm2, %v4577_v25 }
 0x177   : > { %4034 = vmatmul.msk.bf16.gmra.mxu3 %vm377_vm2, %v4457_v16 }
 0x179   : > { %v832_v7 = vpop.f32.mrf.mxu2 }
 0x17a   : > { %v876_v44 = vadd.f32 %v832_v7, %v643_v53  ;;  %v1055_v59 = vpop.f32.mrf.mxu3  ;;  %v1219_v47 = vpop.f32.mrf.mxu0 }
 0x17b   : > { %v1298_v18 = vadd.f32 %v1219_v47, %v4581_v31  ;;  %v1441_v34 = vpop.f32.mrf.mxu1 }
 0x17c   : > { %v4794_v57 = vadd.f32 %v1055_v59, %v876_v44 }
 0x17d   : > { %v4796_v61 = vadd.f32 %v1441_v34, %v1298_v18 }
 0x181   : > { %v834_v4 = vpop.f32.mrf.mxu2 }
 0x182   : > { %v877_v1 = vadd.f32 %v834_v4, %v645_v43  ;;  %v1057_v17 = vpop.f32.mrf.mxu3  ;;  %v1222_v14 = vpop.f32.mrf.mxu0 }
 0x183   : > { %v1299_v25 = vadd.f32 %v1222_v14, %v4593_v55  ;;  %v1444_v6 = vpop.f32.mrf.mxu1 }
 0x184   : > { %v4799_v40 = vadd.f32 %v1057_v17, %v877_v1 }
 0x185   : > { %v4801_v16 = vadd.f32 %v1444_v6, %v1299_v25  ;;  %3892 = vmatmul.msk.bf16.gmra.mxu0 %vm377_vm2, %v4545_v32  ;;  %v5959_v6 = vld [vmem:[#allocation12_spill] sm:$0xff] }
 0x186   : > { %3986 = vmatmul.msk.bf16.gmra.mxu2 %vm377_vm2, %v4479_v27  ;;  %3941 = vmatmul.msk.bf16.gmra.mxu1 %vm377_vm2, %v4614_v35 }
 0x187   : > { %4035 = vmatmul.msk.bf16.gmra.mxu3 %vm377_vm2, %v4477_v26 }
 0x189   : > { %v837_v31 = vpop.f32.mrf.mxu2 }
 0x18a   : > { %v878_v53 = vadd.f32 %v837_v31, %v648_v62  ;;  %v1060_v55 = vpop.f32.mrf.mxu3  ;;  %v1224_v43 = vpop.f32.mrf.mxu0 }
 0x18b   : > { %v1300_v46 = vadd.f32 %v1224_v43, %v4620_v60  ;;  %v1446_v23 = vpop.f32.mrf.mxu1  ;;  %v4013_v43 = vld [vmem:[%s4340_s16 + $0xf1] sm:$0xff] }
 0x18c   : > { %v4812_v5 = vadd.f32 %v1060_v55, %v878_v53 }
 0x18d   : > { %v4814_v8 = vadd.f32 %v1446_v23, %v1300_v46  ;;  %v5960_v23 = vld [vmem:[#allocation7_spill] sm:$0xff] }
 0x191   : > { %v839_v32 = vpop.f32.mrf.mxu2 }
 0x192   : > { %v879_v24 = vadd.f32 %v839_v32, %v650_v56  ;;  %v1062_v27 = vpop.f32.mrf.mxu3  ;;  %v1227_v7 = vpop.f32.mrf.mxu0 }
 0x193   : > { %v1301_v35 = vadd.f32 %v1227_v7, %v4635_v21  ;;  %v1449_v44 = vpop.f32.mrf.mxu1  ;;  %v5961_v7 = vld [vmem:[#allocation10_spill] sm:$0xff] }
 0x194   : > { %v4817_v59 = vadd.f32 %v1062_v27, %v879_v24 }
 0x195   : > { %v4819_v26 = vadd.f32 %v1449_v44, %v1301_v35  ;;  %3893 = vmatmul.msk.bf16.gmra.mxu0 %vm377_vm2, %v4573_v15  ;;  %v5962_v35 = vld [vmem:[#allocation6_spill] sm:$0xff] }
 0x196   : > { %3987 = vmatmul.msk.bf16.gmra.mxu2 %vm377_vm2, %v4499_v39  ;;  %3942 = vmatmul.msk.bf16.gmra.mxu1 %vm377_vm2, %v4648_v11 }
 0x197   : > { %4036 = vmatmul.msk.bf16.gmra.mxu3 %vm377_vm2, %v4497_v37 }
 0x199   : > { %v842_v60 = vpop.f32.mrf.mxu2 }
 0x19a   : > { %v880_v21 = vadd.f32 %v842_v60, %v4511_v49  ;;  %v1065_v62 = vpop.f32.mrf.mxu3  ;;  %v1229_v56 = vpop.f32.mrf.mxu0 }
 0x19b   : > { %v1302_v47 = vadd.f32 %v1229_v56, %v4650_v12  ;;  %v1451_v18 = vpop.f32.mrf.mxu1 }
 0x19c   : > { %v4831_v34 = vadd.f32 %v1065_v62, %v880_v21 }
 0x19d   : > { %v4833_v15 = vadd.f32 %v1451_v18, %v1302_v47  ;;  %v3876_v47 = vld [vmem:[%s4340_s16 + $0x151] sm:$0xff]  ;;  %v3877_v18 = vld [vmem:[%s4340_s16 + $0x159] sm:$0xff] }
 0x1a1   : > { %v844_v4 = vpop.f32.mrf.mxu2 }
 0x1a2   : > { %v881_v39 = vadd.f32 %v844_v4, %v4525_v10  ;;  %v1067_v1 = vpop.f32.mrf.mxu3  ;;  %v1232_v11 = vpop.f32.mrf.mxu0  ;;  %v4015_v4 = vld [vmem:[%s4340_s16 + $0x109] sm:$0xff] }
 0x1a3   : > { %v1303_v17 = vadd.f32 %v1232_v11, %v4661_v45  ;;  %v1454_v37 = vpop.f32.mrf.mxu1  ;;  %v4880_v11 = vpack.c.bf16 %v3877_v18, %v3876_v47  ;;  %v5967_v47 = vld [vmem:[#allocation9_spill] sm:$0xff] }
 0x1a4   : > { %v4837_v49 = vadd.f32 %v1067_v1, %v881_v39  ;;  %v4016_v39 = vld [vmem:[%s4340_s16 + $0x111] sm:$0xff] }
 0x1a5   : > { %v4839_v14 = vadd.f32 %v1454_v37, %v1303_v17  ;;  %3894 = vmatmul.msk.bf16.gmra.mxu0 %vm377_vm2, %v4609_v22  ;;  %v5963_v37 = vld [vmem:[#allocation13_spill] sm:$0xff] }
 0x1a6   : > { %3988 = vmatmul.msk.bf16.gmra.mxu2 %vm377_vm2, %v4521_v3  ;;  %3943 = vmatmul.msk.bf16.gmra.mxu1 %vm377_vm2, %v4666_v42  ;;  %v4014_v3 = vld [vmem:[%s4340_s16 + $0xf9] sm:$0xff] }
 0x1a7   : > { %4037 = vmatmul.msk.bf16.gmra.mxu3 %vm377_vm2, %v4519_v0  ;;  %v1814_v24 = vpack.c.bf16 %v4014_v3, %v4013_v43  ;;  %v5966_v43 = vld [vmem:[#allocation15_spill] sm:$0xff] }
 0x1a9   : > { %v847_v10 = vpop.f32.mrf.mxu2 }
 0x1aa   : > { %v882_v12 = vadd.f32 %v847_v10, %v4535_v19  ;;  %v1070_v45 = vpop.f32.mrf.mxu3  ;;  %v1234_v25 = vpop.f32.mrf.mxu0 }
 0x1ab   : > { %v1304_v31 = vadd.f32 %v1234_v25, %v5959_v6  ;;  %v1456_v53 = vpop.f32.mrf.mxu1  ;;  %v5965_v25 = vld [vmem:[#allocation14_spill] sm:$0xff] }
 0x1ac   : > { %v4851_v55 = vadd.f32 %v1070_v45, %v882_v12  ;;  %v5964_v45 = vld [vmem:[#allocation8_spill] sm:$0xff] }
 0x1ad   : > { %v4853_v22 = vadd.f32 %v1456_v53, %v1304_v31 }
 0x1b1   : > { %v849_v46 = vpop.f32.mrf.mxu2 }
 0x1b2   : > { %v883_v42 = vadd.f32 %v849_v46, %v5960_v23  ;;  %v1072_v32 = vpop.f32.mrf.mxu3  ;;  %v1237_v0 = vpop.f32.mrf.mxu0  ;;  %v3878_v23 = vld [vmem:[%s4340_s16 + $0x169] sm:$0xff] }
 0x1b3   : > { %v4859_v19 = vadd.f32 %v1237_v0, %v4678_v29  ;;  %v4018_v0 = vld [vmem:[%s4340_s16 + $0x129] sm:$0xff] }
 0x1b4   : > { %v4861_v27 = vadd.f32 %v1072_v32, %v883_v42  ;;  %v3879_v42 = vld [vmem:[%s4340_s16 + $0x171] sm:$0xff]  ;;  %v4017_v32 = vld [vmem:[%s4340_s16 + $0x121] sm:$0xff] }
 0x1b5   : > { %3895 = vmatmul.msk.bf16.gmra.mxu0 %vm377_vm2, %v5961_v7  ;;  %v4905_v7 = vpack.c.bf16 %v3879_v42, %v3878_v23  ;;  %v5968_v23 = vld [vmem:[#allocation11_spill] sm:$0xff] }
 0x1b6   : > { %3989 = vmatmul.msk.bf16.gmra.mxu2 %vm377_vm2, %v5962_v35  ;;  %3944 = vmatmul.msk.bf16.gmra.mxu1 %vm377_vm2, %v4682_v2 }
 0x1b7   : > { %4038 = vmatmul.msk.bf16.gmra.mxu3 %vm377_vm2, %v1814_v24 }
 0x1b9   : > { %v1662_v44 = vpop.f32.mrf.mxu2 }
 0x1ba   : > { %v1742_v60 = vadd.f32 %v1662_v44, %v4783_v41  ;;  %v1239_v29 = vpop.f32.mrf.mxu0  ;;  %v1884_v21 = vpop.f32.mrf.mxu3 }
 0x1bb   : > { %v4872_v62 = vadd.f32 %v1239_v29, %v4684_v30  ;;  %v1815_v30 = vpack.c.bf16 %v4016_v39, %v4015_v4  ;;  %v1816_v29 = vpack.c.bf16 %v4018_v0, %v4017_v32 }
 0x1bc   : > { %v4874_v56 = vadd.f32 %v1884_v21, %v1742_v60 }
 0x1c1   : > { %v1664_v1 = vpop.f32.mrf.mxu2 }
 0x1c2   : > { %v1743_v2 = vadd.f32 %v1664_v1, %v4796_v61  ;;  %v1242_v17 = vpop.f32.mrf.mxu0  ;;  %v1886_v41 = vpop.f32.mrf.mxu3 }
 0x1c3   : > { %v4884_v10 = vadd.f32 %v1242_v17, %v5963_v37  ;;  %v3881_v17 = vld [vmem:[%s4340_s16 + $0x189] sm:$0xff] }
 0x1c4   : > { %v4886_v12 = vadd.f32 %v1886_v41, %v1743_v2  ;;  %v3880_v2 = vld [vmem:[%s4340_s16 + $0x181] sm:$0xff]  ;;  %v3930_v37 = vld [vmem:[%s4340_s16 + $0x18a] sm:$0xff] }
 0x1c5   : > { %3896 = vmatmul.msk.bf16.gmra.mxu0 %vm377_vm2, %v4880_v11  ;;  %v3929_v41 = vld [vmem:[%s4340_s16 + $0x182] sm:$0xff] }
 0x1c6   : > { %3990 = vmatmul.msk.bf16.gmra.mxu2 %vm377_vm2, %v5964_v45  ;;  %3945 = vmatmul.msk.bf16.gmra.mxu1 %vm377_vm2, %v5965_v25  ;;  %v4020_v45 = vld [vmem:[%s4340_s16 + $0x141] sm:$0xff] }
 0x1c7   : > { %4039 = vmatmul.msk.bf16.gmra.mxu3 %vm377_vm2, %v1815_v30  ;;  %v4019_v30 = vld [vmem:[%s4340_s16 + $0x139] sm:$0xff] }
 0x1c9   : > { %v1667_v61 = vpop.f32.mrf.mxu2 }
 0x1ca   : > { %v1744_v6 = vadd.f32 %v1667_v61, %v4801_v16  ;;  %v1244_v31 = vpop.f32.mrf.mxu0  ;;  %v1889_v53 = vpop.f32.mrf.mxu3 }
 0x1cb   : > { %v4897_v3 = vadd.f32 %v1244_v31, %v5966_v43  ;;  %v4933_v31 = vpack.c.bf16 %v3930_v37, %v3929_v41  ;;  %v4048_v41 = vld [vmem:[%s4340_s16 + $0x4a] sm:$0xff]  ;;  %v4049_v37 = vld [vmem:[%s4340_s16 + $0x52] sm:$0xff] }
 0x1cc   : > { %v4899_v46 = vadd.f32 %v1889_v53, %v1744_v6  ;;  %v1817_v53 = vpack.c.bf16 %v4020_v45, %v4019_v30  ;;  %v3974_v30 = vld [vmem:[%s4340_s16 + $0x168] sm:$0xff]  ;;  %v2029_v45 = vpack.c.bf16 %v4049_v37, %v4048_v41  ;;  %v4054_v37 = vld [vmem:[%s4340_s16 + $0x92] sm:$0xff] }
 0x1d1   : > { %v1669_v24 = vpop.f32.mrf.mxu2 }
 0x1d2   : > { %v1745_v35 = vadd.f32 %v1669_v24, %v4814_v8  ;;  %v1247_v44 = vpop.f32.mrf.mxu0  ;;  %v1891_v16 = vpop.f32.mrf.mxu3 }
 0x1d3   : > { %v4909_v60 = vadd.f32 %v1247_v44, %v4710_v48  ;;  %v4047_v44 = vld [vmem:[%s4340_s16 + $0x3a] sm:$0xff] }
 0x1d4   : > { %v4911_v21 = vadd.f32 %v1891_v16, %v1745_v35  ;;  %v4046_v35 = vld [vmem:[%s4340_s16 + $0x32] sm:$0xff] }
 0x1d5   : > { %3897 = vmatmul.msk.bf16.gmra.mxu0 %vm377_vm2, %v4905_v7  ;;  %v3972_v16 = vld [vmem:[%s4340_s16 + $0x150] sm:$0xff] }
 0x1d6   : > { %3991 = vmatmul.msk.bf16.gmra.mxu2 %vm377_vm2, %v5967_v47  ;;  %3946 = vmatmul.msk.bf16.gmra.mxu1 %vm377_vm2, %v4716_v9  ;;  %v1154_v9 = vpack.c.bf16 %v3881_v17, %v3880_v2 }
 0x1d7   : > { %4040 = vmatmul.msk.bf16.gmra.mxu3 %vm377_vm2, %v1816_v29  ;;  %v3973_v29 = vld [vmem:[%s4340_s16 + $0x158] sm:$0xff] }
 0x1d9   : > { %v1672_v8 = vpop.f32.mrf.mxu2 }
 0x1da   : > { %v1746_v48 = vadd.f32 %v1672_v8, %v4819_v26  ;;  %v1249_v18 = vpop.f32.mrf.mxu0  ;;  %v1894_v4 = vpop.f32.mrf.mxu3  ;;  %v2028_v8 = vpack.c.bf16 %v4047_v44, %v4046_v35  ;;  %v4052_v44 = vld [vmem:[%s4340_s16 + $0x7a] sm:$0xff] }
 0x1db   : > { %v4922_v39 = vadd.f32 %v1249_v18, %v4720_v50 }
 0x1dc   : > { %v4924_v1 = vadd.f32 %v1894_v4, %v1746_v48  ;;  %v1596_v4 = vpack.c.bf16 %v3973_v29, %v3972_v16  ;;  %v3978_v16 = vld [vmem:[%s4340_s16 + $0x198] sm:$0xff]  ;;  %v3979_v29 = vld [vmem:[%s4340_s16 + $0x1a0] sm:$0xff] }
 0x1e1   : > { %v1674_v25 = vpop.f32.mrf.mxu2 }
 0x1e2   : > { %v1747_v61 = vadd.f32 %v1674_v25, %v4833_v15  ;;  %v1252_v6 = vpop.f32.mrf.mxu0  ;;  %v1896_v26 = vpop.f32.mrf.mxu3 }
 0x1e3   : > { %v4936_v50 = vadd.f32 %v1252_v6, %v4730_v54 }
 0x1e4   : > { %v4938_v43 = vadd.f32 %v1896_v26, %v1747_v61  ;;  %v4050_v26 = vld [vmem:[%s4340_s16 + $0x62] sm:$0xff] }
 0x1e5   : > { %3898 = vmatmul.msk.bf16.gmra.mxu0 %vm377_vm2, %v1154_v9 }
 0x1e6   : > { %3992 = vmatmul.msk.bf16.gmra.mxu2 %vm377_vm2, %v5968_v23  ;;  %3947 = vmatmul.msk.bf16.gmra.mxu1 %vm377_vm2, %v4933_v31 }
 0x1e7   : > { %4041 = vmatmul.msk.bf16.gmra.mxu3 %vm377_vm2, %v1817_v53  ;;  %v4051_v53 = vld [vmem:[%s4340_s16 + $0x6a] sm:$0xff] }
 0x1e8   : > { %v2030_v23 = vpack.c.bf16 %v4051_v53, %v4050_v26  ;;  %v4056_v53 = vld [vmem:[%s4340_s16 + $0xaa] sm:$0xff] }
 0x1e9   : > { %v1677_v15 = vpop.f32.mrf.mxu2 }
 0x1ea   : > { %v1748_v42 = vadd.f32 %v1677_v15, %v4839_v14  ;;  %v1254_v32 = vpop.f32.mrf.mxu0  ;;  %v1899_v54 = vpop.f32.mrf.mxu3 }
 0x1eb   : > { %v4948_v0 = vadd.f32 %v1254_v32, %v4732_v63 }
 0x1ec   : > { %v4950_v24 = vadd.f32 %v1899_v54, %v1748_v42 }
 0x1f1   : > { %v1679_v47 = vpop.f32.mrf.mxu2 }
 0x1f2   : > { %v1749_v48 = vadd.f32 %v1679_v47, %v4853_v22  ;;  %v1257_v14 = vpop.f32.mrf.mxu0  ;;  %v1901_v18 = vpop.f32.mrf.mxu3  ;;  %v4027_v47 = vld [vmem:[%s4340_s16 + $0x199] sm:$0xff] }
 0x1f3   : > { %v4958_v63 = vadd.f32 %v1257_v14, %v4742_v51  ;;  %v3975_v51 = vld [vmem:[%s4340_s16 + $0x170] sm:$0xff]  ;;  %v1599_v14 = vpack.c.bf16 %v3979_v29, %v3978_v16 }
 0x1f4   : > { %v4960_v2 = vadd.f32 %v1901_v18, %v1749_v48  ;;  %v1597_v61 = vpack.c.bf16 %v3975_v51, %v3974_v30  ;;  %v4055_v30 = vld [vmem:[%s4340_s16 + $0x9a] sm:$0xff] }
 0x1f5   : > { %4079 = vmatmul.msk.bf16.vlgmr.msra.gmra.mxu0 %vm377_vm2, %v2028_v8  ;;  %v4028_v8 = vld [vmem:[%s4340_s16 + $0x1a1] sm:$0xff]  ;;  %v2032_v51 = vpack.c.bf16 %v4055_v30, %v4054_v37 }
 0x1f6   : > { %3993 = vmatmul.msk.bf16.gmra.mxu2 %vm377_vm2, %v1596_v4  ;;  %v1821_v4 = vpack.c.bf16 %v4028_v8, %v4027_v47 }
 0x1f7   : > { %4042 = vmatmul.msk.bf16.gmra.mxu3 %vm377_vm2, %v4880_v11 }
 0x1f9   : > { %v5033_v26 = vpop.f32.mrf.mxu2 }
 0x1fa   : > { %v1259_v17 = vpop.f32.mrf.mxu0 }
 0x1fb   : > { %v4967_v22 = vadd.f32 %v1259_v17, %v4744_v20 }
 0x202   : > { %v1262_v25 = vpop.f32.mrf.mxu0 }
 0x203   : > { %v4974_v6 = vadd.f32 %v1262_v25, %v4754_v13  ;;  %v2400_v13 = vld [vmem:[%s5934_s3] sm:$0xf] }
 0x205   : > { %4080 = vmatmul.msk.bf16.gmra.mxu0 %vm377_vm2, %v2029_v45 }
 0x206   : > { %3994 = vmatmul.msk.bf16.gmra.mxu2 %vm377_vm2, %v1597_v61  ;;  %v5028_v61 = vpop.f32.mrf.mxu1 }
 0x207   : > { %4043 = vmatmul.msk.bf16.gmra.mxu3 %vm377_vm2, %v4905_v7  ;;  %v4104_v7 = vld [vmem:[%s5934_s3 + $0x8] sm:$0xf] }
 0x208   : > { %v2531_v54 = vsel %vm2427_vm3, %v4104_v7, 0 }
 0x209   : > { %2540 = vmatpush.bf16.msrb.mxu3 %v2531_v54 }
 0x20a   : > { %v1264_v11 = vpop.f32.mrf.mxu0 }
 0x20b   : > { %v4981_v20 = vadd.f32 %v1264_v11, %v4756_v33  ;;  %v2473_v33 = vsel %vm2427_vm3, %v2400_v13, 0 }
 0x20c   : > { %2482 = vmatpush.bf16.msrb.mxu2 %v2473_v33 }
 0x20d   : > { %5969 = vst [vmem:[#allocation12_spill] sm:$0xff] %v4981_v20 }
 0x20e   : > { %v5042_v33 = vpop.f32.mrf.mxu1 }
 0x212   : > { %v1267_v15 = vpop.f32.mrf.mxu0 }
 0x213   : > { %v4986_v42 = vadd.f32 %v1267_v15, %v4766_v28 }
 0x215   : > { %5970 = vst [vmem:[#allocation7_spill] sm:$0xff] %v4986_v42  ;;  %4081 = vmatmul.msk.bf16.gmra.mxu0 %vm377_vm2, %v2030_v23  ;;  %v4057_v23 = vld [vmem:[%s4340_s16 + $0xb2] sm:$0xff] }
 0x216   : > { %3995 = vmatmul.msk.bf16.gmra.mxu2 %vm377_vm2, %v4718_v36  ;;  %v4095_v36 = vld [vmem:[%s5934_s3 + $0x4] sm:$0xf]  ;;  %v2033_v15 = vpack.c.bf16 %v4057_v23, %v4056_v53 }
 0x217   : > { %4044 = vmatmul.msk.bf16.gmra.mxu3 %vm377_vm2, %v1154_v9  ;;  %v2429_v35 = vsel %vm2427_vm3, %v4095_v36, 0  ;;  %v4053_v9 = vld [vmem:[%s4340_s16 + $0x82] sm:$0xff] }
 0x218   : > { %2438 = vmatpush.bf16.msra.mxu1 %v2429_v35  ;;  %v4058_v36 = vld [vmem:[%s4340_s16 + $0xc2] sm:$0xff]  ;;  %v4059_v35 = vld [vmem:[%s4340_s16 + $0xca] sm:$0xff] }
 0x21a   : > { %v1269_v28 = vpop.f32.mrf.mxu0 }
 0x21b   : > { %v5000_v32 = vadd.f32 %v1269_v28, %v4768_v38  ;;  %v2031_v38 = vpack.c.bf16 %v4053_v9, %v4052_v44  ;;  %v5045_v28 = vpop.f32.mrf.mxu2  ;;  %v5054_v44 = vpop.f32.mrf.mxu1  ;;  %v2034_v9 = vpack.c.bf16 %v4059_v35, %v4058_v36 }
 0x21d   : > { %5971 = vst [vmem:[#allocation10_spill] sm:$0xff] %v5000_v32 }
 0x222   : > { %v1272_v48 = vpop.f32.mrf.mxu0 }
 0x223   : > { %v5014_v18 = vadd.f32 %v1272_v48, %v4778_v52  ;;  %v5064_v8 = vpop.f32.mrf.mxu1 }
 0x225   : > { %5972 = vst [vmem:[#allocation6_spill] sm:$0xff] %v5014_v18  ;;  %4082 = vmatmul.msk.bf16.gmra.mxu0 %vm377_vm2, %v2031_v38 }
 0x226   : > { %3996 = vmatmul.msk.bf16.gmra.mxu2 %vm377_vm2, %v1599_v14 }
 0x227   : > { %4045 = vmatmul.msk.bf16.gmra.mxu3 %vm377_vm2, %v1821_v4  ;;  %v4060_v4 = vld [vmem:[%s4340_s16 + $0xda] sm:$0xff] }
 0x22a   : > { %v1274_v17 = vpop.f32.mrf.mxu0 }
 0x22b   : > { %v5020_v41 = vadd.f32 %v1274_v17, %v4781_v58  ;;  %v5035_v58 = vpop.f32.mrf.mxu3  ;;  %v4061_v17 = vld [vmem:[%s4340_s16 + $0xe2] sm:$0xff] }
 0x22c   : > { %v2035_v37 = vpack.c.bf16 %v4061_v17, %v4060_v4  ;;  %v5945_v4 = vmov 0.0   ;;  %v4064_v17 = vld [vmem:[%s4340_s16 + $0x10a] sm:$0xff] }
 0x22d   : > { %5973 = vst [vmem:[#allocation13_spill] sm:$0xff] %v5020_v41 }
 0x22e   : > { %2361 = vst.msk [vmem:[#allocation2 + $0x10] sm:$0xff] %vm2302_vm4, %v5945_v4 }
 0x22f   : > { %2362 = vst.msk [vmem:[#allocation2 + $0x18] sm:$0x3] %vm2359_vm5, %v5945_v4 }
 0x230   : > { %2358 = vst.msk [vmem:[#allocation2] sm:$0xff] %vm2302_vm4, %v5945_v4 }
 0x231   : > { %2360 = vst.msk [vmem:[#allocation2 + $0x8] sm:$0x3] %vm2359_vm5, %v5945_v4 }
 0x232   : > { %v1277_v45 = vpop.f32.mrf.mxu0  ;;  %2363 = vst.msk [vmem:[#allocation2 + $0x20] sm:$0xff] %vm2302_vm4, %v5945_v4 }
 0x233   : > { %v5025_v52 = vadd.f32 %v1277_v45, %v4794_v57  ;;  %v5047_v7 = vpop.f32.mrf.mxu3  ;;  %2364 = vst.msk [vmem:[#allocation2 + $0x28] sm:$0x3] %vm2359_vm5, %v5945_v4 }
 0x234   : > { %2365 = vst.msk [vmem:[#allocation2 + $0x30] sm:$0xff] %vm2302_vm4, %v5945_v4 }
 0x235   : > { %5974 = vst [vmem:[#allocation8_spill] sm:$0xff] %v5025_v52  ;;  %4083 = vmatmul.msk.bf16.gmra.mxu0 %vm377_vm2, %v2032_v51 }
 0x236   : > { %2366 = vst.msk [vmem:[#allocation2 + $0x38] sm:$0x3] %vm2359_vm5, %v5945_v4 }
 0x237   : > { %2367 = vst.msk [vmem:[#allocation2 + $0x40] sm:$0xff] %vm2302_vm4, %v5945_v4  ;;  %v2388_v18 = vld [vmem:[#allocation2] sm:$0xff] }
 0x238   : > { %2368 = vst.msk [vmem:[#allocation2 + $0x48] sm:$0x3] %vm2359_vm5, %v5945_v4  ;;  %v2401_v32 = vld [vmem:[#allocation2 + $0x1] sm:$0xff] }
 0x239   : > { %2369 = vst.msk [vmem:[#allocation2 + $0x50] sm:$0xff] %vm2302_vm4, %v5945_v4  ;;  %v2504_v42 = vld [vmem:[#allocation2 + $0x2] sm:$0xff] }
 0x23a   : > { %v1279_v25 = vpop.f32.mrf.mxu0  ;;  %2370 = vst.msk [vmem:[#allocation2 + $0x58] sm:$0x3] %vm2359_vm5, %v5945_v4 }
 0x23b   : > { %v5031_v11 = vadd.f32 %v1279_v25, %v4799_v40  ;;  %v5058_v16 = vpop.f32.mrf.mxu3  ;;  %2371 = vst.msk [vmem:[#allocation2 + $0x60] sm:$0xff] %vm2302_vm4, %v5945_v4 }
 0x23c   : > { %2372 = vst.msk [vmem:[#allocation2 + $0x68] sm:$0x3] %vm2359_vm5, %v5945_v4 }
 0x23d   : > { %5975 = vst [vmem:[#allocation14_spill] sm:$0xff] %v5031_v11 }
 0x23e   : > { %2373 = vst.msk [vmem:[#allocation2 + $0x70] sm:$0xff] %vm2302_vm4, %v5945_v4 }
 0x23f   : > { %2374 = vst.msk [vmem:[#allocation2 + $0x78] sm:$0x3] %vm2359_vm5, %v5945_v4 }
 0x240   : > { %2375 = vst.msk [vmem:[#allocation2 + $0x80] sm:$0xff] %vm2302_vm4, %v5945_v4 }
 0x241   : > { %2376 = vst.msk [vmem:[#allocation2 + $0x88] sm:$0x3] %vm2359_vm5, %v5945_v4 }
 0x242   : > { %v1282_v13 = vpop.f32.mrf.mxu0  ;;  %2377 = vst.msk [vmem:[#allocation2 + $0x90] sm:$0xff] %vm2302_vm4, %v5945_v4 }
 0x243   : > { %v5040_v57 = vadd.f32 %v1282_v13, %v4812_v5  ;;  %v5056_v5 = vpop.f32.mrf.mxu2  ;;  %v5071_v14 = vpop.f32.mrf.mxu3  ;;  %v4062_v13 = vld [vmem:[%s4340_s16 + $0xf2] sm:$0xff]  ;;  %2378 = vst.msk [vmem:[#allocation2 + $0x98] sm:$0x3] %vm2359_vm5, %v5945_v4  ;;  %v4068_v4 = vld [vmem:[%s4340_s16 + $0x13a] sm:$0xff] }
 0x245   : > { %5976 = vst [vmem:[#allocation15_spill] sm:$0xff] %v5040_v57  ;;  %4084 = vmatmul.msk.bf16.gmra.mxu0 %vm377_vm2, %v2033_v15 }
 0x24a   : > { %v1284_v40 = vpop.f32.mrf.mxu0 }
 0x24b   : > { %v5050_v54 = vadd.f32 %v1284_v40, %v4817_v59  ;;  %v5066_v59 = vpop.f32.mrf.mxu2  ;;  %v5083_v25 = vpop.f32.mrf.mxu3  ;;  %v4063_v40 = vld [vmem:[%s4340_s16 + $0xfa] sm:$0xff] }
 0x24c   : > { %v2036_v36 = vpack.c.bf16 %v4063_v40, %v4062_v13 }
 0x24d   : > { %5977 = vst [vmem:[#allocation9_spill] sm:$0xff] %v5050_v54 }
 0x252   : > { %v1287_v29 = vpop.f32.mrf.mxu0 }
 0x253   : > { %v5061_v47 = vadd.f32 %v1287_v29, %v4831_v34  ;;  %v5075_v34 = vpop.f32.mrf.mxu1  ;;  %v5080_v45 = vpop.f32.mrf.mxu2 }
 0x255   : > { %5978 = vst [vmem:[#allocation11_spill] sm:$0xff] %v5061_v47  ;;  %4085 = vmatmul.msk.bf16.gmra.mxu0 %vm377_vm2, %v2034_v9 }
 0x25a   : > { %v1289_v38 = vpop.f32.mrf.mxu0 }
 0x25b   : > { %v5069_v48 = vadd.f32 %v1289_v38, %v4837_v49  ;;  %v5088_v23 = vpop.f32.mrf.mxu1  ;;  %v5090_v15 = vpop.f32.mrf.mxu2 }
 0x25d   : > { %5979 = vst [vmem:[#allocation16_spill] sm:$0xff] %v5069_v48 }
 0x262   : > { %v1292_v30 = vpop.f32.mrf.mxu0 }
 0x263   : > { %v5078_v51 = vadd.f32 %v1292_v30, %v4851_v55  ;;  %v5094_v55 = vpop.f32.mrf.mxu3  ;;  %v5097_v9 = vpop.f32.mrf.mxu1 }
 0x264   : > { %v5099_v29 = vpop.f32.mrf.mxu2 }
 0x265   : > { %5980 = vst [vmem:[#allocation17_spill] sm:$0xff] %v5078_v51  ;;  %4086 = vmatmul.msk.bf16.gmra.mxu0 %vm377_vm2, %v2035_v37  ;;  %v4065_v37 = vld [vmem:[%s4340_s16 + $0x112] sm:$0xff] }
 0x266   : > { %v2037_v40 = vpack.c.bf16 %v4065_v37, %v4064_v17 }
 0x26a   : > { %v1294_v49 = vpop.f32.mrf.mxu0 }
 0x26b   : > { %v5086_v53 = vadd.f32 %v1294_v49, %v4861_v27  ;;  %v5101_v27 = vpop.f32.mrf.mxu3  ;;  %v5115_v49 = vld [vmem:[%s5933_s2] ss:$0 sm:$0xff]  ;;  %v5121_v13 = vpop.f32.mrf.mxu1 }
 0x26d   : > { %5981 = vst [vmem:[#allocation18_spill] sm:$0xff] %v5086_v53 }
 0x272   : > { %v2106_v35 = vpop.f32.mrf.mxu0 }
 0x273   : > { %v2186_v30 = vadd.f32 %v2106_v35, %v4874_v56  ;;  %v5133_v48 = vpop.f32.mrf.mxu3 }
 0x275   : > { %4087 = vmatmul.msk.bf16.gmra.mxu0 %vm377_vm2, %v2036_v36  ;;  %v5125_v36 = vpop.f32.mrf.mxu2  ;;  %v2222_v35 = vadd.f32 %v5115_v49, %v2186_v30 }
 0x277   : > { %v2254_v37 = vmax.f32 %v2222_v35, 0.0 }
 0x27a   : > { %v2108_v38 = vpop.f32.mrf.mxu0 }
 0x27d   : > { %v5157_v35 = vpop.f32.mrf.mxu2 }
 0x282   : > { %v2111_v56 = vpop.f32.mrf.mxu0 }
 0x283   : > { %v2188_v53 = vadd.f32 %v2111_v56, %v4899_v46  ;;  %v2187_v46 = vadd.f32 %v2108_v38, %v4886_v12  ;;  %v5152_v56 = vpop.f32.mrf.mxu1 }
 0x285   : > { %v2224_v17 = vadd.f32 %v5115_v49, %v2188_v53  ;;  %4088 = vmatmul.msk.bf16.gmra.mxu0 %vm377_vm2, %v2037_v40  ;;  %v2223_v12 = vadd.f32 %v5115_v49, %v2187_v46  ;;  %v4066_v46 = vld [vmem:[%s4340_s16 + $0x122] sm:$0xff]  ;;  %v5178_v54 = vpop.f32.mrf.mxu2 }
 0x287   : > { %v2256_v30 = vmax.f32 %v2224_v17, 0.0 }
 0x289   : > { %v2286_v53 = vmax.f32 %v2254_v37, %v2256_v30  ;;  %v5164_v37 = vpop.f32.mrf.mxu3  ;;  %v4067_v30 = vld [vmem:[%s4340_s16 + $0x12a] sm:$0xff] }
 0x28a   : > { %v2113_v40 = vpop.f32.mrf.mxu0 }
 0x28b   : > { %2303 = vst.msk [vmem:[#allocation4] sm:$0xff] %vm2302_vm4, %v2286_v53  ;;  %v2189_v38 = vadd.f32 %v2113_v40, %v4911_v21  ;;  %v2255_v53 = vmax.f32 %v2223_v12, 0.0  ;;  %v2038_v40 = vpack.c.bf16 %v4067_v30, %v4066_v46  ;;  %v5175_v47 = vpop.f32.mrf.mxu1 }
 0x28d   : > { %v2225_v17 = vadd.f32 %v5115_v49, %v2189_v38 }
 0x28f   : > { %v2257_v51 = vmax.f32 %v2225_v17, 0.0 }
 0x291   : > { %v2287_v21 = vmax.f32 %v2255_v53, %v2257_v51  ;;  %v5180_v12 = vpop.f32.mrf.mxu3  ;;  %v4069_v51 = vld [vmem:[%s4340_s16 + $0x142] sm:$0xff]  ;;  %v5188_v53 = vpop.f32.mrf.mxu2 }
 0x292   : > { %v2116_v38 = vpop.f32.mrf.mxu0  ;;  %5982 = vst [vmem:[#allocation19_spill] sm:$0xff] %v5180_v12 }
 0x293   : > { %2304 = vst.msk [vmem:[#allocation4 + $0x8] sm:$0xff] %vm2302_vm4, %v2287_v21  ;;  %v5185_v46 = vpop.f32.mrf.mxu1  ;;  %v2190_v30 = vadd.f32 %v2116_v38, %v4924_v1  ;;  %v2039_v21 = vpack.c.bf16 %v4069_v51, %v4068_v4 }
 0x295   : > { %4089 = vmatmul.msk.bf16.gmra.mxu0 %vm377_vm2, %v2038_v40  ;;  %v2226_v12 = vadd.f32 %v5115_v49, %v2190_v30 }
 0x297   : > { %v2258_v30 = vmax.f32 %v2226_v12, 0.0 }
 0x299   : > { %v5190_v40 = vpop.f32.mrf.mxu3 }
 0x29a   : > { %v2319_v17 = vld [vmem:[#allocation4] ss:$2 sm:$0xff]  ;;  %v2335_v11 = vld [vmem:[#allocation4 + $0x1] ss:$2 sm:$0xff]  ;;  %v2118_v57 = vpop.f32.mrf.mxu0  ;;  %5983 = vst [vmem:[#allocation20_spill] sm:$0xff] %v5190_v40 }
 0x29b   : > { %v2350_v52 = vmax.f32 %v2319_v17, %v2335_v11 }
 0x29d   : > { %2380 = vst.msk [vmem:[#allocation2 + $0x11] sm:$0xff] %vm2302_vm4, %v2350_v52 }
 0x2a2   : > { %v2121_v41 = vpop.f32.mrf.mxu0 }
 0x2a3   : > { %v2192_v11 = vadd.f32 %v2121_v41, %v4950_v24  ;;  %v2191_v24 = vadd.f32 %v2118_v57, %v4938_v43  ;;  %v5216_v43 = vpop.f32.mrf.mxu3 }
 0x2a4   : > { %v5194_v52 = vld [vmem:[#allocation2 + $0x11] sm:$0xff] }
 0x2a5   : > { %v5196_v17 = vld [vmem:[#allocation2 + $0x10] sm:$0xff]  ;;  %v2228_v1 = vadd.f32 %v5115_v49, %v2192_v11  ;;  %4090 = vmatmul.msk.bf16.gmra.mxu0 %vm377_vm2, %v2039_v21  ;;  %v2409_v4 = vpack.c.bf16 %v5194_v52, %v2401_v32  ;;  %v5209_v11 = vpop.f32.mrf.mxu1  ;;  %v5211_v32 = vpop.f32.mrf.mxu2 }
 0x2a6   : > { %v5198_v20 = vld [vmem:[#allocation2 + $0x12] sm:$0xff]  ;;  %v2396_v38 = vpack.c.bf16 %v5196_v17, %v2388_v18  ;;  %5984 = vst [vmem:[#allocation21_spill] sm:$0xff] %v5209_v11 }
 0x2a7   : > { %v2512_v51 = vpack.c.bf16 %v5198_v20, %v2504_v42  ;;  %v2260_v41 = vmax.f32 %v2228_v1, 0.0  ;;  %4096 = vmatmul.msk.bf16.vlgmr.msra.gmra.mxu1 %vm2302_vm4, %v2409_v4  ;;  %v2227_v42 = vadd.f32 %v5115_v49, %v2191_v24  ;;  %v4070_v1 = vld [vmem:[%s4340_s16 + $0x152] sm:$0xff]  ;;  %v4071_v4 = vld [vmem:[%s4340_s16 + $0x15a] sm:$0xff] }
 0x2a8   : > { %4100 = vmatmul.msk.bf16.vlgmr.msrb.gmra.mxu2 %vm2302_vm4, %v2396_v38  ;;  %v2040_v11 = vpack.c.bf16 %v4071_v4, %v4070_v1  ;;  %v1529_v1 = vadd.f32 %v5054_v44, %v4884_v10 }
 0x2a9   : > { %4105 = vmatmul.msk.bf16.vlgmr.msrb.gmra.mxu3 %vm2302_vm4, %v2512_v51  ;;  %v2288_v21 = vmax.f32 %v2258_v30, %v2260_v41  ;;  %v2259_v38 = vmax.f32 %v2227_v42, 0.0 }
 0x2aa   : > { %v2123_v18 = vpop.f32.mrf.mxu0 }
 0x2ab   : > { %2305 = vst.msk [vmem:[#allocation4 + $0x10] sm:$0xff] %vm2302_vm4, %v2288_v21  ;;  %v2193_v12 = vadd.f32 %v2123_v18, %v4960_v2  ;;  %v5227_v2 = vpop.f32.mrf.mxu3  ;;  %v1527_v21 = vadd.f32 %v5028_v61, %v4859_v19  ;;  %v1528_v19 = vadd.f32 %v5042_v33, %v4872_v62 }
 0x2ac   : > { %5985 = vst [vmem:[#allocation22_spill] sm:$0xff] %v5227_v2 }
 0x2ad   : > { %v2229_v57 = vadd.f32 %v5115_v49, %v2193_v12  ;;  %v5221_v41 = vpop.f32.mrf.mxu1  ;;  %v5224_v24 = vpop.f32.mrf.mxu2  ;;  %v1750_v18 = vadd.f32 %v5033_v26, %v1527_v21  ;;  %v4072_v26 = vld [vmem:[%s4340_s16 + $0x16a] sm:$0xff]  ;;  %v1751_v2 = vadd.f32 %v5045_v28, %v1528_v19 }
 0x2af   : > { %v2261_v51 = vmax.f32 %v2229_v57, 0.0  ;;  %v1972_v4 = vadd.f32 %v5035_v58, %v1750_v18  ;;  %v1973_v62 = vadd.f32 %v5047_v7, %v1751_v2 }
 0x2b1   : > { %v2289_v40 = vmax.f32 %v2259_v38, %v2261_v51  ;;  %v1752_v38 = vadd.f32 %v5056_v5, %v1529_v1  ;;  %v4073_v51 = vld [vmem:[%s4340_s16 + $0x172] sm:$0xff]  ;;  %v1530_v5 = vadd.f32 %v5064_v8, %v4897_v3 }
 0x2b2   : > { %v2126_v30 = vpop.f32.mrf.mxu0  ;;  %v2041_v44 = vpack.c.bf16 %v4073_v51, %v4072_v26 }
 0x2b3   : > { %2306 = vst.msk [vmem:[#allocation4 + $0x18] sm:$0xff] %vm2302_vm4, %v2289_v40  ;;  %v2194_v21 = vadd.f32 %v2126_v30, %v1972_v4  ;;  %v5246_v10 = vpop.f32.mrf.mxu3  ;;  %v1974_v58 = vadd.f32 %v5058_v16, %v1752_v38  ;;  %v1753_v33 = vadd.f32 %v5066_v59, %v1530_v5 }
 0x2b5   : > { %4091 = vmatmul.msk.bf16.gmra.mxu0 %vm377_vm2, %v2040_v11  ;;  %v5236_v11 = vpop.f32.mrf.mxu1  ;;  %v5241_v61 = vpop.f32.mrf.mxu2  ;;  %v1975_v19 = vadd.f32 %v5071_v14, %v1753_v33  ;;  %v1531_v33 = vadd.f32 %v5075_v34, %v4909_v60  ;;  %v1532_v60 = vadd.f32 %v5088_v23, %v4922_v39 }
 0x2ba   : > { %v2321_v42 = vld [vmem:[#allocation4 + $0x10] ss:$2 sm:$0xff]  ;;  %v2337_v12 = vld [vmem:[#allocation4 + $0x11] ss:$2 sm:$0xff]  ;;  %v2128_v57 = vpop.f32.mrf.mxu0 }
 0x2bb   : > { %v2351_v40 = vmax.f32 %v2321_v42, %v2337_v12  ;;  %v2230_v42 = vadd.f32 %v5115_v49, %v2194_v21  ;;  %v5273_v51 = vpop.f32.mrf.mxu3 }
 0x2bd   : > { %2381 = vst.msk [vmem:[#allocation2 + $0x21] sm:$0xff] %vm2302_vm4, %v2351_v40  ;;  %v5268_v59 = vpop.f32.mrf.mxu1  ;;  %v2262_v2 = vmax.f32 %v2230_v42, 0.0  ;;  %v2195_v40 = vadd.f32 %v2128_v57, %v1973_v62  ;;  %v5270_v38 = vpop.f32.mrf.mxu2 }
 0x2c2   : > { %v2131_v18 = vpop.f32.mrf.mxu0 }
 0x2c3   : > { %v2196_v12 = vadd.f32 %v2131_v18, %v1974_v58  ;;  %v2231_v58 = vadd.f32 %v5115_v49, %v2195_v40  ;;  %v5283_v14 = vpop.f32.mrf.mxu3 }
 0x2c4   : > { %v5254_v1 = vld [vmem:[#allocation2 + $0x21] sm:$0xff] }
 0x2c5   : > { %v5256_v30 = vld [vmem:[#allocation2 + $0x20] sm:$0xff]  ;;  %v2232_v16 = vadd.f32 %v5115_v49, %v2196_v12  ;;  %4092 = vmatmul.msk.bf16.gmra.mxu0 %vm377_vm2, %v2041_v44  ;;  %v2263_v18 = vmax.f32 %v2231_v58, 0.0  ;;  %v5278_v42 = vpop.f32.mrf.mxu1  ;;  %v5280_v62 = vpop.f32.mrf.mxu2 }
 0x2c6   : > { %v5258_v28 = vld [vmem:[#allocation2 + $0x22] sm:$0xff] }
 0x2c7   : > { %v2264_v4 = vmax.f32 %v2232_v16, 0.0 }
 0x2c9   : > { %v2290_v26 = vmax.f32 %v2262_v2, %v2264_v4  ;;  %v1754_v2 = vadd.f32 %v5080_v45, %v1531_v33  ;;  %v4076_v45 = vld [vmem:[%s4340_s16 + $0x19a] sm:$0xff] }
 0x2ca   : > { %v2133_v21 = vpop.f32.mrf.mxu0 }
 0x2cb   : > { %2307 = vst.msk [vmem:[#allocation4 + $0x20] sm:$0xff] %vm2302_vm4, %v2290_v26  ;;  %v2197_v44 = vadd.f32 %v2133_v21, %v1975_v19  ;;  %v1533_v26 = vadd.f32 %v5097_v9, %v4936_v50  ;;  %v5301_v34 = vpop.f32.mrf.mxu3  ;;  %v1755_v50 = vadd.f32 %v5090_v15, %v1532_v60 }
 0x2cd   : > { %v2233_v5 = vadd.f32 %v5115_v49, %v2197_v44  ;;  %v5292_v21 = vpop.f32.mrf.mxu1  ;;  %v5294_v44 = vpop.f32.mrf.mxu2 }
 0x2cf   : > { %v2265_v12 = vmax.f32 %v2233_v5, 0.0  ;;  %v1976_v5 = vadd.f32 %v5083_v25, %v1754_v2  ;;  %v1534_v25 = vadd.f32 %v5121_v13, %v4948_v0 }
 0x2d1   : > { %v2291_v57 = vmax.f32 %v2263_v18, %v2265_v12  ;;  %v4077_v18 = vld [vmem:[%s4340_s16 + $0x1a2] sm:$0xff]  ;;  %v1757_v39 = vadd.f32 %v5125_v36, %v1534_v25 }
 0x2d2   : > { %v2136_v16 = vpop.f32.mrf.mxu0 }
 0x2d3   : > { %2308 = vst.msk [vmem:[#allocation4 + $0x28] sm:$0xff] %vm2302_vm4, %v2291_v57  ;;  %v2198_v12 = vadd.f32 %v2136_v16, %v1976_v5  ;;  %v2043_v57 = vpack.c.bf16 %v4077_v18, %v4076_v45  ;;  %v1979_v60 = vadd.f32 %v5133_v48, %v1757_v39  ;;  %v1535_v48 = vadd.f32 %v5152_v56, %v4958_v63 }
 0x2d4   : > { %v1536_v63 = vadd.f32 %v5175_v47, %v4967_v22 }
 0x2d5   : > { %4093 = vmatmul.msk.bf16.gmra.mxu0 %vm377_vm2, %v4933_v31  ;;  %v1756_v31 = vadd.f32 %v5099_v29, %v1533_v26  ;;  %v2234_v29 = vadd.f32 %v5115_v49, %v2198_v12  ;;  %v5318_v15 = vpop.f32.mrf.mxu1  ;;  %v5334_v36 = vpop.f32.mrf.mxu2  ;;  %v1758_v39 = vadd.f32 %v5157_v35, %v1535_v48  ;;  %v5988_v48 = vld [vmem:[#allocation21_spill] sm:$0xff] }
 0x2d6   : > { %v1759_v35 = vadd.f32 %v5178_v54, %v1536_v63 }
 0x2d7   : > { %v1978_v9 = vadd.f32 %v5101_v27, %v1756_v31  ;;  %v2266_v26 = vmax.f32 %v2234_v29, 0.0  ;;  %v5340_v31 = vpop.f32.mrf.mxu3 }
 0x2da   : > { %v2323_v40 = vld [vmem:[#allocation4 + $0x20] ss:$2 sm:$0xff]  ;;  %v2339_v4 = vld [vmem:[#allocation4 + $0x21] ss:$2 sm:$0xff]  ;;  %v2138_v19 = vpop.f32.mrf.mxu0 }
 0x2db   : > { %v2352_v58 = vmax.f32 %v2323_v40, %v2339_v4  ;;  %v1977_v40 = vadd.f32 %v5094_v55, %v1755_v50 }
 0x2dd   : > { %2382 = vst.msk [vmem:[#allocation2 + $0x31] sm:$0xff] %vm2302_vm4, %v2352_v58  ;;  %v2199_v58 = vadd.f32 %v2138_v19, %v1977_v40 }
 0x2df   : > { %v2235_v12 = vadd.f32 %v5115_v49, %v2199_v58 }
 0x2e2   : > { %v2141_v33 = vpop.f32.mrf.mxu0 }
 0x2e3   : > { %v2200_v2 = vadd.f32 %v2141_v33, %v1978_v9  ;;  %v5348_v9 = vpop.f32.mrf.mxu1  ;;  %v5350_v33 = vpop.f32.mrf.mxu2 }
 0x2e4   : > { %v5312_v23 = vld [vmem:[#allocation2 + $0x31] sm:$0xff] }
 0x2e5   : > { %v5314_v4 = vld [vmem:[#allocation2 + $0x30] sm:$0xff]  ;;  %v2236_v27 = vadd.f32 %v5115_v49, %v2200_v2  ;;  %4094 = vmatmul.msk.bf16.gmra.mxu0 %vm377_vm2, %v2043_v57  ;;  %v5324_v0 = vpack.c.bf16 %v5312_v23, %v5254_v1  ;;  %v2267_v57 = vmax.f32 %v2235_v12, 0.0  ;;  %v5352_v2 = vpop.f32.mrf.mxu3 }
 0x2e6   : > { %v5316_v16 = vld [vmem:[#allocation2 + $0x32] sm:$0xff]  ;;  %v5328_v55 = vpack.c.bf16 %v5314_v4, %v5256_v30 }
 0x2e7   : > { %v5332_v13 = vpack.c.bf16 %v5316_v16, %v5258_v28  ;;  %v2268_v5 = vmax.f32 %v2236_v27, 0.0  ;;  %4097 = vmatmul.msk.bf16.gmra.mxu1 %vm2302_vm4, %v5324_v0 }
 0x2e8   : > { %4101 = vmatmul.msk.bf16.gmra.mxu2 %vm2302_vm4, %v5328_v55 }
 0x2e9   : > { %4106 = vmatmul.msk.bf16.gmra.mxu3 %vm2302_vm4, %v5332_v13  ;;  %v2292_v45 = vmax.f32 %v2266_v26, %v2268_v5 }
 0x2ea   : > { %v2143_v18 = vpop.f32.mrf.mxu0 }
 0x2eb   : > { %2309 = vst.msk [vmem:[#allocation4 + $0x30] sm:$0xff] %vm2302_vm4, %v2292_v45  ;;  %v2201_v19 = vadd.f32 %v2143_v18, %v1979_v60  ;;  %v5358_v27 = vpop.f32.mrf.mxu1  ;;  %v5360_v26 = vpop.f32.mrf.mxu2  ;;  %v1537_v45 = vadd.f32 %v5185_v46, %v4974_v6 }
 0x2ed   : > { %v2237_v50 = vadd.f32 %v5115_v49, %v2201_v19  ;;  %v5364_v12 = vpop.f32.mrf.mxu3  ;;  %v1980_v19 = vadd.f32 %v5164_v37, %v1758_v39 }
 0x2ef   : > { %v2269_v25 = vmax.f32 %v2237_v50, 0.0  ;;  %v1760_v50 = vadd.f32 %v5188_v53, %v1537_v45  ;;  %v5989_v53 = vld [vmem:[#allocation19_spill] sm:$0xff] }
 0x2f1   : > { %v2293_v29 = vmax.f32 %v2267_v57, %v2269_v25  ;;  %v5986_v57 = vld [vmem:[#allocation20_spill] sm:$0xff] }
 0x2f2   : > { %v2146_v40 = vpop.f32.mrf.mxu0  ;;  %v1982_v25 = vadd.f32 %v5986_v57, %v1760_v50 }
 0x2f3   : > { %2310 = vst.msk [vmem:[#allocation4 + $0x38] sm:$0xff] %vm2302_vm4, %v2293_v29  ;;  %v2202_v56 = vadd.f32 %v2146_v40, %v1980_v19  ;;  %v5987_v29 = vld [vmem:[#allocation12_spill] sm:$0xff] }
 0x2f4   : > { %v1538_v6 = vadd.f32 %v5988_v48, %v5987_v29 }
 0x2f5   : > { %v2238_v37 = vadd.f32 %v5115_v49, %v2202_v56 }
 0x2f6   : > { %v1761_v45 = vadd.f32 %v5211_v32, %v1538_v6  ;;  %v5395_v32 = vpop.f32.mrf.mxu3 }
 0x2f7   : > { %v2270_v56 = vmax.f32 %v2238_v37, 0.0 }
 0x2fa   : > { %v2325_v58 = vld [vmem:[#allocation4 + $0x30] ss:$2 sm:$0xff]  ;;  %v2341_v5 = vld [vmem:[#allocation4 + $0x31] ss:$2 sm:$0xff]  ;;  %v2148_v60 = vpop.f32.mrf.mxu0 }
 0x2fb   : > { %v2353_v18 = vmax.f32 %v2325_v58, %v2341_v5  ;;  %v5375_v58 = vpop.f32.mrf.mxu1  ;;  %v1981_v5 = vadd.f32 %v5989_v53, %v1759_v35 }
 0x2fd   : > { %2383 = vst.msk [vmem:[#allocation2 + $0x41] sm:$0xff] %vm2302_vm4, %v2353_v18  ;;  %v5380_v18 = vpop.f32.mrf.mxu2  ;;  %v2203_v35 = vadd.f32 %v2148_v60, %v1981_v5 }
 0x2fe   : > { %v5405_v37 = vpop.f32.mrf.mxu3 }
 0x2ff   : > { %v2239_v6 = vadd.f32 %v5115_v49, %v2203_v35 }
 0x301   : > { %v2271_v63 = vmax.f32 %v2239_v6, 0.0  ;;  %v5991_v6 = vld [vmem:[#allocation6_spill] sm:$0xff] }
 0x302   : > { %v2151_v46 = vpop.f32.mrf.mxu0 }
 0x303   : > { %v2204_v39 = vadd.f32 %v2151_v46, %v1982_v25  ;;  %v1983_v25 = vadd.f32 %v5216_v43, %v1761_v45  ;;  %v5990_v43 = vld [vmem:[#allocation7_spill] sm:$0xff] }
 0x304   : > { %v5382_v22 = vld [vmem:[#allocation2 + $0x41] sm:$0xff]  ;;  %v1539_v45 = vadd.f32 %v5221_v41, %v5990_v43 }
 0x305   : > { %v5384_v54 = vld [vmem:[#allocation2 + $0x40] sm:$0xff]  ;;  %v2240_v40 = vadd.f32 %v5115_v49, %v2204_v39  ;;  %v5400_v39 = vpop.f32.mrf.mxu1  ;;  %v5403_v50 = vpop.f32.mrf.mxu2  ;;  %v4114_v41 = vld [vmem:[%s5934_s3 + $0x10] sm:$0xf] }
 0x306   : > { %v5386_v47 = vld [vmem:[#allocation2 + $0x42] sm:$0xff]  ;;  %v1762_v35 = vadd.f32 %v5224_v24, %v1539_v45  ;;  %v4119_v24 = vld [vmem:[%s5934_s3 + $0x14] sm:$0xf] }
 0x307   : > { %v2272_v57 = vmax.f32 %v2240_v40, 0.0  ;;  %v5993_v43 = vld [vmem:[#allocation10_spill] sm:$0xff] }
 0x308   : > { %v1540_v45 = vadd.f32 %v5236_v11, %v5993_v43  ;;  %v5994_v11 = vld [vmem:[#allocation13_spill] sm:$0xff] }
 0x309   : > { %v2294_v29 = vmax.f32 %v2270_v56, %v2272_v57  ;;  %v5415_v57 = vpop.f32.mrf.mxu3 }
 0x30a   : > { %v2153_v48 = vpop.f32.mrf.mxu0 }
 0x30b   : > { %2311 = vst.msk [vmem:[#allocation4 + $0x40] sm:$0xff] %vm2302_vm4, %v2294_v29  ;;  %v2205_v46 = vadd.f32 %v2153_v48, %v1983_v25 }
 0x30d   : > { %v2241_v53 = vadd.f32 %v5115_v49, %v2205_v46  ;;  %v5410_v40 = vpop.f32.mrf.mxu1  ;;  %v5412_v56 = vpop.f32.mrf.mxu2  ;;  %v5992_v46 = vld [vmem:[#allocation22_spill] sm:$0xff] }
 0x30f   : > { %v2273_v19 = vmax.f32 %v2241_v53, 0.0  ;;  %v1984_v53 = vadd.f32 %v5992_v46, %v1762_v35  ;;  %v1542_v46 = vadd.f32 %v5278_v42, %v5994_v11 }
 0x311   : > { %v2295_v60 = vmax.f32 %v2271_v63, %v2273_v19  ;;  %v1541_v19 = vadd.f32 %v5268_v59, %v5991_v6  ;;  %v2663_v59 = vsel %vm2427_vm3, %v4114_v41, 0 }
 0x312   : > { %v2156_v5 = vpop.f32.mrf.mxu0  ;;  %2672 = vmatpush.bf16.msra.mxu2 %v2663_v59 }
 0x313   : > { %2312 = vst.msk [vmem:[#allocation4 + $0x48] sm:$0xff] %vm2302_vm4, %v2295_v60  ;;  %v1764_v60 = vadd.f32 %v5270_v38, %v1541_v19  ;;  %v2206_v35 = vadd.f32 %v2156_v5, %v1984_v53  ;;  %v4109_v38 = vld [vmem:[%s5934_s3 + $0xc] sm:$0xf] }
 0x314   : > { %v2597_v6 = vsel %vm2427_vm3, %v4109_v38, 0 }
 0x315   : > { %v1986_v19 = vadd.f32 %v5273_v51, %v1764_v60  ;;  %2606 = vmatpush.bf16.msrb.mxu1 %v2597_v6  ;;  %v5442_v41 = vpop.f32.mrf.mxu2  ;;  %v2242_v53 = vadd.f32 %v5115_v49, %v2206_v35 }
 0x31a   : > { %v2327_v25 = vld [vmem:[#allocation4 + $0x40] ss:$2 sm:$0xff]  ;;  %v2343_v29 = vld [vmem:[#allocation4 + $0x41] ss:$2 sm:$0xff]  ;;  %v2158_v48 = vpop.f32.mrf.mxu0 }
 0x31b   : > { %v2354_v63 = vmax.f32 %v2327_v25, %v2343_v29  ;;  %v2729_v25 = vsel %vm2427_vm3, %v4119_v24, 0  ;;  %v1763_v29 = vadd.f32 %v5241_v61, %v1540_v45  ;;  %v1765_v61 = vadd.f32 %v5280_v62, %v1542_v46  ;;  %v5447_v45 = vpop.f32.mrf.mxu3 }
 0x31c   : > { %2738 = vmatpush.bf16.msra.mxu3 %v2729_v25  ;;  %v2274_v62 = vmax.f32 %v2242_v53, 0.0 }
 0x31d   : > { %2384 = vst.msk [vmem:[#allocation2 + $0x51] sm:$0xff] %vm2302_vm4, %v2354_v63  ;;  %v5438_v63 = vpop.f32.mrf.mxu1  ;;  %v1985_v43 = vadd.f32 %v5246_v10, %v1763_v29  ;;  %v1987_v6 = vadd.f32 %v5283_v14, %v1765_v61  ;;  %v5997_v14 = vld [vmem:[#allocation8_spill] sm:$0xff] }
 0x31e   : > { %v1543_v61 = vadd.f32 %v5292_v21, %v5997_v14 }
 0x31f   : > { %v2207_v38 = vadd.f32 %v2158_v48, %v1985_v43 }
 0x322   : > { %v2161_v5 = vpop.f32.mrf.mxu0 }
 0x323   : > { %v2208_v24 = vadd.f32 %v2161_v5, %v1986_v19 }
 0x324   : > { %v5449_v59 = vld [vmem:[#allocation2 + $0x51] sm:$0xff] }
 0x325   : > { %v5451_v51 = vld [vmem:[#allocation2 + $0x50] sm:$0xff]  ;;  %v2244_v42 = vadd.f32 %v5115_v49, %v2208_v24  ;;  %v5458_v25 = vpack.c.bf16 %v5449_v59, %v5382_v22  ;;  %v2440_v11 = vpop.f32.mrf.mxu1  ;;  %v2243_v24 = vadd.f32 %v5115_v49, %v2207_v38 }
 0x326   : > { %v5453_v60 = vld [vmem:[#allocation2 + $0x52] sm:$0xff]  ;;  %v5462_v35 = vpack.c.bf16 %v5451_v51, %v5384_v54 }
 0x327   : > { %5995 = vst [vmem:[#allocation20_spill] sm:$0xff] %v5458_v25  ;;  %v5466_v10 = vpack.c.bf16 %v5453_v60, %v5386_v47  ;;  %v2276_v29 = vmax.f32 %v2244_v42, 0.0  ;;  %4098 = vmatmul.msk.bf16.gmra.mxu1 %vm2302_vm4, %v5458_v25  ;;  %v2275_v8 = vmax.f32 %v2243_v24, 0.0 }
 0x328   : > { %4102 = vmatmul.msk.bf16.gmra.mxu2 %vm2302_vm4, %v5462_v35 }
 0x329   : > { %5996 = vst [vmem:[#allocation12_spill] sm:$0xff] %v5466_v10  ;;  %4107 = vmatmul.msk.bf16.gmra.mxu3 %vm2302_vm4, %v5466_v10  ;;  %v2296_v19 = vmax.f32 %v2274_v62, %v2276_v29  ;;  %v1766_v62 = vadd.f32 %v5294_v44, %v1543_v61 }
 0x32a   : > { %v2163_v46 = vpop.f32.mrf.mxu0 }
 0x32b   : > { %v2484_v5 = vpop.f32.mrf.mxu2  ;;  %2313 = vst.msk [vmem:[#allocation4 + $0x50] sm:$0xff] %vm2302_vm4, %v2296_v19  ;;  %v2209_v48 = vadd.f32 %v2163_v46, %v1987_v6  ;;  %v5998_v19 = vld [vmem:[#allocation15_spill] sm:$0xff] }
 0x32c   : > { %v2485_v53 = vadd.f32 %v2484_v5, %v2440_v11  ;;  %v2542_v43 = vpop.f32.mrf.mxu3  ;;  %v1545_v11 = vadd.f32 %v5348_v9, %v5998_v19  ;;  %v1988_v5 = vadd.f32 %v5301_v34, %v1766_v62 }
 0x32d   : > { %v2245_v42 = vadd.f32 %v5115_v49, %v2209_v48 }
 0x32e   : > { %v5478_v7 = vadd.f32 %v2542_v43, %v2485_v53  ;;  %v1768_v24 = vadd.f32 %v5350_v33, %v1545_v11  ;;  %v6000_v53 = vld [vmem:[#allocation9_spill] sm:$0xff] }
 0x32f   : > { %v2277_v3 = vmax.f32 %v2245_v42, 0.0  ;;  %v1546_v43 = vadd.f32 %v5358_v27, %v6000_v53  ;;  %v4129_v53 = vld [vmem:[%s5934_s3 + $0x1c] sm:$0xf] }
 0x330   : > { %v1990_v44 = vadd.f32 %v5352_v2, %v1768_v24 }
 0x331   : > { %v2297_v10 = vmax.f32 %v2275_v8, %v2277_v3  ;;  %v5999_v3 = vld [vmem:[#allocation14_spill] sm:$0xff]  ;;  %v1769_v33 = vadd.f32 %v5360_v26, %v1546_v43 }
 0x332   : > { %v2166_v25 = vpop.f32.mrf.mxu0  ;;  %v1544_v8 = vadd.f32 %v5318_v15, %v5999_v3 }
 0x333   : > { %2314 = vst.msk [vmem:[#allocation4 + $0x58] sm:$0xff] %vm2302_vm4, %v2297_v10  ;;  %v2210_v10 = vadd.f32 %v2166_v25, %v1988_v5 }
 0x334   : > { %v1767_v21 = vadd.f32 %v5334_v36, %v1544_v8  ;;  %v1991_v36 = vadd.f32 %v5364_v12, %v1769_v33  ;;  %v6002_v8 = vld [vmem:[#allocation17_spill] sm:$0xff] }
 0x335   : > { %v2246_v9 = vadd.f32 %v5115_v49, %v2210_v10  ;;  %v1549_v10 = vadd.f32 %v5410_v40, %v6002_v8  ;;  %v2862_v40 = vsel %vm2427_vm3, %v4129_v53, 0 }
 0x336   : > { %v1989_v34 = vadd.f32 %v5340_v31, %v1767_v21  ;;  %2871 = vmatpush.bf16.msrb.mxu2 %v2862_v40 }
 0x337   : > { %v2278_v61 = vmax.f32 %v2246_v9, 0.0 }
 0x33a   : > { %v2329_v38 = vld [vmem:[#allocation4 + $0x50] ss:$2 sm:$0xff]  ;;  %v2345_v29 = vld [vmem:[#allocation4 + $0x51] ss:$2 sm:$0xff]  ;;  %v2168_v6 = vpop.f32.mrf.mxu0 }
 0x33b   : > { %v2355_v46 = vmax.f32 %v2329_v38, %v2345_v29  ;;  %v2211_v15 = vadd.f32 %v2168_v6, %v1989_v34 }
 0x33d   : > { %2385 = vst.msk [vmem:[#allocation2 + $0x61] sm:$0xff] %vm2302_vm4, %v2355_v46  ;;  %v2247_v38 = vadd.f32 %v5115_v49, %v2211_v15  ;;  %v6001_v46 = vld [vmem:[#allocation11_spill] sm:$0xff]  ;;  %v5532_v15 = vpop.f32.mrf.mxu2 }
 0x33e   : > { %v1547_v6 = vadd.f32 %v5375_v58, %v6001_v46  ;;  %v4134_v58 = vld [vmem:[%s5934_s3 + $0x20] sm:$0xf] }
 0x33f   : > { %v2279_v19 = vmax.f32 %v2247_v38, 0.0  ;;  %v2928_v9 = vsel %vm2427_vm3, %v4134_v58, 0 }
 0x340   : > { %v1770_v12 = vadd.f32 %v5380_v18, %v1547_v6  ;;  %v6003_v18 = vld [vmem:[#allocation16_spill] sm:$0xff]  ;;  %2937 = vmatpush.bf16.msrb.mxu3 %v2928_v9 }
 0x341   : > { %v1548_v43 = vadd.f32 %v5400_v39, %v6003_v18  ;;  %v6004_v39 = vld [vmem:[#allocation18_spill] sm:$0xff] }
 0x342   : > { %v2171_v48 = vpop.f32.mrf.mxu0 }
 0x343   : > { %v2212_v42 = vadd.f32 %v2171_v48, %v1990_v44  ;;  %v1992_v44 = vadd.f32 %v5395_v32, %v1770_v12  ;;  %v1772_v48 = vadd.f32 %v5412_v56, %v1549_v10  ;;  %v4124_v32 = vld [vmem:[%s5934_s3 + $0x18] sm:$0xf]  ;;  %v1771_v34 = vadd.f32 %v5403_v50, %v1548_v43 }
 0x344   : > { %v2394_v38 = vld [vmem:[#allocation2 + $0x60] sm:$0xff] }
 0x345   : > { %v2248_v14 = vadd.f32 %v5115_v49, %v2212_v42  ;;  %v2796_v42 = vsel %vm2427_vm3, %v4124_v32, 0  ;;  %v1994_v33 = vadd.f32 %v5415_v57, %v1772_v48 }
 0x346   : > { %2805 = vmatpush.bf16.msra.mxu1 %v2796_v42 }
 0x347   : > { %v2280_v25 = vmax.f32 %v2248_v14, 0.0  ;;  %v5528_v14 = vpop.f32.mrf.mxu1 }
 0x349   : > { %v2298_v62 = vmax.f32 %v2278_v61, %v2280_v25  ;;  %v1550_v61 = vadd.f32 %v5438_v63, %v6004_v39 }
 0x34a   : > { %v2173_v2 = vpop.f32.mrf.mxu0 }
 0x34b   : > { %2315 = vst.msk [vmem:[#allocation4 + $0x60] sm:$0xff] %vm2302_vm4, %v2298_v62  ;;  %v2213_v27 = vadd.f32 %v2173_v2, %v1991_v36  ;;  %v2407_v2 = vld [vmem:[#allocation2 + $0x61] sm:$0xff]  ;;  %v1773_v50 = vadd.f32 %v5442_v41, %v1550_v61 }
 0x34d   : > { %v2249_v29 = vadd.f32 %v5115_v49, %v2213_v27  ;;  %v2510_v27 = vld [vmem:[#allocation2 + $0x62] sm:$0xff]  ;;  %v1995_v41 = vadd.f32 %v5447_v45, %v1773_v50  ;;  %v6005_v45 = vpack.c.bf16 %v5256_v30, %v5196_v17  ;;  %v6008_v17 = vpack.c.bf16 %v5384_v54, %v5314_v4 }
 0x34e   : > { %v2646_v30 = vpack.c.bf16 %v2407_v2, %v5449_v59 }
 0x34f   : > { %v2281_v31 = vmax.f32 %v2249_v29, 0.0  ;;  %v1993_v29 = vadd.f32 %v5405_v37, %v1771_v34  ;;  %v4232_v37 = vld [vmem:[%s5936_s5 + $0x18] sm:$0xff] }
 0x350   : > { %3251 = vmatpush.bf16.msrb.mxu0 %v4232_v37 }
 0x351   : > { %v2299_v11 = vmax.f32 %v2279_v19, %v2281_v31  ;;  %v5537_v19 = vpop.f32.mrf.mxu3 }
 0x352   : > { %v2176_v26 = vpop.f32.mrf.mxu0 }
 0x353   : > { %2316 = vst.msk [vmem:[#allocation4 + $0x68] sm:$0xff] %vm2302_vm4, %v2299_v11  ;;  %v2214_v56 = vadd.f32 %v2176_v26, %v1992_v44 }
 0x355   : > { %v2250_v36 = vadd.f32 %v5115_v49, %v2214_v56  ;;  %v6006_v56 = vpack.c.bf16 %v5254_v1, %v5194_v52  ;;  %v6009_v52 = vpack.c.bf16 %v5382_v22, %v5312_v23  ;;  %v2580_v1 = vpack.c.bf16 %v2394_v38, %v5451_v51 }
 0x357   : > { %v2282_v12 = vmax.f32 %v2250_v36, 0.0 }
 0x35a   : > { %v2331_v5 = vld [vmem:[#allocation4 + $0x60] ss:$2 sm:$0xff]  ;;  %v2347_v24 = vld [vmem:[#allocation4 + $0x61] ss:$2 sm:$0xff]  ;;  %v2178_v3 = vpop.f32.mrf.mxu0 }
 0x35b   : > { %v2356_v21 = vmax.f32 %v2331_v5, %v2347_v24  ;;  %v2215_v5 = vadd.f32 %v2178_v3, %v1993_v29  ;;  %v2908_v29 = vld [vmem:[#allocation2 + $0x92] sm:$0xff] }
 0x35d   : > { %2386 = vst.msk [vmem:[#allocation2 + $0x71] sm:$0xff] %vm2302_vm4, %v2356_v21  ;;  %v2251_v44 = vadd.f32 %v5115_v49, %v2215_v5  ;;  %v4230_v5 = vld [vmem:[%s5936_s5 + $0x8] sm:$0xff] }
 0x35f   : > { %v2283_v40 = vmax.f32 %v2251_v44, 0.0 }
 0x362   : > { %v2181_v25 = vpop.f32.mrf.mxu0 }
 0x363   : > { %v2216_v62 = vadd.f32 %v2181_v25, %v1994_v33 }
 0x364   : > { %v2408_v57 = vld [vmem:[#allocation2 + $0x71] sm:$0xff]  ;;  %v2445_v10 = vpop.f32.mrf.mxu1 }
 0x365   : > { %v2395_v31 = vld [vmem:[#allocation2 + $0x70] sm:$0xff]  ;;  %v2252_v63 = vadd.f32 %v5115_v49, %v2216_v62  ;;  %v5540_v26 = vpack.c.bf16 %v2408_v57, %v2407_v2 }
 0x366   : > { %v2511_v11 = vld [vmem:[#allocation2 + $0x72] sm:$0xff]  ;;  %v5542_v46 = vpack.c.bf16 %v2395_v31, %v2394_v38 }
 0x367   : > { %v5544_v6 = vpack.c.bf16 %v2511_v11, %v2510_v27  ;;  %v2284_v24 = vmax.f32 %v2252_v63, 0.0  ;;  %4099 = vmatmul.msk.bf16.gmra.mxu1 %vm2302_vm4, %v5540_v26  ;;  %v6011_v2 = vld [vmem:[#allocation20_spill] sm:$0xff] }
 0x368   : > { %4103 = vmatmul.msk.bf16.gmra.mxu2 %vm2302_vm4, %v5542_v46  ;;  %v6012_v38 = vld [vmem:[#allocation12_spill] sm:$0xff] }
 0x369   : > { %4108 = vmatmul.msk.bf16.gmra.mxu3 %vm2302_vm4, %v5544_v6  ;;  %v2300_v8 = vmax.f32 %v2282_v12, %v2284_v24 }
 0x36a   : > { %v2183_v21 = vpop.f32.mrf.mxu0 }
 0x36b   : > { %v2489_v3 = vpop.f32.mrf.mxu2  ;;  %2317 = vst.msk [vmem:[#allocation4 + $0x70] sm:$0xff] %vm2302_vm4, %v2300_v8  ;;  %v2217_v48 = vadd.f32 %v2183_v21, %v1995_v41 }
 0x36c   : > { %v2490_v53 = vadd.f32 %v2489_v3, %v2445_v10  ;;  %v2547_v58 = vpop.f32.mrf.mxu3  ;;  %v5593_v23 = vpop.f32.mrf.mxu1 }
 0x36d   : > { %v2253_v18 = vadd.f32 %v5115_v49, %v2217_v48  ;;  %v6007_v49 = vpack.c.bf16 %v5258_v28, %v5198_v20  ;;  %v6010_v20 = vpack.c.bf16 %v5386_v47, %v5316_v16  ;;  %v2712_v28 = vpack.c.bf16 %v2510_v27, %v5453_v60 }
 0x36e   : > { %v5559_v43 = vadd.f32 %v2547_v58, %v2490_v53 }
 0x36f   : > { %v2285_v9 = vmax.f32 %v2253_v18, 0.0 }
 0x371   : > { %v2301_v32 = vmax.f32 %v2283_v40, %v2285_v9 }
 0x373   : > { %2318 = vst.msk [vmem:[#allocation4 + $0x78] sm:$0xff] %vm2302_vm4, %v2301_v32  ;;  %v5595_v4 = vpop.f32.mrf.mxu2 }
 0x374   : > { %v5597_v47 = vpop.f32.mrf.mxu3 }
 0x377   : > { %4110 = vmatmul.msk.bf16.vlgmr.msrb.gmra.mxu1 %vm2302_vm4, %v6005_v45 }
 0x378   : > { %4115 = vmatmul.msk.bf16.vlgmr.msra.gmra.mxu2 %vm2302_vm4, %v6006_v56  ;;  %3072 = vmatpush.bf16.msrb.mxu1 %v4230_v5 }
 0x379   : > { %4120 = vmatmul.msk.bf16.vlgmr.msra.gmra.mxu3 %vm2302_vm4, %v6007_v49 }
 0x37a   : > { %v2333_v42 = vld [vmem:[#allocation4 + $0x70] ss:$2 sm:$0xff]  ;;  %v2349_v34 = vld [vmem:[#allocation4 + $0x71] ss:$2 sm:$0xff] }
 0x37b   : > { %v2357_v33 = vmax.f32 %v2333_v42, %v2349_v34  ;;  %v6013_v34 = vmov 0.0  }
 0x37c   : > { %2991 = vst.msk [vmem:[#allocation3 + $0x10] sm:$0xff] %vm2987_vm6, %v6013_v34 }
 0x37d   : > { %2387 = vst.msk [vmem:[#allocation2 + $0x81] sm:$0xff] %vm2302_vm4, %v2357_v33 }
 0x37e   : > { %2992 = vst.msk [vmem:[#allocation3 + $0x18] sm:$0x3] %vm2989_vm7, %v6013_v34 }
 0x37f   : > { %2988 = vst.msk [vmem:[#allocation3] sm:$0xff] %vm2987_vm6, %v6013_v34 }
 0x380   : > { %2990 = vst.msk [vmem:[#allocation3 + $0x8] sm:$0x3] %vm2989_vm7, %v6013_v34 }
 0x381   : > { %2993 = vst.msk [vmem:[#allocation3 + $0x20] sm:$0xff] %vm2987_vm6, %v6013_v34 }
 0x382   : > { %2994 = vst.msk [vmem:[#allocation3 + $0x28] sm:$0x3] %vm2989_vm7, %v6013_v34 }
 0x383   : > { %2995 = vst.msk [vmem:[#allocation3 + $0x30] sm:$0xff] %vm2987_vm6, %v6013_v34 }
 0x384   : > { %v2577_v22 = vld [vmem:[#allocation2 + $0x80] sm:$0xff]  ;;  %2996 = vst.msk [vmem:[#allocation3 + $0x38] sm:$0x3] %vm2989_vm7, %v6013_v34 }
 0x385   : > { %v2643_v16 = vld [vmem:[#allocation2 + $0x81] sm:$0xff]  ;;  %v2581_v51 = vpack.c.bf16 %v2577_v22, %v2395_v31  ;;  %2997 = vst.msk [vmem:[#allocation3 + $0x40] sm:$0xff] %vm2987_vm6, %v6013_v34 }
 0x386   : > { %v2709_v54 = vld [vmem:[#allocation2 + $0x82] sm:$0xff]  ;;  %v2647_v39 = vpack.c.bf16 %v2643_v16, %v2408_v57  ;;  %2998 = vst.msk [vmem:[#allocation3 + $0x48] sm:$0x3] %vm2989_vm7, %v6013_v34 }
 0x387   : > { %4111 = vmatmul.msk.bf16.gmra.mxu1 %vm2302_vm4, %v6008_v17  ;;  %v2713_v59 = vpack.c.bf16 %v2709_v54, %v2511_v11  ;;  %v2912_v11 = vpack.c.bf16 %v2908_v29, %v2709_v54  ;;  %v4229_v17 = vld [vmem:[%s5936_s5] sm:$0xff]  ;;  %2999 = vst.msk [vmem:[#allocation3 + $0x50] sm:$0xff] %vm2987_vm6, %v6013_v34  ;;  %v2487_v54 = vadd.f32 %v5532_v15, %v5528_v14 }
 0x388   : > { %4116 = vmatmul.msk.bf16.gmra.mxu2 %vm2302_vm4, %v6009_v52  ;;  %3000 = vst.msk [vmem:[#allocation3 + $0x58] sm:$0x3] %vm2989_vm7, %v6013_v34 }
 0x389   : > { %4121 = vmatmul.msk.bf16.gmra.mxu3 %vm2302_vm4, %v6010_v20  ;;  %3119 = vmatpush.bf16.msra.mxu2 %v4229_v17  ;;  %v4231_v20 = vld [vmem:[%s5936_s5 + $0x10] sm:$0xff]  ;;  %3001 = vst.msk [vmem:[#allocation3 + $0x60] sm:$0xff] %vm2987_vm6, %v6013_v34  ;;  %v2563_v14 = vadd.f32 %v5537_v19, %v2487_v54 }
 0x38a   : > { %3181 = vmatpush.bf16.msra.mxu3 %v4231_v20  ;;  %3002 = vst.msk [vmem:[#allocation3 + $0x68] sm:$0x3] %vm2989_vm7, %v6013_v34 }
 0x38b   : > { %3003 = vst.msk [vmem:[#allocation3 + $0x70] sm:$0xff] %vm2987_vm6, %v6013_v34 }
 0x38c   : > { %3004 = vst.msk [vmem:[#allocation3 + $0x78] sm:$0x3] %vm2989_vm7, %v6013_v34 }
 0x38d   : > { %3005 = vst.msk [vmem:[#allocation3 + $0x80] sm:$0xff] %vm2987_vm6, %v6013_v34 }
 0x38e   : > { %3006 = vst.msk [vmem:[#allocation3 + $0x88] sm:$0x3] %vm2989_vm7, %v6013_v34 }
 0x38f   : > { %3007 = vst.msk [vmem:[#allocation3 + $0x90] sm:$0xff] %vm2987_vm6, %v6013_v34 }
 0x390   : > { %3008 = vst.msk [vmem:[#allocation3 + $0x98] sm:$0x3] %vm2989_vm7, %v6013_v34  ;;  %v3018_v34 = vld [vmem:[#allocation3] sm:$0xff] }
 0x397   : > { %4112 = vmatmul.msk.bf16.gmra.mxu1 %vm2302_vm4, %v2580_v1 }
 0x398   : > { %4117 = vmatmul.msk.bf16.gmra.mxu2 %vm2302_vm4, %v2646_v30 }
 0x399   : > { %4122 = vmatmul.msk.bf16.gmra.mxu3 %vm2302_vm4, %v2712_v28 }
 0x3a4   : > { %v2450_v60 = vpop.f32.mrf.mxu1 }
 0x3a7   : > { %4113 = vmatmul.msk.bf16.gmra.mxu1 %vm2302_vm4, %v2581_v51 }
 0x3a8   : > { %4118 = vmatmul.msk.bf16.gmra.mxu2 %vm2302_vm4, %v2647_v39 }
 0x3a9   : > { %4123 = vmatmul.msk.bf16.gmra.mxu3 %vm2302_vm4, %v2713_v59 }
 0x3ab   : > { %v2494_v61 = vpop.f32.mrf.mxu2 }
 0x3ac   : > { %v2495_v25 = vadd.f32 %v2494_v61, %v2450_v60  ;;  %v2552_v36 = vpop.f32.mrf.mxu3 }
 0x3ae   : > { %v5602_v62 = vadd.f32 %v2552_v36, %v2495_v25 }
 0x3b4   : > { %v5626_v27 = vpop.f32.mrf.mxu3 }
 0x3b7   : > { %4125 = vmatmul.msk.bf16.vlgmr.msra.gmra.mxu1 %vm2302_vm4, %v5328_v55  ;;  %v5624_v55 = vpop.f32.mrf.mxu2 }
 0x3b8   : > { %4130 = vmatmul.msk.bf16.vlgmr.msrb.gmra.mxu2 %vm2302_vm4, %v5324_v0  ;;  %v5622_v0 = vpop.f32.mrf.mxu1 }
 0x3b9   : > { %4135 = vmatmul.msk.bf16.vlgmr.msrb.gmra.mxu3 %vm2302_vm4, %v5332_v13  ;;  %v2776_v13 = vld [vmem:[#allocation2 + $0x90] sm:$0xff] }
 0x3ba   : > { %v2780_v57 = vpack.c.bf16 %v2776_v13, %v2577_v22  ;;  %v5734_v13 = vld [vmem:[%s5935_s4] ss:$0 sm:$0xff] }
 0x3c7   : > { %4126 = vmatmul.msk.bf16.gmra.mxu1 %vm2302_vm4, %v5462_v35  ;;  %v2842_v35 = vld [vmem:[#allocation2 + $0x91] sm:$0xff] }
 0x3c8   : > { %4131 = vmatmul.msk.bf16.gmra.mxu2 %vm2302_vm4, %v6011_v2  ;;  %v2846_v31 = vpack.c.bf16 %v2842_v35, %v2643_v16 }
 0x3c9   : > { %4136 = vmatmul.msk.bf16.gmra.mxu3 %vm2302_vm4, %v6012_v38 }
 0x3d7   : > { %4127 = vmatmul.msk.bf16.gmra.mxu1 %vm2302_vm4, %v5542_v46 }
 0x3d8   : > { %4132 = vmatmul.msk.bf16.gmra.mxu2 %vm2302_vm4, %v5540_v26 }
 0x3d9   : > { %4137 = vmatmul.msk.bf16.gmra.mxu3 %vm2302_vm4, %v5544_v6 }
 0x3e4   : > { %v2455_v50 = vpop.f32.mrf.mxu1 }
 0x3e7   : > { %4128 = vmatmul.msk.bf16.gmra.mxu1 %vm2302_vm4, %v2780_v57 }
 0x3e8   : > { %4133 = vmatmul.msk.bf16.gmra.mxu2 %vm2302_vm4, %v2846_v31 }
 0x3e9   : > { %4138 = vmatmul.msk.bf16.gmra.mxu3 %vm2302_vm4, %v2912_v11 }
 0x3eb   : > { %v2499_v63 = vpop.f32.mrf.mxu2 }
 0x3ec   : > { %v2500_v26 = vadd.f32 %v2499_v63, %v2455_v50  ;;  %v2557_v46 = vpop.f32.mrf.mxu3  ;;  %v5631_v6 = vpop.f32.mrf.mxu1  ;;  %v2492_v63 = vadd.f32 %v5595_v4, %v5593_v23  ;;  %v3141_v23 = vld [vmem:[#allocation3 + $0x2] sm:$0xff] }
 0x3ee   : > { %v5633_v12 = vadd.f32 %v2557_v46, %v2500_v26 }
 0x3f3   : > { %v5638_v24 = vpop.f32.mrf.mxu2 }
 0x3f4   : > { %v5640_v37 = vpop.f32.mrf.mxu3  ;;  %v2608_v41 = vpop.f32.mrf.mxu1 }
 0x3f5   : > { %v2628_v22 = vadd.f32 %v2608_v41, %v5478_v7  ;;  %v4233_v7 = vld [vmem:[%s5936_s5 + $0x20] sm:$0xff] }
 0x3f6   : > { %3321 = vmatpush.bf16.msra.mxu1 %v4233_v7 }
 0x3fb   : > { %v2674_v8 = vpop.f32.mrf.mxu2 }
 0x3fc   : > { %v2740_v10 = vpop.f32.mrf.mxu3  ;;  %v2610_v21 = vpop.f32.mrf.mxu1  ;;  %v2694_v51 = vadd.f32 %v2674_v8, %v2628_v22 }
 0x3fd   : > { %v2629_v60 = vadd.f32 %v2610_v21, %v2563_v14  ;;  %v2565_v21 = vadd.f32 %v5597_v47, %v2492_v63 }
 0x3fe   : > { %v2760_v15 = vadd.f32 %v2740_v10, %v2694_v51 }
 0x403   : > { %v2676_v3 = vpop.f32.mrf.mxu2 }
 0x404   : > { %v2742_v44 = vpop.f32.mrf.mxu3  ;;  %v5642_v48 = vpop.f32.mrf.mxu1  ;;  %v2695_v36 = vadd.f32 %v2676_v3, %v2629_v60 }
 0x405   : > { %v2630_v19 = vadd.f32 %v5642_v48, %v5559_v43  ;;  %v3032_v48 = vld [vmem:[#allocation3 + $0x1] sm:$0xff] }
 0x406   : > { %v2761_v50 = vadd.f32 %v2742_v44, %v2695_v36 }
 0x40b   : > { %v5644_v53 = vpop.f32.mrf.mxu2 }
 0x40c   : > { %v5646_v58 = vpop.f32.mrf.mxu3  ;;  %v5648_v18 = vpop.f32.mrf.mxu1  ;;  %v2696_v46 = vadd.f32 %v5644_v53, %v2630_v19 }
 0x40d   : > { %v2631_v44 = vadd.f32 %v5648_v18, %v2565_v21 }
 0x40e   : > { %v2762_v3 = vadd.f32 %v5646_v58, %v2696_v46 }
 0x413   : > { %v5650_v40 = vpop.f32.mrf.mxu2 }
 0x414   : > { %v5652_v9 = vpop.f32.mrf.mxu3  ;;  %v5654_v32 = vpop.f32.mrf.mxu1  ;;  %v2697_v53 = vadd.f32 %v5650_v40, %v2631_v44  ;;  %v4234_v44 = vld [vmem:[%s5936_s5 + $0x28] sm:$0xff] }
 0x415   : > { %3391 = vmatpush.bf16.msrb.mxu2 %v4234_v44 }
 0x416   : > { %v2763_v40 = vadd.f32 %v5652_v9, %v2697_v53 }
 0x41b   : > { %v5656_v45 = vpop.f32.mrf.mxu2 }
 0x41c   : > { %v5658_v56 = vpop.f32.mrf.mxu3  ;;  %v5660_v49 = vpop.f32.mrf.mxu1 }
 0x423   : > { %v5662_v42 = vpop.f32.mrf.mxu2 }
 0x424   : > { %v5666_v33 = vpop.f32.mrf.mxu3  ;;  %v5673_v52 = vpop.f32.mrf.mxu1 }
 0x42b   : > { %v5690_v1 = vpop.f32.mrf.mxu2 }
 0x42c   : > { %v5694_v30 = vpop.f32.mrf.mxu3  ;;  %v5698_v28 = vpop.f32.mrf.mxu1 }
 0x433   : > { %v5713_v16 = vpop.f32.mrf.mxu2 }
 0x434   : > { %v5719_v39 = vpop.f32.mrf.mxu3  ;;  %v2807_v59 = vpop.f32.mrf.mxu1 }
 0x435   : > { %v2827_v61 = vadd.f32 %v2807_v59, %v2760_v15 }
 0x43b   : > { %v2873_v25 = vpop.f32.mrf.mxu2 }
 0x43c   : > { %v2893_v2 = vadd.f32 %v2873_v25, %v2827_v61  ;;  %v2939_v38 = vpop.f32.mrf.mxu3  ;;  %v2809_v35 = vpop.f32.mrf.mxu1  ;;  %v2632_v61 = vadd.f32 %v5654_v32, %v5602_v62 }
 0x43d   : > { %v2828_v11 = vadd.f32 %v2809_v35, %v2761_v50 }
 0x43e   : > { %v2959_v29 = vadd.f32 %v2939_v38, %v2893_v2  ;;  %v2497_v2 = vadd.f32 %v5624_v55, %v5622_v0 }
 0x440   : > { %v2971_v57 = vadd.f32 %v5734_v13, %v2959_v29  ;;  %v2698_v29 = vadd.f32 %v5656_v45, %v2632_v61  ;;  %v2567_v62 = vadd.f32 %v5626_v27, %v2497_v2 }
 0x442   : > { %v2979_v31 = vmax.f32 %v2971_v57, 0.0  ;;  %v2764_v32 = vadd.f32 %v5658_v56, %v2698_v29  ;;  %v2633_v0 = vadd.f32 %v5660_v49, %v2567_v62 }
 0x443   : > { %v2875_v26 = vpop.f32.mrf.mxu2 }
 0x444   : > { %3010 = vst.msk [vmem:[#allocation3 + $0x11] sm:$0xff] %vm2987_vm6, %v2979_v31  ;;  %v2894_v5 = vadd.f32 %v2875_v26, %v2828_v11  ;;  %v2941_v41 = vpop.f32.mrf.mxu3  ;;  %v2812_v8 = vpop.f32.mrf.mxu1  ;;  %v2699_v46 = vadd.f32 %v5662_v42, %v2633_v0 }
 0x445   : > { %v2829_v17 = vadd.f32 %v2812_v8, %v2762_v3 }
 0x446   : > { %v2960_v10 = vadd.f32 %v2941_v41, %v2894_v5 }
 0x448   : > { %v2972_v43 = vadd.f32 %v5734_v13, %v2960_v10 }
 0x44a   : > { %v2980_v4 = vmax.f32 %v2972_v43, 0.0 }
 0x44b   : > { %v2878_v20 = vpop.f32.mrf.mxu2  ;;  %v5748_v22 = vld [vmem:[#allocation3 + $0x11] sm:$0xff] }
 0x44c   : > { %v3019_v54 = vld [vmem:[#allocation3 + $0x10] sm:$0xff]  ;;  %3011 = vst.msk [vmem:[#allocation3 + $0x21] sm:$0xff] %vm2987_vm6, %v2980_v4  ;;  %v2895_v47 = vadd.f32 %v2878_v20, %v2829_v17  ;;  %v2944_v58 = vpop.f32.mrf.mxu3  ;;  %v3040_v7 = vpack.c.bf16 %v5748_v22, %v3032_v48  ;;  %v2814_v14 = vpop.f32.mrf.mxu1  ;;  %v4235_v48 = vld [vmem:[%s5936_s5 + $0x30] sm:$0xff]  ;;  %v2634_v4 = vadd.f32 %v5673_v52, %v5633_v12  ;;  %v2502_v20 = vadd.f32 %v5638_v24, %v5631_v6 }
 0x44d   : > { %v5750_v51 = vld [vmem:[#allocation3 + $0x12] sm:$0xff]  ;;  %v3026_v18 = vpack.c.bf16 %v3019_v54, %v3018_v34  ;;  %v2830_v36 = vadd.f32 %v2814_v14, %v2763_v40  ;;  %v2765_v34 = vadd.f32 %v5666_v33, %v2699_v46  ;;  %3462 = vmatpush.bf16.msrb.mxu3 %v4235_v48 }
 0x44e   : > { %v3149_v59 = vpack.c.bf16 %v5750_v51, %v3141_v23  ;;  %v2961_v15 = vadd.f32 %v2944_v58, %v2895_v47  ;;  %4145 = vmatmul.msk.bf16.vlgmr.msrb.gmra.mxu1 %vm2987_vm6, %v3040_v7  ;;  %v2700_v58 = vadd.f32 %v5690_v1, %v2634_v4  ;;  %v4236_v12 = vld [vmem:[%s5936_s5 + $0x38] sm:$0xff]  ;;  %v2569_v52 = vadd.f32 %v5640_v37, %v2502_v20 }
 0x44f   : > { %4153 = vmatmul.msk.bf16.vlgmr.msra.gmra.mxu2 %vm2987_vm6, %v3026_v18  ;;  %3532 = vmatpush.bf16.msra.mxu0 %v4236_v12 }
 0x450   : > { %4163 = vmatmul.msk.bf16.vlgmr.msra.gmra.mxu3 %vm2987_vm6, %v3149_v59  ;;  %v2973_v60 = vadd.f32 %v5734_v13, %v2961_v15  ;;  %v2766_v6 = vadd.f32 %v5694_v30, %v2700_v58  ;;  %v2635_v1 = vadd.f32 %v5698_v28, %v2569_v52 }
 0x452   : > { %v2981_v25 = vmax.f32 %v2973_v60, 0.0 }
 0x453   : > { %v2880_v38 = vpop.f32.mrf.mxu2  ;;  %v3212_v35 = vld [vmem:[#allocation3 + $0x20] sm:$0xff] }
 0x454   : > { %3012 = vst.msk [vmem:[#allocation3 + $0x31] sm:$0xff] %vm2987_vm6, %v2981_v25  ;;  %v2896_v50 = vadd.f32 %v2880_v38, %v2830_v36  ;;  %v2946_v57 = vpop.f32.mrf.mxu3  ;;  %v3219_v19 = vpack.c.bf16 %v3212_v35, %v3019_v54  ;;  %v2817_v9 = vpop.f32.mrf.mxu1  ;;  %v5771_v45 = vld [vmem:[#allocation3 + $0x21] sm:$0xff]  ;;  %v2701_v25 = vadd.f32 %v5713_v16, %v2635_v1  ;;  %v4237_v16 = vld [vmem:[%s5936_s5 + $0x40] sm:$0xff] }
 0x455   : > { %v2831_v63 = vadd.f32 %v2817_v9, %v2764_v32  ;;  %v5773_v26 = vld [vmem:[#allocation3 + $0x22] sm:$0xff]  ;;  %3602 = vmatpush.bf16.msrb.mxu1 %v4237_v16 }
 0x456   : > { %v2962_v31 = vadd.f32 %v2946_v57, %v2896_v50  ;;  %4173 = vmatmul.msk.bf16.vlgmr.msrb.gmra.mxu0 %vm2987_vm6, %v3219_v19  ;;  %v2767_v9 = vadd.f32 %v5719_v39, %v2701_v25 }
 0x458   : > { %v2974_v11 = vadd.f32 %v5734_v13, %v2962_v31 }
 0x45a   : > { %v2982_v55 = vmax.f32 %v2974_v11, 0.0 }
 0x45b   : > { %v2883_v5 = vpop.f32.mrf.mxu2  ;;  %v5776_v41 = vld [vmem:[#allocation3 + $0x31] sm:$0xff] }
 0x45c   : > { %v3021_v8 = vld [vmem:[#allocation3 + $0x30] sm:$0xff]  ;;  %3013 = vst.msk [vmem:[#allocation3 + $0x41] sm:$0xff] %vm2987_vm6, %v2982_v55  ;;  %v2897_v27 = vadd.f32 %v2883_v5, %v2831_v63  ;;  %v2949_v56 = vpop.f32.mrf.mxu3  ;;  %v5783_v49 = vpack.c.bf16 %v5776_v41, %v5771_v45  ;;  %v2819_v42 = vpop.f32.mrf.mxu1 }
 0x45d   : > { %v5778_v10 = vld [vmem:[#allocation3 + $0x32] sm:$0xff]  ;;  %v5785_v21 = vpack.c.bf16 %v3021_v8, %v3212_v35  ;;  %v2832_v53 = vadd.f32 %v2819_v42, %v2765_v34 }
 0x45e   : > { %v5789_v3 = vpack.c.bf16 %v5778_v10, %v5773_v26  ;;  %v2963_v43 = vadd.f32 %v2949_v56, %v2897_v27  ;;  %4146 = vmatmul.msk.bf16.gmra.mxu1 %vm2987_vm6, %v5783_v49 }
 0x45f   : > { %4154 = vmatmul.msk.bf16.gmra.mxu2 %vm2987_vm6, %v5785_v21 }
 0x460   : > { %4164 = vmatmul.msk.bf16.gmra.mxu3 %vm2987_vm6, %v5789_v3  ;;  %v2975_v23 = vadd.f32 %v5734_v13, %v2963_v43 }
 0x462   : > { %v2983_v17 = vmax.f32 %v2975_v23, 0.0 }
 0x463   : > { %v2885_v54 = vpop.f32.mrf.mxu2  ;;  %v3214_v47 = vld [vmem:[#allocation3 + $0x40] sm:$0xff] }
 0x464   : > { %3014 = vst.msk [vmem:[#allocation3 + $0x51] sm:$0xff] %vm2987_vm6, %v2983_v17  ;;  %v2898_v7 = vadd.f32 %v2885_v54, %v2832_v53  ;;  %v2951_v33 = vpop.f32.mrf.mxu3  ;;  %v3220_v18 = vpack.c.bf16 %v3214_v47, %v3021_v8  ;;  %v2822_v59 = vpop.f32.mrf.mxu1  ;;  %v3036_v60 = vld [vmem:[#allocation3 + $0x41] sm:$0xff]  ;;  %v3359_v53 = vpack.c.bf16 %v5773_v26, %v5750_v51 }
 0x465   : > { %v2833_v40 = vadd.f32 %v2822_v59, %v2766_v6  ;;  %v3145_v61 = vld [vmem:[#allocation3 + $0x42] sm:$0xff]  ;;  %v3290_v20 = vpack.c.bf16 %v3036_v60, %v5776_v41  ;;  %v3429_v41 = vld [vmem:[#allocation3 + $0x90] sm:$0xff] }
 0x466   : > { %v2964_v14 = vadd.f32 %v2951_v33, %v2898_v7  ;;  %4174 = vmatmul.msk.bf16.gmra.mxu0 %vm2987_vm6, %v3220_v18  ;;  %v3360_v54 = vpack.c.bf16 %v3145_v61, %v5778_v10 }
 0x468   : > { %v2976_v24 = vadd.f32 %v5734_v13, %v2964_v14 }
 0x46a   : > { %v2984_v15 = vmax.f32 %v2976_v24, 0.0 }
 0x46b   : > { %v2888_v36 = vpop.f32.mrf.mxu2  ;;  %v3037_v2 = vld [vmem:[#allocation3 + $0x51] sm:$0xff] }
 0x46c   : > { %v3023_v38 = vld [vmem:[#allocation3 + $0x50] sm:$0xff]  ;;  %3015 = vst.msk [vmem:[#allocation3 + $0x61] sm:$0xff] %vm2987_vm6, %v2984_v15  ;;  %v2899_v37 = vadd.f32 %v2888_v36, %v2833_v40  ;;  %v2954_v29 = vpop.f32.mrf.mxu3  ;;  %v3042_v30 = vpack.c.bf16 %v3037_v2, %v3036_v60  ;;  %v2824_v28 = vpop.f32.mrf.mxu1 }
 0x46d   : > { %v3146_v35 = vld [vmem:[#allocation3 + $0x52] sm:$0xff]  ;;  %v3028_v50 = vpack.c.bf16 %v3023_v38, %v3214_v47  ;;  %v2834_v32 = vadd.f32 %v2824_v28, %v2767_v9 }
 0x46e   : > { %v5821_v57 = vpack.c.bf16 %v3146_v35, %v3145_v61  ;;  %v2965_v19 = vadd.f32 %v2954_v29, %v2899_v37  ;;  %4147 = vmatmul.msk.bf16.gmra.mxu1 %vm2987_vm6, %v3042_v30  ;;  %v3499_v47 = vld [vmem:[#allocation3 + $0x91] sm:$0xff] }
 0x46f   : > { %4155 = vmatmul.msk.bf16.gmra.mxu2 %vm2987_vm6, %v3028_v50 }
 0x470   : > { %4165 = vmatmul.msk.bf16.gmra.mxu3 %vm2987_vm6, %v5821_v57  ;;  %v2977_v31 = vadd.f32 %v5734_v13, %v2965_v19 }
 0x472   : > { %v2985_v62 = vmax.f32 %v2977_v31, 0.0 }
 0x473   : > { %v2890_v11 = vpop.f32.mrf.mxu2  ;;  %v3216_v0 = vld [vmem:[#allocation3 + $0x60] sm:$0xff] }
 0x474   : > { %3016 = vst.msk [vmem:[#allocation3 + $0x71] sm:$0xff] %vm2987_vm6, %v2985_v62  ;;  %v2900_v55 = vadd.f32 %v2890_v11, %v2834_v32  ;;  %v3221_v63 = vpack.c.bf16 %v3216_v0, %v3023_v38  ;;  %v2956_v46 = vpop.f32.mrf.mxu3  ;;  %v3038_v56 = vld [vmem:[#allocation3 + $0x61] sm:$0xff]  ;;  %v3569_v32 = vld [vmem:[#allocation3 + $0x92] sm:$0xff] }
 0x475   : > { %v3147_v39 = vld [vmem:[#allocation3 + $0x62] sm:$0xff] }
 0x476   : > { %v2966_v5 = vadd.f32 %v2956_v46, %v2900_v55  ;;  %4175 = vmatmul.msk.bf16.gmra.mxu0 %vm2987_vm6, %v3221_v63  ;;  %v3361_v51 = vpack.c.bf16 %v3147_v39, %v3146_v35 }
 0x478   : > { %v2978_v8 = vadd.f32 %v5734_v13, %v2966_v5  ;;  %v3289_v13 = vpack.c.bf16 %v5771_v45, %v5748_v22  ;;  %v3291_v22 = vpack.c.bf16 %v3038_v56, %v3037_v2 }
 0x47a   : > { %v2986_v27 = vmax.f32 %v2978_v8, 0.0 }
 0x47b   : > { %v3039_v42 = vld [vmem:[#allocation3 + $0x71] sm:$0xff] }
 0x47c   : > { %v3025_v43 = vld [vmem:[#allocation3 + $0x70] sm:$0xff]  ;;  %3017 = vst.msk [vmem:[#allocation3 + $0x81] sm:$0xff] %vm2987_vm6, %v2986_v27  ;;  %v3043_v48 = vpack.c.bf16 %v3039_v42, %v3038_v56 }
 0x47d   : > { %v3148_v44 = vld [vmem:[#allocation3 + $0x72] sm:$0xff]  ;;  %v3029_v34 = vpack.c.bf16 %v3025_v43, %v3216_v0 }
 0x47e   : > { %v3152_v23 = vpack.c.bf16 %v3148_v44, %v3147_v39  ;;  %4148 = vmatmul.msk.bf16.gmra.mxu1 %vm2987_vm6, %v3043_v48 }
 0x47f   : > { %4156 = vmatmul.msk.bf16.gmra.mxu2 %vm2987_vm6, %v3029_v34 }
 0x480   : > { %4166 = vmatmul.msk.bf16.gmra.mxu3 %vm2987_vm6, %v3152_v23 }
 0x483   : > { %v3218_v4 = vld [vmem:[#allocation3 + $0x80] sm:$0xff] }
 0x484   : > { %v3222_v17 = vpack.c.bf16 %v3218_v4, %v3025_v43  ;;  %v3288_v45 = vld [vmem:[#allocation3 + $0x81] sm:$0xff] }
 0x485   : > { %v3358_v26 = vld [vmem:[#allocation3 + $0x82] sm:$0xff]  ;;  %v3292_v10 = vpack.c.bf16 %v3288_v45, %v3039_v42  ;;  %v3503_v58 = vpack.c.bf16 %v3499_v47, %v3288_v45 }
 0x486   : > { %4176 = vmatmul.msk.bf16.gmra.mxu0 %vm2987_vm6, %v3222_v17  ;;  %v3573_v63 = vpack.c.bf16 %v3569_v32, %v3358_v26 }
 0x48e   : > { %4183 = vmatmul.msk.bf16.vlgmr.msra.gmra.mxu1 %vm2987_vm6, %v3289_v13 }
 0x48f   : > { %4193 = vmatmul.msk.bf16.vlgmr.msrb.gmra.mxu2 %vm2987_vm6, %v3359_v53 }
 0x490   : > { %4203 = vmatmul.msk.bf16.vlgmr.msrb.gmra.mxu3 %vm2987_vm6, %v5785_v21  ;;  %v3433_v21 = vpack.c.bf16 %v3429_v41, %v3218_v4 }
 0x496   : > { %4213 = vmatmul.msk.bf16.vlgmr.msra.gmra.mxu0 %vm2987_vm6, %v5783_v49  ;;  %v3362_v49 = vpack.c.bf16 %v3358_v26, %v3148_v44 }
 0x49e   : > { %4184 = vmatmul.msk.bf16.gmra.mxu1 %vm2987_vm6, %v3290_v20 }
 0x49f   : > { %4194 = vmatmul.msk.bf16.gmra.mxu2 %vm2987_vm6, %v3360_v54 }
 0x4a0   : > { %4204 = vmatmul.msk.bf16.gmra.mxu3 %vm2987_vm6, %v3028_v50 }
 0x4a6   : > { %4214 = vmatmul.msk.bf16.gmra.mxu0 %vm2987_vm6, %v3042_v30 }
 0x4ae   : > { %4185 = vmatmul.msk.bf16.gmra.mxu1 %vm2987_vm6, %v3291_v22 }
 0x4af   : > { %4195 = vmatmul.msk.bf16.gmra.mxu2 %vm2987_vm6, %v3361_v51 }
 0x4b0   : > { %4205 = vmatmul.msk.bf16.gmra.mxu3 %vm2987_vm6, %v3029_v34 }
 0x4b6   : > { %4215 = vmatmul.msk.bf16.gmra.mxu0 %vm2987_vm6, %v3043_v48 }
 0x4be   : > { %4186 = vmatmul.msk.bf16.gmra.mxu1 %vm2987_vm6, %v3292_v10 }
 0x4bf   : > { %4196 = vmatmul.msk.bf16.gmra.mxu2 %vm2987_vm6, %v3362_v49 }
 0x4c0   : > { %4206 = vmatmul.msk.bf16.gmra.mxu3 %vm2987_vm6, %v3433_v21 }
 0x4c6   : > { %4216 = vmatmul.msk.bf16.gmra.mxu0 %vm2987_vm6, %v3503_v58 }
 0x4cb   : > { %v3074_v7 = vpop.f32.mrf.mxu1 }
 0x4ce   : > { %4223 = vmatmul.msk.bf16.vlgmr.msrb.gmra.mxu1 %vm2987_vm6, %v5789_v3 }
 0x4d2   : > { %v3121_v33 = vpop.f32.mrf.mxu2 }
 0x4d3   : > { %v3122_v18 = vadd.f32 %v3121_v33, %v3074_v7  ;;  %v3183_v59 = vpop.f32.mrf.mxu3  ;;  %v3076_v14 = vpop.f32.mrf.mxu1 }
 0x4d4   : > { %v3253_v12 = vpop.f32.mrf.mxu0 }
 0x4d5   : > { %v3203_v52 = vadd.f32 %v3183_v59, %v3122_v18 }
 0x4d7   : > { %v3273_v6 = vadd.f32 %v3253_v12, %v3203_v52 }
 0x4da   : > { %v3123_v24 = vpop.f32.mrf.mxu2 }
 0x4db   : > { %v3185_v1 = vpop.f32.mrf.mxu3  ;;  %v3079_v15 = vpop.f32.mrf.mxu1  ;;  %v3124_v21 = vadd.f32 %v3123_v24, %v3076_v14  ;;  %v5897_v14 = vld [vmem:[%s5937_s6] ss:$0 sm:$0xff] }
 0x4dc   : > { %v3255_v40 = vpop.f32.mrf.mxu0 }
 0x4dd   : > { %v3204_v58 = vadd.f32 %v3185_v1, %v3124_v21 }
 0x4de   : > { %4224 = vmatmul.msk.bf16.gmra.mxu1 %vm2987_vm6, %v5821_v57 }
 0x4df   : > { %v3274_v59 = vadd.f32 %v3255_v40, %v3204_v58 }
 0x4e2   : > { %v3126_v60 = vpop.f32.mrf.mxu2 }
 0x4e3   : > { %v3127_v61 = vadd.f32 %v3126_v60, %v3079_v15  ;;  %v3188_v25 = vpop.f32.mrf.mxu3  ;;  %v3081_v36 = vpop.f32.mrf.mxu1 }
 0x4e4   : > { %v3258_v2 = vpop.f32.mrf.mxu0 }
 0x4e5   : > { %v3205_v3 = vadd.f32 %v3188_v25, %v3127_v61 }
 0x4e7   : > { %v3275_v38 = vadd.f32 %v3258_v2, %v3205_v3 }
 0x4ea   : > { %v3128_v35 = vpop.f32.mrf.mxu2 }
 0x4eb   : > { %v5868_v37 = vpop.f32.mrf.mxu3  ;;  %v3084_v29 = vpop.f32.mrf.mxu1  ;;  %v3129_v25 = vadd.f32 %v3128_v35, %v3081_v36 }
 0x4ec   : > { %v5870_v30 = vpop.f32.mrf.mxu0 }
 0x4ed   : > { %v3206_v24 = vadd.f32 %v5868_v37, %v3129_v25 }
 0x4ee   : > { %4225 = vmatmul.msk.bf16.gmra.mxu1 %vm2987_vm6, %v3152_v23 }
 0x4ef   : > { %v3276_v36 = vadd.f32 %v5870_v30, %v3206_v24 }
 0x4f2   : > { %v3131_v50 = vpop.f32.mrf.mxu2 }
 0x4f3   : > { %v3132_v19 = vadd.f32 %v3131_v50, %v3084_v29  ;;  %v3193_v28 = vpop.f32.mrf.mxu3  ;;  %v5873_v16 = vpop.f32.mrf.mxu1 }
 0x4f4   : > { %v3263_v57 = vpop.f32.mrf.mxu0 }
 0x4f5   : > { %v3207_v9 = vadd.f32 %v3193_v28, %v3132_v19 }
 0x4f7   : > { %v3277_v31 = vadd.f32 %v3263_v57, %v3207_v9 }
 0x4fa   : > { %v5875_v62 = vpop.f32.mrf.mxu2 }
 0x4fb   : > { %v5877_v11 = vpop.f32.mrf.mxu3  ;;  %v3089_v0 = vpop.f32.mrf.mxu1 }
 0x4fc   : > { %v5879_v55 = vpop.f32.mrf.mxu0 }
 0x4fe   : > { %4226 = vmatmul.msk.bf16.gmra.mxu1 %vm2987_vm6, %v3573_v63 }
 0x502   : > { %v3136_v46 = vpop.f32.mrf.mxu2 }
 0x503   : > { %v3137_v5 = vadd.f32 %v3136_v46, %v3089_v0  ;;  %v3198_v8 = vpop.f32.mrf.mxu3  ;;  %v5882_v27 = vpop.f32.mrf.mxu1 }
 0x504   : > { %v3268_v39 = vpop.f32.mrf.mxu0 }
 0x505   : > { %v3209_v56 = vadd.f32 %v3198_v8, %v3137_v5 }
 0x507   : > { %v3279_v42 = vadd.f32 %v3268_v39, %v3209_v56  ;;  %v3134_v39 = vadd.f32 %v5875_v62, %v5873_v16 }
 0x50a   : > { %v5884_v17 = vpop.f32.mrf.mxu2 }
 0x50b   : > { %v3323_v43 = vpop.f32.mrf.mxu1  ;;  %v5886_v20 = vpop.f32.mrf.mxu3 }
 0x50c   : > { %v3343_v44 = vadd.f32 %v3323_v43, %v3273_v6  ;;  %v5888_v54 = vpop.f32.mrf.mxu0 }
 0x512   : > { %v3393_v22 = vpop.f32.mrf.mxu2 }
 0x513   : > { %v3325_v48 = vpop.f32.mrf.mxu1  ;;  %v3464_v45 = vpop.f32.mrf.mxu3  ;;  %v3413_v12 = vadd.f32 %v3393_v22, %v3343_v44 }
 0x514   : > { %v3534_v26 = vpop.f32.mrf.mxu0  ;;  %v3344_v52 = vadd.f32 %v3325_v48, %v3274_v59  ;;  %v3208_v48 = vadd.f32 %v5877_v11, %v3134_v39 }
 0x515   : > { %v3484_v6 = vadd.f32 %v3464_v45, %v3413_v12 }
 0x517   : > { %v3554_v2 = vadd.f32 %v3534_v26, %v3484_v6  ;;  %v3278_v26 = vadd.f32 %v5879_v55, %v3208_v48 }
 0x51a   : > { %v3395_v41 = vpop.f32.mrf.mxu2 }
 0x51b   : > { %v3328_v34 = vpop.f32.mrf.mxu1  ;;  %v3466_v47 = vpop.f32.mrf.mxu3  ;;  %v3414_v15 = vadd.f32 %v3395_v41, %v3344_v52  ;;  %v3139_v52 = vadd.f32 %v5884_v17, %v5882_v27 }
 0x51c   : > { %v3345_v23 = vadd.f32 %v3328_v34, %v3275_v38  ;;  %v3536_v33 = vpop.f32.mrf.mxu0 }
 0x51d   : > { %v3485_v3 = vadd.f32 %v3466_v47, %v3414_v15  ;;  %v3210_v15 = vadd.f32 %v5886_v20, %v3139_v52 }
 0x51f   : > { %v3555_v1 = vadd.f32 %v3536_v33, %v3485_v3 }
 0x522   : > { %v3398_v18 = vpop.f32.mrf.mxu2 }
 0x523   : > { %v3330_v4 = vpop.f32.mrf.mxu1  ;;  %v3469_v60 = vpop.f32.mrf.mxu3  ;;  %v3415_v35 = vadd.f32 %v3398_v18, %v3345_v23 }
 0x524   : > { %v3539_v38 = vpop.f32.mrf.mxu0 }
 0x525   : > { %v3486_v5 = vadd.f32 %v3469_v60, %v3415_v35 }
 0x52a   : > { %v3400_v29 = vpop.f32.mrf.mxu2 }
 0x52b   : > { %v3333_v13 = vpop.f32.mrf.mxu1  ;;  %v3471_v57 = vpop.f32.mrf.mxu3 }
 0x52c   : > { %v3347_v53 = vadd.f32 %v3333_v13, %v3277_v31  ;;  %v3346_v31 = vadd.f32 %v3330_v4, %v3276_v36  ;;  %v3541_v32 = vpop.f32.mrf.mxu0 }
 0x52e   : > { %v3416_v8 = vadd.f32 %v3400_v29, %v3346_v31 }
 0x530   : > { %v3487_v43 = vadd.f32 %v3471_v57, %v3416_v8 }
 0x532   : > { %v3403_v46 = vpop.f32.mrf.mxu2  ;;  %v3557_v34 = vadd.f32 %v3541_v32, %v3487_v43 }
 0x533   : > { %v3335_v51 = vpop.f32.mrf.mxu1  ;;  %v3474_v30 = vpop.f32.mrf.mxu3  ;;  %v3417_v41 = vadd.f32 %v3403_v46, %v3347_v53 }
 0x534   : > { %v3544_v23 = vpop.f32.mrf.mxu0  ;;  %v3348_v21 = vadd.f32 %v3335_v51, %v3278_v26 }
 0x535   : > { %v3488_v58 = vadd.f32 %v3474_v30, %v3417_v41 }
 0x537   : > { %v3558_v6 = vadd.f32 %v3544_v23, %v3488_v58 }
 0x53a   : > { %v3405_v4 = vpop.f32.mrf.mxu2 }
 0x53b   : > { %v3338_v10 = vpop.f32.mrf.mxu1  ;;  %v3476_v47 = vpop.f32.mrf.mxu3  ;;  %v3418_v33 = vadd.f32 %v3405_v4, %v3348_v21 }
 0x53c   : > { %v5890_v49 = vadd.f32 %v3338_v10, %v3279_v42  ;;  %v3556_v42 = vadd.f32 %v3539_v38, %v3486_v5  ;;  %v3546_v59 = vpop.f32.mrf.mxu0 }
 0x53d   : > { %v3489_v55 = vadd.f32 %v3476_v47, %v3418_v33 }
 0x53f   : > { %v3559_v51 = vadd.f32 %v3546_v59, %v3489_v55 }
 0x542   : > { %v3408_v12 = vpop.f32.mrf.mxu2 }
 0x543   : > { %v5892_v7 = vpop.f32.mrf.mxu1  ;;  %v3479_v60 = vpop.f32.mrf.mxu3  ;;  %v3419_v24 = vadd.f32 %v3408_v12, %v5890_v49 }
 0x544   : > { %v3549_v17 = vpop.f32.mrf.mxu0 }
 0x545   : > { %v3490_v36 = vadd.f32 %v3479_v60, %v3419_v24 }
 0x547   : > { %v3560_v32 = vadd.f32 %v3549_v17, %v3490_v36 }
 0x54b   : > { %v3604_v61 = vpop.f32.mrf.mxu1 }
 0x54c   : > { %v3624_v50 = vadd.f32 %v3604_v61, %v3554_v2 }
 0x54e   : > { %v3636_v19 = vadd.f32 %v5897_v14, %v3624_v50  ;;  %v3280_v50 = vadd.f32 %v5888_v54, %v3210_v15  ;;  %v3481_v54 = vpop.f32.mrf.mxu3 }
 0x550   : > { %v3644_v0 = vmax.f32 %v3636_v19, 0.0  ;;  %v3350_v20 = vadd.f32 %v5892_v7, %v3280_v50 }
 0x553   : > { %v3606_v40 = vpop.f32.mrf.mxu1 }
 0x554   : > { %v3625_v28 = vadd.f32 %v3606_v40, %v3555_v1  ;;  %v3410_v40 = vpop.f32.mrf.mxu2 }
 0x555   : > { %v3420_v35 = vadd.f32 %v3410_v40, %v3350_v20 }
 0x556   : > { %v3637_v9 = vadd.f32 %v5897_v14, %v3625_v28 }
 0x557   : > { %v3491_v49 = vadd.f32 %v3481_v54, %v3420_v35 }
 0x558   : > { %v3645_v63 = vmax.f32 %v3637_v9, 0.0 }
 0x55a   : > { %v3652_v56 = vmax.f32 %v3644_v0, %v3645_v63  ;;  %v3551_v63 = vpop.f32.mrf.mxu0 }
 0x55b   : > { %v3609_v37 = vpop.f32.mrf.mxu1  ;;  %v3561_v46 = vadd.f32 %v3551_v63, %v3491_v49 }
 0x55c   : > { %3656 = vst.msk [vmem:[#allocation5] sm:$0xff] %vm2302_vm4, %v3652_v56  ;;  %v3626_v44 = vadd.f32 %v3609_v37, %v3556_v42 }
 0x55e   : > { %v3638_v22 = vadd.f32 %v5897_v14, %v3626_v44 }
 0x560   : > { %v3646_v16 = vmax.f32 %v3638_v22, 0.0 }
 0x563   : > { %v3611_v13 = vpop.f32.mrf.mxu1 }
 0x564   : > { %v3627_v45 = vadd.f32 %v3611_v13, %v3557_v34 }
 0x566   : > { %v3639_v10 = vadd.f32 %v5897_v14, %v3627_v45 }
 0x568   : > { %v3647_v62 = vmax.f32 %v3639_v10, 0.0 }
 0x56a   : > { %v3653_v18 = vmax.f32 %v3646_v16, %v3647_v62 }
 0x56b   : > { %v3614_v11 = vpop.f32.mrf.mxu1 }
 0x56c   : > { %3657 = vst.msk [vmem:[#allocation5 + $0x8] sm:$0xff] %vm2302_vm4, %v3653_v18  ;;  %v3628_v53 = vadd.f32 %v3614_v11, %v3558_v6 }
 0x56e   : > { %v3640_v38 = vadd.f32 %v5897_v14, %v3628_v53 }
 0x570   : > { %v3648_v28 = vmax.f32 %v3640_v38, 0.0 }
 0x573   : > { %v3660_v61 = vld [vmem:[#allocation5] ss:$2 sm:$0xff]  ;;  %v3664_v25 = vld [vmem:[#allocation5 + $0x1] ss:$2 sm:$0xff]  ;;  %v3616_v2 = vpop.f32.mrf.mxu1 }
 0x574   : > { %v3667_v3 = vmax.f32 %v3660_v61, %v3664_v25  ;;  %v3629_v29 = vadd.f32 %v3616_v2, %v3559_v51 }
 0x576   : > { %v3671_v1 = vrot.slane %v3667_v3, 4  ;;  %v3641_v27 = vadd.f32 %v5897_v14, %v3629_v29 }
 0x578   : > { %v3675_v19 = vadd.f32 %v3671_v1, %v3667_v3  ;;  %v3649_v57 = vmax.f32 %v3641_v27, 0.0 }
 0x57a   : > { %3679 = vst [vmem:[#allocation1] ss:$2 sm:$0xff] %v3675_v19  ;;  %v3654_v9 = vmax.f32 %v3648_v28, %v3649_v57 }
 0x57b   : > { %v3619_v31 = vpop.f32.mrf.mxu1 }
 0x57c   : > { %3658 = vst.msk [vmem:[#allocation5 + $0x10] sm:$0xff] %vm2302_vm4, %v3654_v9  ;;  %v3630_v0 = vadd.f32 %v3619_v31, %v3560_v32 }
 0x57e   : > { %v3642_v7 = vadd.f32 %v5897_v14, %v3630_v0 }
 0x580   : > { %v3650_v37 = vmax.f32 %v3642_v7, 0.0 }
 0x583   : > { %v3621_v5 = vpop.f32.mrf.mxu1 }
 0x584   : > { %v3631_v8 = vadd.f32 %v3621_v5, %v3561_v46 }
 0x586   : > { %v3643_v56 = vadd.f32 %v5897_v14, %v3631_v8 }
 0x588   : > { %v3651_v39 = vmax.f32 %v3643_v56, 0.0 }
 0x58a   : > { %v3655_v42 = vmax.f32 %v3650_v37, %v3651_v39 }
 0x58c   : > { %3659 = vst.msk [vmem:[#allocation5 + $0x18] sm:$0xff] %vm2302_vm4, %v3655_v42 }
 0x593   : > { %v3662_v43 = vld [vmem:[#allocation5 + $0x10] ss:$2 sm:$0xff]  ;;  %v3666_v30 = vld [vmem:[#allocation5 + $0x11] ss:$2 sm:$0xff] }
 0x594   : > { %v3668_v44 = vmax.f32 %v3662_v43, %v3666_v30 }
 0x596   : > { %v3672_v48 = vrot.slane %v3668_v44, 4 }
 0x598   : > { %v3676_v34 = vadd.f32 %v3672_v48, %v3668_v44 }
 0x59a   : > { %3681 = vst [vmem:[#allocation1 + $0x1] ss:$2 sm:$0xff] %v3676_v34 }
 0x5a1   : > { %v3682_v23 = vld.sshfl [vmem:[#allocation1] sm:$0xff pattern:$0x75316420] }
 0x5a2   : > { %3684 = vst.msk [vmem:[#allocation5] sm:$0xff] %vm2302_vm4, %v3682_v23 }
 0x5a9   : > { %v3685_v4 = vld [vmem:[#allocation5] ss:$2 sm:$0xf]  ;;  %v3686_v13 = vld [vmem:[#allocation5 + $0x1] ss:$2 sm:$0xf] }
 0x5aa   : > { %v3687_v22 = vadd.f32 %v3686_v13, %v3685_v4 }
 0x5ac   : > { %v3688_v14 = vmul.f32 0.25, %v3687_v22 }
 0x5ae   : > { %3690 = vst.msk [vmem:[%s276_s30] sm:$0xf] %vm3689_vm8, %v3688_v14 }
 0x5af PF: > { %s17_s24 = sadd.s32 1, %s4260_s24  }
 0x5b0   : > { %p14_p4 = scmp.ge.s32.totalorder %s17_s24, 4  }
 0x5b2   :  { %16 = sbr.rel (!%p14_p4) target bundleno = 1 (0x1), region = 127 }

</bundles_post_ra>
